<compile_context>
chip_gen: v6e
topology: v6e:2x2x1
jax: 0.10.0
libtpu: 0.0.40
codegen_flags: <defaults>
</compile_context>

<pallas_src>
import math

import jax
import jax.numpy as jnp
import numpy as np
from jax.experimental import pallas as pl
from jax.experimental.pallas import tpu as pltpu

BN_EPS = 1e-5

_CONV_TAPS = [(dy - 1, dx - 1) for dy in range(3) for dx in range(3)]
_TCONV_TAPS = [(dy, dx) for dy in range(2) for dx in range(2)]


# ----------------------------------------------------------------------------
# Host-built 0/1 masks (tiny: O(H*W), not O((H*W)^2) like the old P/S matrices)
# ----------------------------------------------------------------------------
def _lane_coords(H, W, Bc):
    HW = H * W
    pos = np.arange(Bc * HW)
    return (pos % HW) // W, pos % W


def _conv_masks(H, W, Bc):
    """(3, 9, 1, m): boundary masks for the 3x3 convs at stride levels 1/2/4."""
    r, c = _lane_coords(H, W, Bc)
    m = r.shape[0]
    out = np.zeros((3, 9, 1, m), np.float32)
    for li, s in enumerate((1, 2, 4)):
        for k, (oy, ox) in enumerate(_CONV_TAPS):
            ok = ((r + s * oy >= 0) & (r + s * oy < H) &
                  (c + s * ox >= 0) & (c + s * ox < W))
            out[li, k, 0] = ok.astype(np.float32)
    return jnp.asarray(out)


def _tconv_masks(H, W, Bc):
    """(2, 4, 1, m): parity masks for ConvTranspose2d(2,2): level0 4->2, level1 2->1."""
    r, c = _lane_coords(H, W, Bc)
    m = r.shape[0]
    out = np.zeros((2, 4, 1, m), np.float32)
    for li, s in enumerate((4, 2)):
        half = s // 2
        for k, (dy, dx) in enumerate(_TCONV_TAPS):
            sel = ((r % s) == half * dy) & ((c % s) == half * dx)
            out[li, k, 0] = sel.astype(np.float32)
    return jnp.asarray(out)


# ----------------------------------------------------------------------------
# Fused kernel: whole forward per batch chunk, activations stay in registers
# ----------------------------------------------------------------------------
def _build_kernel(W, m):
    f32 = jnp.float32

    def kernel(x_ref, cmask_ref, pmask_ref,
               w_e1a, s_e1a, t_e1a, w_e1b, s_e1b, t_e1b,
               w_e2a, s_e2a, t_e2a, w_e2b, s_e2b, t_e2b,
               w_d2a, s_d2a, t_d2a, w_d2b, s_d2b, t_d2b, wt_d2, bt_d2,
               w_d1a, s_d1a, t_d1a, w_d1b, s_d1b, t_d1b, wt_d1, bt_d1,
               enc2_ref, dec1_ref):

        def conv3x3_bn_relu(x, s, li, w_ref, sc_ref, sh_ref):
            # x: (cin, m), valid on the stride-`s` spatial lattice.
            acc = None
            for k, (oy, ox) in enumerate(_CONV_TAPS):
                d = s * (oy * W + ox)
                shifted = pltpu.roll(x, shift=(-d) % m, axis=1) if d % m else x
                t = jnp.dot(w_ref[k], shifted * cmask_ref[li, k],
                            preferred_element_type=f32)
                acc = t if acc is None else acc + t
            # folded conv-bias + BatchNorm(eval) + ReLU
            return jnp.maximum(acc * sc_ref[...] + sh_ref[...], 0.0)

        def maxpool2x2(x, s):
            # stride-s lattice -> stride-2s lattice (valid lanes stay in place).
            z = jnp.maximum(x, pltpu.roll(x, shift=(-s) % m, axis=1))
            return jnp.maximum(z, pltpu.roll(z, shift=(-s * W) % m, axis=1))

        def conv_t2x2(x, s, ti, wt_ref, b_ref):
            # ConvTranspose2d(k=2, stride=2): stride-s lattice -> stride-s/2.
            half = s // 2
            out = None
            for k, (dy, dx) in enumerate(_TCONV_TAPS):
                tap = jnp.dot(wt_ref[k], x, preferred_element_type=f32)
                d = half * (dy * W + dx)
                if d % m:
                    tap = pltpu.roll(tap, shift=d % m, axis=1)
                tap = tap * pmask_ref[ti, k]
                out = tap if out is None else out + tap
            return out + b_ref[...]

        x = x_ref[0]                                            # (c1, m), dense

        # ---------------- encoder 1 (stride 1 -> 2) ----------------
        h = conv3x3_bn_relu(x, 1, 0, w_e1a, s_e1a, t_e1a)
        h = conv3x3_bn_relu(h, 1, 0, w_e1b, s_e1b, t_e1b)
        enc1 = maxpool2x2(h, 1)

        # ---------------- encoder 2 (stride 2 -> 4) ----------------
        h = conv3x3_bn_relu(enc1, 2, 1, w_e2a, s_e2a, t_e2a)
        h = conv3x3_bn_relu(h, 2, 1, w_e2b, s_e2b, t_e2b)
        enc2 = maxpool2x2(h, 2)
        enc2_ref[0] = enc2                                      # stride-4 lattice

        # ---------------- decoder 2 (stride 4 -> 2) ----------------
        h = conv3x3_bn_relu(enc2, 4, 2, w_d2a, s_d2a, t_d2a)
        h = conv3x3_bn_relu(h, 4, 2, w_d2b, s_d2b, t_d2b)
        dec2 = conv_t2x2(h, 4, 0, wt_d2, bt_d2)
        # F.upsample(dec2, enc1.size()[2:], 'bilinear') is the identity here:
        # dec2 and enc1 are both on the stride-2 lattice of the same size.
        # TODO(synk): a real bilinear resize is only needed if sizes ever differ.

        # ---------------- decoder 1 (stride 2 -> 1, dense) ----------------
        h = conv3x3_bn_relu(dec2, 2, 1, w_d1a, s_d1a, t_d1a)
        h = conv3x3_bn_relu(h, 2, 1, w_d1b, s_d1b, t_d1b)
        dec1_ref[0] = conv_t2x2(h, 2, 1, wt_d1, bt_d1)

    return kernel


# ----------------------------------------------------------------------------
# Module forward: one fused pallas_call + cheap XLA layout cosmetics outside
# ----------------------------------------------------------------------------
def semantic_module_forward(x_nchw, params):
    N, c1, H, W = x_nchw.shape
    assert H % 4 == 0 and W % 4 == 0, "spatial dims must be divisible by 4"
    c4 = 4 * c1
    HW = H * W

    # Batch chunking: 2 "parallel" grid steps when possible (v7x megacore split);
    # within a step the chunk's images are folded into the lane dim (big matmul N).
    G = 2 if (N >= 2 and N % 2 == 0) else 1
    Bc = N // G
    m = Bc * HW

    # NCHW -> (G, C, Bc*H*W): channel-major, folded batch+spatial lane-dense.
    x_k = x_nchw.reshape(G, Bc, c1, HW).transpose(0, 2, 1, 3).reshape(G, c1, m)

    cmasks = _conv_masks(H, W, Bc)      # (3, 9, 1, m)
    pmasks = _tconv_masks(H, W, Bc)     # (2, 4, 1, m)

    flat = [x_k, cmasks, pmasks]
    for name in ("enc1_c1", "enc1_c2", "enc2_c1", "enc2_c2", "dec2_c1", "dec2_c2"):
        flat += list(params[name])
    flat += list(params["dec2_t"])
    for name in ("dec1_c1", "dec1_c2"):
        flat += list(params[name])
    flat += list(params["dec1_t"])

    def _const_spec(a):
        nd = a.ndim
        return pl.BlockSpec(a.shape, lambda g, _nd=nd: (0,) * _nd)

    in_specs = [pl.BlockSpec((1, c1, m), lambda g: (g, 0, 0))]
    in_specs += [_const_spec(a) for a in flat[1:]]

    out_shapes = (
        jax.ShapeDtypeStruct((G, c4, m), jnp.float32),   # enc2 on stride-4 lattice
        jax.ShapeDtypeStruct((G, c1, m), jnp.float32),   # dec1, dense
    )
    out_specs = (
        pl.BlockSpec((1, c4, m), lambda g: (g, 0, 0)),
        pl.BlockSpec((1, c1, m), lambda g: (g, 0, 0)),
    )

    enc2_raw, dec1_raw = pl.pallas_call(
        _build_kernel(W, m),
        out_shape=out_shapes,
        grid=(G,),
        in_specs=in_specs,
        out_specs=out_specs,
        compiler_params=pltpu.CompilerParams(
            dimension_semantics=("parallel",),
            vmem_limit_bytes=32 * 1024 * 1024),
    )(*flat)

    # enc2.view(-1) in NCHW flatten order: extract the stride-4 lattice (XLA side).
    enc2 = enc2_raw.reshape(G, c4, Bc, H, W)[:, :, :, ::4, ::4]
    enc2_flat = jnp.transpose(enc2, (0, 2, 1, 3, 4)).reshape(-1)

    # dec1: dense (G, c1, Bc*H*W) -> (N, c1, H, W)
    dec1 = jnp.transpose(dec1_raw.reshape(G, c1, Bc, H, W),
                         (0, 2, 1, 3, 4)).reshape(N, c1, H, W)
    return enc2_flat, dec1


# ----------------------------------------------------------------------------
# Parameter initialization (deterministic, PyTorch-default-like, eval-mode BN)
# ----------------------------------------------------------------------------
def make_conv_bn_params(key, cin, cout):
    kw, kb = jax.random.split(key)
    bound = 1.0 / math.sqrt(cin * 9)
    w = jax.random.uniform(kw, (cout, cin, 3, 3), jnp.float32, -bound, bound)
    b = jax.random.uniform(kb, (cout,), jnp.float32, -bound, bound)
    gamma = jnp.ones((cout,), jnp.float32)
    beta = jnp.zeros((cout,), jnp.float32)
    rmean = jnp.zeros((cout,), jnp.float32)
    rvar = jnp.ones((cout,), jnp.float32)
    s = gamma / jnp.sqrt(rvar + BN_EPS)
    scale = s.reshape(cout, 1)
    shift = ((b - rmean) * s + beta).reshape(cout, 1)
    # tap-major weights for the transposed compute: w9[dy*3+dx][co, ci]
    w9 = jnp.transpose(w, (2, 3, 0, 1)).reshape(9, cout, cin)
    return w9, scale, shift


def make_convT_params(key, cin, cout):
    kw, kb = jax.random.split(key)
    bound = 1.0 / math.sqrt(cin * 4)
    w = jax.random.uniform(kw, (cin, cout, 2, 2), jnp.float32, -bound, bound)
    b = jax.random.uniform(kb, (cout,), jnp.float32, -bound, bound)
    wt4 = jnp.transpose(w, (2, 3, 1, 0)).reshape(4, cout, cin)   # [dy*2+dx, co, ci]
    return wt4, b.reshape(cout, 1)


def init_params(key, in_dim):
    ks = jax.random.split(key, 10)
    p = {}
    p["enc1_c1"] = make_conv_bn_params(ks[0], in_dim, in_dim * 2)
    p["enc1_c2"] = make_conv_bn_params(ks[1], in_dim * 2, in_dim * 2)
    p["enc2_c1"] = make_conv_bn_params(ks[2], in_dim * 2, in_dim * 4)
    p["enc2_c2"] = make_conv_bn_params(ks[3], in_dim * 4, in_dim * 4)
    p["dec2_c1"] = make_conv_bn_params(ks[4], in_dim * 4, in_dim * 2)
    p["dec2_c2"] = make_conv_bn_params(ks[5], in_dim * 2, in_dim * 2)
    p["dec2_t"] = make_convT_params(ks[6], in_dim * 2, in_dim * 2)
    p["dec1_c1"] = make_conv_bn_params(ks[7], in_dim * 2, in_dim)
    p["dec1_c2"] = make_conv_bn_params(ks[8], in_dim, in_dim)
    p["dec1_t"] = make_convT_params(ks[9], in_dim, in_dim)
    return p


# ----------------------------------------------------------------------------
# Pure-JAX (XLA) reference with the same folded-BN eval-mode math, for checking
# ----------------------------------------------------------------------------
def _reference_forward(x, params):
    hp = jax.lax.Precision.HIGHEST

    def conv_bn_relu(a, p):
        w9, scale, shift = p
        cout, cin = w9.shape[1], w9.shape[2]
        w = jnp.transpose(w9.reshape(3, 3, cout, cin), (2, 3, 0, 1))     # OIHW
        y = jax.lax.conv_general_dilated(
            a, w, window_strides=(1, 1), padding=((1, 1), (1, 1)),
            dimension_numbers=("NCHW", "OIHW", "NCHW"), precision=hp)
        y = y * scale.reshape(1, cout, 1, 1) + shift.reshape(1, cout, 1, 1)
        return jnp.maximum(y, 0.0)

    def maxpool(a):
        return jax.lax.reduce_window(a, -jnp.inf, jax.lax.max,
                                     (1, 1, 2, 2), (1, 1, 2, 2), "VALID")

    def conv_t(a, p):
        wt4, b = p                                     # (4, co, ci), (co, 1)
        cout, cin = wt4.shape[1], wt4.shape[2]
        w = wt4.reshape(2, 2, cout, cin)               # (dy, dx, co, ci)
        y = jnp.einsum("nihw,dkoi->nohdwk", a, w, precision=hp)
        n_, co, hh, _, ww, _ = y.shape
        return y.reshape(n_, co, 2 * hh, 2 * ww) + b.reshape(1, cout, 1, 1)

    enc1 = maxpool(conv_bn_relu(conv_bn_relu(x, params["enc1_c1"]), params["enc1_c2"]))
    enc2 = maxpool(conv_bn_relu(conv_bn_relu(enc1, params["enc2_c1"]), params["enc2_c2"]))
    d2 = conv_bn_relu(conv_bn_relu(enc2, params["dec2_c1"]), params["dec2_c2"])
    dec2 = conv_t(d2, params["dec2_t"])                 # same spatial size as enc1
    d1 = conv_bn_relu(conv_bn_relu(dec2, params["dec1_c1"]), params["dec1_c2"])
    dec1 = conv_t(d1, params["dec1_t"])
    return enc2.reshape(-1), dec1


if __name__ == "__main__":
    key = jax.random.PRNGKey(0)
    k_x, k_p = jax.random.split(key)

    N, in_dim, H, W = 2, 4, 16, 16
    x = jax.random.normal(k_x, (N, in_dim, H, W), jnp.float32)   # NCHW like PyTorch
    params = init_params(k_p, in_dim)

    fwd = jax.jit(lambda xx: semantic_module_forward(xx, params))
    enc2_flat, dec1 = fwd(x)
    jax.block_until_ready(enc2_flat)
    jax.block_until_ready(dec1)

    assert enc2_flat.shape == (N * in_dim * 4 * (H // 4) * (W // 4),)
    assert dec1.shape == (N, in_dim, H, W)

    # sanity-check against a pure-JAX reference (tolerance for MXU f32 rounding)
    ref_enc2, ref_dec1 = _reference_forward(x, params)
    np.testing.assert_allclose(np.asarray(enc2_flat), np.asarray(ref_enc2),
                               rtol=5e-2, atol=5e-2)
    np.testing.assert_allclose(np.asarray(dec1), np.asarray(ref_dec1),
                               rtol=5e-2, atol=5e-2)

    print("KERNEL_OK")
</pallas_src>

<mosaic_0001>
module attributes {stable_mosaic.version = 11 : i64} {
  func.func @kernel(%arg0: i32, %arg1: memref<1x4x256xf32, #tpu.memory_space<vmem>>, %arg2: memref<3x9x1x256xf32, #tpu.memory_space<vmem>>, %arg3: memref<2x4x1x256xf32, #tpu.memory_space<vmem>>, %arg4: memref<9x8x4xf32, #tpu.memory_space<vmem>>, %arg5: memref<8x1xf32, #tpu.memory_space<vmem>>, %arg6: memref<8x1xf32, #tpu.memory_space<vmem>>, %arg7: memref<9x8x8xf32, #tpu.memory_space<vmem>>, %arg8: memref<8x1xf32, #tpu.memory_space<vmem>>, %arg9: memref<8x1xf32, #tpu.memory_space<vmem>>, %arg10: memref<9x16x8xf32, #tpu.memory_space<vmem>>, %arg11: memref<16x1xf32, #tpu.memory_space<vmem>>, %arg12: memref<16x1xf32, #tpu.memory_space<vmem>>, %arg13: memref<9x16x16xf32, #tpu.memory_space<vmem>>, %arg14: memref<16x1xf32, #tpu.memory_space<vmem>>, %arg15: memref<16x1xf32, #tpu.memory_space<vmem>>, %arg16: memref<9x8x16xf32, #tpu.memory_space<vmem>>, %arg17: memref<8x1xf32, #tpu.memory_space<vmem>>, %arg18: memref<8x1xf32, #tpu.memory_space<vmem>>, %arg19: memref<9x8x8xf32, #tpu.memory_space<vmem>>, %arg20: memref<8x1xf32, #tpu.memory_space<vmem>>, %arg21: memref<8x1xf32, #tpu.memory_space<vmem>>, %arg22: memref<4x8x8xf32, #tpu.memory_space<vmem>>, %arg23: memref<8x1xf32, #tpu.memory_space<vmem>>, %arg24: memref<9x4x8xf32, #tpu.memory_space<vmem>>, %arg25: memref<4x1xf32, #tpu.memory_space<vmem>>, %arg26: memref<4x1xf32, #tpu.memory_space<vmem>>, %arg27: memref<9x4x4xf32, #tpu.memory_space<vmem>>, %arg28: memref<4x1xf32, #tpu.memory_space<vmem>>, %arg29: memref<4x1xf32, #tpu.memory_space<vmem>>, %arg30: memref<4x4x4xf32, #tpu.memory_space<vmem>>, %arg31: memref<4x1xf32, #tpu.memory_space<vmem>>, %arg32: memref<1x16x256xf32, #tpu.memory_space<vmem>>, %arg33: memref<1x4x256xf32, #tpu.memory_space<vmem>>) attributes {dimension_semantics = [#tpu.dimension_semantics<parallel>], iteration_bounds = array<i64: 2>, scalar_prefetch = 0 : i64, scratch_operands = 0 : i64, tpu.core_type = #tpu.core_type<tc>, window_params = [{transform_indices = @transform_0, window_bounds = array<i64: 1, 4, 256>}, {pipeline_mode = #tpu.pipeline_mode<synchronous>, transform_indices = @transform_1, window_bounds = array<i64: 3, 9, 1, 256>}, {pipeline_mode = #tpu.pipeline_mode<synchronous>, transform_indices = @transform_2, window_bounds = array<i64: 2, 4, 1, 256>}, {pipeline_mode = #tpu.pipeline_mode<synchronous>, transform_indices = @transform_3, window_bounds = array<i64: 9, 8, 4>}, {pipeline_mode = #tpu.pipeline_mode<synchronous>, transform_indices = @transform_4, window_bounds = array<i64: 8, 1>}, {pipeline_mode = #tpu.pipeline_mode<synchronous>, transform_indices = @transform_5, window_bounds = array<i64: 8, 1>}, {pipeline_mode = #tpu.pipeline_mode<synchronous>, transform_indices = @transform_6, window_bounds = array<i64: 9, 8, 8>}, {pipeline_mode = #tpu.pipeline_mode<synchronous>, transform_indices = @transform_7, window_bounds = array<i64: 8, 1>}, {pipeline_mode = #tpu.pipeline_mode<synchronous>, transform_indices = @transform_8, window_bounds = array<i64: 8, 1>}, {pipeline_mode = #tpu.pipeline_mode<synchronous>, transform_indices = @transform_9, window_bounds = array<i64: 9, 16, 8>}, {pipeline_mode = #tpu.pipeline_mode<synchronous>, transform_indices = @transform_10, window_bounds = array<i64: 16, 1>}, {pipeline_mode = #tpu.pipeline_mode<synchronous>, transform_indices = @transform_11, window_bounds = array<i64: 16, 1>}, {pipeline_mode = #tpu.pipeline_mode<synchronous>, transform_indices = @transform_12, window_bounds = array<i64: 9, 16, 16>}, {pipeline_mode = #tpu.pipeline_mode<synchronous>, transform_indices = @transform_13, window_bounds = array<i64: 16, 1>}, {pipeline_mode = #tpu.pipeline_mode<synchronous>, transform_indices = @transform_14, window_bounds = array<i64: 16, 1>}, {pipeline_mode = #tpu.pipeline_mode<synchronous>, transform_indices = @transform_15, window_bounds = array<i64: 9, 8, 16>}, {pipeline_mode = #tpu.pipeline_mode<synchronous>, transform_indices = @transform_16, window_bounds = array<i64: 8, 1>}, {pipeline_mode = #tpu.pipeline_mode<synchronous>, transform_indices = @transform_17, window_bounds = array<i64: 8, 1>}, {pipeline_mode = #tpu.pipeline_mode<synchronous>, transform_indices = @transform_18, window_bounds = array<i64: 9, 8, 8>}, {pipeline_mode = #tpu.pipeline_mode<synchronous>, transform_indices = @transform_19, window_bounds = array<i64: 8, 1>}, {pipeline_mode = #tpu.pipeline_mode<synchronous>, transform_indices = @transform_20, window_bounds = array<i64: 8, 1>}, {pipeline_mode = #tpu.pipeline_mode<synchronous>, transform_indices = @transform_21, window_bounds = array<i64: 4, 8, 8>}, {pipeline_mode = #tpu.pipeline_mode<synchronous>, transform_indices = @transform_22, window_bounds = array<i64: 8, 1>}, {pipeline_mode = #tpu.pipeline_mode<synchronous>, transform_indices = @transform_23, window_bounds = array<i64: 9, 4, 8>}, {pipeline_mode = #tpu.pipeline_mode<synchronous>, transform_indices = @transform_24, window_bounds = array<i64: 4, 1>}, {pipeline_mode = #tpu.pipeline_mode<synchronous>, transform_indices = @transform_25, window_bounds = array<i64: 4, 1>}, {pipeline_mode = #tpu.pipeline_mode<synchronous>, transform_indices = @transform_26, window_bounds = array<i64: 9, 4, 4>}, {pipeline_mode = #tpu.pipeline_mode<synchronous>, transform_indices = @transform_27, window_bounds = array<i64: 4, 1>}, {pipeline_mode = #tpu.pipeline_mode<synchronous>, transform_indices = @transform_28, window_bounds = array<i64: 4, 1>}, {pipeline_mode = #tpu.pipeline_mode<synchronous>, transform_indices = @transform_29, window_bounds = array<i64: 4, 4, 4>}, {pipeline_mode = #tpu.pipeline_mode<synchronous>, transform_indices = @transform_30, window_bounds = array<i64: 4, 1>}, {transform_indices = @transform_31, window_bounds = array<i64: 1, 16, 256>}, {transform_indices = @transform_32, window_bounds = array<i64: 1, 4, 256>}]} {
    %c0 = arith.constant 0 : index
    %c0_0 = arith.constant 0 : index
    %c0_1 = arith.constant 0 : index
    %0 = vector.load %arg1[%c0, %c0_0, %c0_1] : memref<1x4x256xf32, #tpu.memory_space<vmem>>, vector<1x4x256xf32>
    %1 = vector.shape_cast %0 : vector<1x4x256xf32> to vector<4x256xf32>
    %c17_i32 = arith.constant 17 : i32
    %2 = tpu.dynamic_rotate %1 by %c17_i32 dim 1 : vector<4x256xf32>, i32 -> vector<4x256xf32>
    %c0_2 = arith.constant 0 : index
    %c0_3 = arith.constant 0 : index
    %c0_4 = arith.constant 0 : index
    %3 = vector.load %arg4[%c0_2, %c0_3, %c0_4] : memref<9x8x4xf32, #tpu.memory_space<vmem>>, vector<1x8x4xf32>
    %4 = vector.shape_cast %3 : vector<1x8x4xf32> to vector<8x4xf32>
    %c0_5 = arith.constant 0 : index
    %c0_6 = arith.constant 0 : index
    %c0_7 = arith.constant 0 : index
    %c0_8 = arith.constant 0 : index
    %5 = vector.load %arg2[%c0_5, %c0_6, %c0_7, %c0_8] : memref<3x9x1x256xf32, #tpu.memory_space<vmem>>, vector<1x1x1x256xf32>
    %6 = vector.shape_cast %5 : vector<1x1x1x256xf32> to vector<1x256xf32>
    %7 = vector.broadcast %6 : vector<1x256xf32> to vector<4x256xf32>
    %8 = arith.mulf %2, %7 : vector<4x256xf32>
    %cst = arith.constant dense<0.000000e+00> : vector<8x256xf32>
    %9 = tpu.matmul %4, %8, %cst {dimension_numbers = #tpu.dot_dimension_numbers<[1], [0], [0], [1], [0, 0, 1, 1], [], []>} : vector<8x4xf32>, vector<4x256xf32>, vector<8x256xf32> -> vector<8x256xf32>
    %c16_i32 = arith.constant 16 : i32
    %10 = tpu.dynamic_rotate %1 by %c16_i32 dim 1 : vector<4x256xf32>, i32 -> vector<4x256xf32>
    %c1 = arith.constant 1 : index
    %c0_9 = arith.constant 0 : index
    %c0_10 = arith.constant 0 : index
    %11 = vector.load %arg4[%c1, %c0_9, %c0_10] : memref<9x8x4xf32, #tpu.memory_space<vmem>>, vector<1x8x4xf32>
    %12 = vector.shape_cast %11 : vector<1x8x4xf32> to vector<8x4xf32>
    %c0_11 = arith.constant 0 : index
    %c1_12 = arith.constant 1 : index
    %c0_13 = arith.constant 0 : index
    %c0_14 = arith.constant 0 : index
    %13 = vector.load %arg2[%c0_11, %c1_12, %c0_13, %c0_14] : memref<3x9x1x256xf32, #tpu.memory_space<vmem>>, vector<1x1x1x256xf32>
    %14 = vector.shape_cast %13 : vector<1x1x1x256xf32> to vector<1x256xf32>
    %15 = vector.broadcast %14 : vector<1x256xf32> to vector<4x256xf32>
    %16 = arith.mulf %10, %15 : vector<4x256xf32>
    %cst_15 = arith.constant dense<0.000000e+00> : vector<8x256xf32>
    %17 = tpu.matmul %12, %16, %cst_15 {dimension_numbers = #tpu.dot_dimension_numbers<[1], [0], [0], [1], [0, 0, 1, 1], [], []>} : vector<8x4xf32>, vector<4x256xf32>, vector<8x256xf32> -> vector<8x256xf32>
    %18 = arith.addf %9, %17 : vector<8x256xf32>
    %c15_i32 = arith.constant 15 : i32
    %19 = tpu.dynamic_rotate %1 by %c15_i32 dim 1 : vector<4x256xf32>, i32 -> vector<4x256xf32>
    %c2 = arith.constant 2 : index
    %c0_16 = arith.constant 0 : index
    %c0_17 = arith.constant 0 : index
    %20 = vector.load %arg4[%c2, %c0_16, %c0_17] : memref<9x8x4xf32, #tpu.memory_space<vmem>>, vector<1x8x4xf32>
    %21 = vector.shape_cast %20 : vector<1x8x4xf32> to vector<8x4xf32>
    %c0_18 = arith.constant 0 : index
    %c2_19 = arith.constant 2 : index
    %c0_20 = arith.constant 0 : index
    %c0_21 = arith.constant 0 : index
    %22 = vector.load %arg2[%c0_18, %c2_19, %c0_20, %c0_21] : memref<3x9x1x256xf32, #tpu.memory_space<vmem>>, vector<1x1x1x256xf32>
    %23 = vector.shape_cast %22 : vector<1x1x1x256xf32> to vector<1x256xf32>
    %24 = vector.broadcast %23 : vector<1x256xf32> to vector<4x256xf32>
    %25 = arith.mulf %19, %24 : vector<4x256xf32>
    %cst_22 = arith.constant dense<0.000000e+00> : vector<8x256xf32>
    %26 = tpu.matmul %21, %25, %cst_22 {dimension_numbers = #tpu.dot_dimension_numbers<[1], [0], [0], [1], [0, 0, 1, 1], [], []>} : vector<8x4xf32>, vector<4x256xf32>, vector<8x256xf32> -> vector<8x256xf32>
    %27 = arith.addf %18, %26 : vector<8x256xf32>
    %c1_i32 = arith.constant 1 : i32
    %28 = tpu.dynamic_rotate %1 by %c1_i32 dim 1 : vector<4x256xf32>, i32 -> vector<4x256xf32>
    %c3 = arith.constant 3 : index
    %c0_23 = arith.constant 0 : index
    %c0_24 = arith.constant 0 : index
    %29 = vector.load %arg4[%c3, %c0_23, %c0_24] : memref<9x8x4xf32, #tpu.memory_space<vmem>>, vector<1x8x4xf32>
    %30 = vector.shape_cast %29 : vector<1x8x4xf32> to vector<8x4xf32>
    %c0_25 = arith.constant 0 : index
    %c3_26 = arith.constant 3 : index
    %c0_27 = arith.constant 0 : index
    %c0_28 = arith.constant 0 : index
    %31 = vector.load %arg2[%c0_25, %c3_26, %c0_27, %c0_28] : memref<3x9x1x256xf32, #tpu.memory_space<vmem>>, vector<1x1x1x256xf32>
    %32 = vector.shape_cast %31 : vector<1x1x1x256xf32> to vector<1x256xf32>
    %33 = vector.broadcast %32 : vector<1x256xf32> to vector<4x256xf32>
    %34 = arith.mulf %28, %33 : vector<4x256xf32>
    %cst_29 = arith.constant dense<0.000000e+00> : vector<8x256xf32>
    %35 = tpu.matmul %30, %34, %cst_29 {dimension_numbers = #tpu.dot_dimension_numbers<[1], [0], [0], [1], [0, 0, 1, 1], [], []>} : vector<8x4xf32>, vector<4x256xf32>, vector<8x256xf32> -> vector<8x256xf32>
    %36 = arith.addf %27, %35 : vector<8x256xf32>
    %c4 = arith.constant 4 : index
    %c0_30 = arith.constant 0 : index
    %c0_31 = arith.constant 0 : index
    %37 = vector.load %arg4[%c4, %c0_30, %c0_31] : memref<9x8x4xf32, #tpu.memory_space<vmem>>, vector<1x8x4xf32>
    %38 = vector.shape_cast %37 : vector<1x8x4xf32> to vector<8x4xf32>
    %c0_32 = arith.constant 0 : index
    %c4_33 = arith.constant 4 : index
    %c0_34 = arith.constant 0 : index
    %c0_35 = arith.constant 0 : index
    %39 = vector.load %arg2[%c0_32, %c4_33, %c0_34, %c0_35] : memref<3x9x1x256xf32, #tpu.memory_space<vmem>>, vector<1x1x1x256xf32>
    %40 = vector.shape_cast %39 : vector<1x1x1x256xf32> to vector<1x256xf32>
    %41 = vector.broadcast %40 : vector<1x256xf32> to vector<4x256xf32>
    %42 = arith.mulf %1, %41 : vector<4x256xf32>
    %cst_36 = arith.constant dense<0.000000e+00> : vector<8x256xf32>
    %43 = tpu.matmul %38, %42, %cst_36 {dimension_numbers = #tpu.dot_dimension_numbers<[1], [0], [0], [1], [0, 0, 1, 1], [], []>} : vector<8x4xf32>, vector<4x256xf32>, vector<8x256xf32> -> vector<8x256xf32>
    %44 = arith.addf %36, %43 : vector<8x256xf32>
    %c255_i32 = arith.constant 255 : i32
    %45 = tpu.dynamic_rotate %1 by %c255_i32 dim 1 : vector<4x256xf32>, i32 -> vector<4x256xf32>
    %c5 = arith.constant 5 : index
    %c0_37 = arith.constant 0 : index
    %c0_38 = arith.constant 0 : index
    %46 = vector.load %arg4[%c5, %c0_37, %c0_38] : memref<9x8x4xf32, #tpu.memory_space<vmem>>, vector<1x8x4xf32>
    %47 = vector.shape_cast %46 : vector<1x8x4xf32> to vector<8x4xf32>
    %c0_39 = arith.constant 0 : index
    %c5_40 = arith.constant 5 : index
    %c0_41 = arith.constant 0 : index
    %c0_42 = arith.constant 0 : index
    %48 = vector.load %arg2[%c0_39, %c5_40, %c0_41, %c0_42] : memref<3x9x1x256xf32, #tpu.memory_space<vmem>>, vector<1x1x1x256xf32>
    %49 = vector.shape_cast %48 : vector<1x1x1x256xf32> to vector<1x256xf32>
    %50 = vector.broadcast %49 : vector<1x256xf32> to vector<4x256xf32>
    %51 = arith.mulf %45, %50 : vector<4x256xf32>
    %cst_43 = arith.constant dense<0.000000e+00> : vector<8x256xf32>
    %52 = tpu.matmul %47, %51, %cst_43 {dimension_numbers = #tpu.dot_dimension_numbers<[1], [0], [0], [1], [0, 0, 1, 1], [], []>} : vector<8x4xf32>, vector<4x256xf32>, vector<8x256xf32> -> vector<8x256xf32>
    %53 = arith.addf %44, %52 : vector<8x256xf32>
    %c241_i32 = arith.constant 241 : i32
    %54 = tpu.dynamic_rotate %1 by %c241_i32 dim 1 : vector<4x256xf32>, i32 -> vector<4x256xf32>
    %c6 = arith.constant 6 : index
    %c0_44 = arith.constant 0 : index
    %c0_45 = arith.constant 0 : index
    %55 = vector.load %arg4[%c6, %c0_44, %c0_45] : memref<9x8x4xf32, #tpu.memory_space<vmem>>, vector<1x8x4xf32>
    %56 = vector.shape_cast %55 : vector<1x8x4xf32> to vector<8x4xf32>
    %c0_46 = arith.constant 0 : index
    %c6_47 = arith.constant 6 : index
    %c0_48 = arith.constant 0 : index
    %c0_49 = arith.constant 0 : index
    %57 = vector.load %arg2[%c0_46, %c6_47, %c0_48, %c0_49] : memref<3x9x1x256xf32, #tpu.memory_space<vmem>>, vector<1x1x1x256xf32>
    %58 = vector.shape_cast %57 : vector<1x1x1x256xf32> to vector<1x256xf32>
    %59 = vector.broadcast %58 : vector<1x256xf32> to vector<4x256xf32>
    %60 = arith.mulf %54, %59 : vector<4x256xf32>
    %cst_50 = arith.constant dense<0.000000e+00> : vector<8x256xf32>
    %61 = tpu.matmul %56, %60, %cst_50 {dimension_numbers = #tpu.dot_dimension_numbers<[1], [0], [0], [1], [0, 0, 1, 1], [], []>} : vector<8x4xf32>, vector<4x256xf32>, vector<8x256xf32> -> vector<8x256xf32>
    %62 = arith.addf %53, %61 : vector<8x256xf32>
    %c240_i32 = arith.constant 240 : i32
    %63 = tpu.dynamic_rotate %1 by %c240_i32 dim 1 : vector<4x256xf32>, i32 -> vector<4x256xf32>
    %c7 = arith.constant 7 : index
    %c0_51 = arith.constant 0 : index
    %c0_52 = arith.constant 0 : index
    %64 = vector.load %arg4[%c7, %c0_51, %c0_52] : memref<9x8x4xf32, #tpu.memory_space<vmem>>, vector<1x8x4xf32>
    %65 = vector.shape_cast %64 : vector<1x8x4xf32> to vector<8x4xf32>
    %c0_53 = arith.constant 0 : index
    %c7_54 = arith.constant 7 : index
    %c0_55 = arith.constant 0 : index
    %c0_56 = arith.constant 0 : index
    %66 = vector.load %arg2[%c0_53, %c7_54, %c0_55, %c0_56] : memref<3x9x1x256xf32, #tpu.memory_space<vmem>>, vector<1x1x1x256xf32>
    %67 = vector.shape_cast %66 : vector<1x1x1x256xf32> to vector<1x256xf32>
    %68 = vector.broadcast %67 : vector<1x256xf32> to vector<4x256xf32>
    %69 = arith.mulf %63, %68 : vector<4x256xf32>
    %cst_57 = arith.constant dense<0.000000e+00> : vector<8x256xf32>
    %70 = tpu.matmul %65, %69, %cst_57 {dimension_numbers = #tpu.dot_dimension_numbers<[1], [0], [0], [1], [0, 0, 1, 1], [], []>} : vector<8x4xf32>, vector<4x256xf32>, vector<8x256xf32> -> vector<8x256xf32>
    %71 = arith.addf %62, %70 : vector<8x256xf32>
    %c239_i32 = arith.constant 239 : i32
    %72 = tpu.dynamic_rotate %1 by %c239_i32 dim 1 : vector<4x256xf32>, i32 -> vector<4x256xf32>
    %c8 = arith.constant 8 : index
    %c0_58 = arith.constant 0 : index
    %c0_59 = arith.constant 0 : index
    %73 = vector.load %arg4[%c8, %c0_58, %c0_59] : memref<9x8x4xf32, #tpu.memory_space<vmem>>, vector<1x8x4xf32>
    %74 = vector.shape_cast %73 : vector<1x8x4xf32> to vector<8x4xf32>
    %c0_60 = arith.constant 0 : index
    %c8_61 = arith.constant 8 : index
    %c0_62 = arith.constant 0 : index
    %c0_63 = arith.constant 0 : index
    %75 = vector.load %arg2[%c0_60, %c8_61, %c0_62, %c0_63] : memref<3x9x1x256xf32, #tpu.memory_space<vmem>>, vector<1x1x1x256xf32>
    %76 = vector.shape_cast %75 : vector<1x1x1x256xf32> to vector<1x256xf32>
    %77 = vector.broadcast %76 : vector<1x256xf32> to vector<4x256xf32>
    %78 = arith.mulf %72, %77 : vector<4x256xf32>
    %cst_64 = arith.constant dense<0.000000e+00> : vector<8x256xf32>
    %79 = tpu.matmul %74, %78, %cst_64 {dimension_numbers = #tpu.dot_dimension_numbers<[1], [0], [0], [1], [0, 0, 1, 1], [], []>} : vector<8x4xf32>, vector<4x256xf32>, vector<8x256xf32> -> vector<8x256xf32>
    %80 = arith.addf %71, %79 : vector<8x256xf32>
    %c0_65 = arith.constant 0 : index
    %c0_66 = arith.constant 0 : index
    %81 = vector.load %arg5[%c0_65, %c0_66] : memref<8x1xf32, #tpu.memory_space<vmem>>, vector<8x1xf32>
    %82 = vector.broadcast %81 : vector<8x1xf32> to vector<8x256xf32>
    %83 = arith.mulf %80, %82 : vector<8x256xf32>
    %c0_67 = arith.constant 0 : index
    %c0_68 = arith.constant 0 : index
    %84 = vector.load %arg6[%c0_67, %c0_68] : memref<8x1xf32, #tpu.memory_space<vmem>>, vector<8x1xf32>
    %85 = vector.broadcast %84 : vector<8x1xf32> to vector<8x256xf32>
    %86 = arith.addf %83, %85 : vector<8x256xf32>
    %cst_69 = arith.constant 0.000000e+00 : f32
    %87 = vector.broadcast %cst_69 : f32 to vector<8x256xf32>
    %88 = arith.maximumf %86, %87 : vector<8x256xf32>
    %c17_i32_70 = arith.constant 17 : i32
    %89 = tpu.dynamic_rotate %88 by %c17_i32_70 dim 1 : vector<8x256xf32>, i32 -> vector<8x256xf32>
    %c0_71 = arith.constant 0 : index
    %c0_72 = arith.constant 0 : index
    %c0_73 = arith.constant 0 : index
    %90 = vector.load %arg7[%c0_71, %c0_72, %c0_73] : memref<9x8x8xf32, #tpu.memory_space<vmem>>, vector<1x8x8xf32>
    %91 = vector.shape_cast %90 : vector<1x8x8xf32> to vector<8x8xf32>
    %c0_74 = arith.constant 0 : index
    %c0_75 = arith.constant 0 : index
    %c0_76 = arith.constant 0 : index
    %c0_77 = arith.constant 0 : index
    %92 = vector.load %arg2[%c0_74, %c0_75, %c0_76, %c0_77] : memref<3x9x1x256xf32, #tpu.memory_space<vmem>>, vector<1x1x1x256xf32>
    %93 = vector.shape_cast %92 : vector<1x1x1x256xf32> to vector<1x256xf32>
    %94 = vector.broadcast %93 : vector<1x256xf32> to vector<8x256xf32>
    %95 = arith.mulf %89, %94 : vector<8x256xf32>
    %cst_78 = arith.constant dense<0.000000e+00> : vector<8x256xf32>
    %96 = tpu.matmul %91, %95, %cst_78 {dimension_numbers = #tpu.dot_dimension_numbers<[1], [0], [0], [1], [0, 0, 1, 1], [], []>} : vector<8x8xf32>, vector<8x256xf32>, vector<8x256xf32> -> vector<8x256xf32>
    %c16_i32_79 = arith.constant 16 : i32
    %97 = tpu.dynamic_rotate %88 by %c16_i32_79 dim 1 : vector<8x256xf32>, i32 -> vector<8x256xf32>
    %c1_80 = arith.constant 1 : index
    %c0_81 = arith.constant 0 : index
    %c0_82 = arith.constant 0 : index
    %98 = vector.load %arg7[%c1_80, %c0_81, %c0_82] : memref<9x8x8xf32, #tpu.memory_space<vmem>>, vector<1x8x8xf32>
    %99 = vector.shape_cast %98 : vector<1x8x8xf32> to vector<8x8xf32>
    %c0_83 = arith.constant 0 : index
    %c1_84 = arith.constant 1 : index
    %c0_85 = arith.constant 0 : index
    %c0_86 = arith.constant 0 : index
    %100 = vector.load %arg2[%c0_83, %c1_84, %c0_85, %c0_86] : memref<3x9x1x256xf32, #tpu.memory_space<vmem>>, vector<1x1x1x256xf32>
    %101 = vector.shape_cast %100 : vector<1x1x1x256xf32> to vector<1x256xf32>
    %102 = vector.broadcast %101 : vector<1x256xf32> to vector<8x256xf32>
    %103 = arith.mulf %97, %102 : vector<8x256xf32>
    %cst_87 = arith.constant dense<0.000000e+00> : vector<8x256xf32>
    %104 = tpu.matmul %99, %103, %cst_87 {dimension_numbers = #tpu.dot_dimension_numbers<[1], [0], [0], [1], [0, 0, 1, 1], [], []>} : vector<8x8xf32>, vector<8x256xf32>, vector<8x256xf32> -> vector<8x256xf32>
    %105 = arith.addf %96, %104 : vector<8x256xf32>
    %c15_i32_88 = arith.constant 15 : i32
    %106 = tpu.dynamic_rotate %88 by %c15_i32_88 dim 1 : vector<8x256xf32>, i32 -> vector<8x256xf32>
    %c2_89 = arith.constant 2 : index
    %c0_90 = arith.constant 0 : index
    %c0_91 = arith.constant 0 : index
    %107 = vector.load %arg7[%c2_89, %c0_90, %c0_91] : memref<9x8x8xf32, #tpu.memory_space<vmem>>, vector<1x8x8xf32>
    %108 = vector.shape_cast %107 : vector<1x8x8xf32> to vector<8x8xf32>
    %c0_92 = arith.constant 0 : index
    %c2_93 = arith.constant 2 : index
    %c0_94 = arith.constant 0 : index
    %c0_95 = arith.constant 0 : index
    %109 = vector.load %arg2[%c0_92, %c2_93, %c0_94, %c0_95] : memref<3x9x1x256xf32, #tpu.memory_space<vmem>>, vector<1x1x1x256xf32>
    %110 = vector.shape_cast %109 : vector<1x1x1x256xf32> to vector<1x256xf32>
    %111 = vector.broadcast %110 : vector<1x256xf32> to vector<8x256xf32>
    %112 = arith.mulf %106, %111 : vector<8x256xf32>
    %cst_96 = arith.constant dense<0.000000e+00> : vector<8x256xf32>
    %113 = tpu.matmul %108, %112, %cst_96 {dimension_numbers = #tpu.dot_dimension_numbers<[1], [0], [0], [1], [0, 0, 1, 1], [], []>} : vector<8x8xf32>, vector<8x256xf32>, vector<8x256xf32> -> vector<8x256xf32>
    %114 = arith.addf %105, %113 : vector<8x256xf32>
    %c1_i32_97 = arith.constant 1 : i32
    %115 = tpu.dynamic_rotate %88 by %c1_i32_97 dim 1 : vector<8x256xf32>, i32 -> vector<8x256xf32>
    %c3_98 = arith.constant 3 : index
    %c0_99 = arith.constant 0 : index
    %c0_100 = arith.constant 0 : index
    %116 = vector.load %arg7[%c3_98, %c0_99, %c0_100] : memref<9x8x8xf32, #tpu.memory_space<vmem>>, vector<1x8x8xf32>
    %117 = vector.shape_cast %116 : vector<1x8x8xf32> to vector<8x8xf32>
    %c0_101 = arith.constant 0 : index
    %c3_102 = arith.constant 3 : index
    %c0_103 = arith.constant 0 : index
    %c0_104 = arith.constant 0 : index
    %118 = vector.load %arg2[%c0_101, %c3_102, %c0_103, %c0_104] : memref<3x9x1x256xf32, #tpu.memory_space<vmem>>, vector<1x1x1x256xf32>
    %119 = vector.shape_cast %118 : vector<1x1x1x256xf32> to vector<1x256xf32>
    %120 = vector.broadcast %119 : vector<1x256xf32> to vector<8x256xf32>
    %121 = arith.mulf %115, %120 : vector<8x256xf32>
    %cst_105 = arith.constant dense<0.000000e+00> : vector<8x256xf32>
    %122 = tpu.matmul %117, %121, %cst_105 {dimension_numbers = #tpu.dot_dimension_numbers<[1], [0], [0], [1], [0, 0, 1, 1], [], []>} : vector<8x8xf32>, vector<8x256xf32>, vector<8x256xf32> -> vector<8x256xf32>
    %123 = arith.addf %114, %122 : vector<8x256xf32>
    %c4_106 = arith.constant 4 : index
    %c0_107 = arith.constant 0 : index
    %c0_108 = arith.constant 0 : index
    %124 = vector.load %arg7[%c4_106, %c0_107, %c0_108] : memref<9x8x8xf32, #tpu.memory_space<vmem>>, vector<1x8x8xf32>
    %125 = vector.shape_cast %124 : vector<1x8x8xf32> to vector<8x8xf32>
    %c0_109 = arith.constant 0 : index
    %c4_110 = arith.constant 4 : index
    %c0_111 = arith.constant 0 : index
    %c0_112 = arith.constant 0 : index
    %126 = vector.load %arg2[%c0_109, %c4_110, %c0_111, %c0_112] : memref<3x9x1x256xf32, #tpu.memory_space<vmem>>, vector<1x1x1x256xf32>
    %127 = vector.shape_cast %126 : vector<1x1x1x256xf32> to vector<1x256xf32>
    %128 = vector.broadcast %127 : vector<1x256xf32> to vector<8x256xf32>
    %129 = arith.mulf %88, %128 : vector<8x256xf32>
    %cst_113 = arith.constant dense<0.000000e+00> : vector<8x256xf32>
    %130 = tpu.matmul %125, %129, %cst_113 {dimension_numbers = #tpu.dot_dimension_numbers<[1], [0], [0], [1], [0, 0, 1, 1], [], []>} : vector<8x8xf32>, vector<8x256xf32>, vector<8x256xf32> -> vector<8x256xf32>
    %131 = arith.addf %123, %130 : vector<8x256xf32>
    %c255_i32_114 = arith.constant 255 : i32
    %132 = tpu.dynamic_rotate %88 by %c255_i32_114 dim 1 : vector<8x256xf32>, i32 -> vector<8x256xf32>
    %c5_115 = arith.constant 5 : index
    %c0_116 = arith.constant 0 : index
    %c0_117 = arith.constant 0 : index
    %133 = vector.load %arg7[%c5_115, %c0_116, %c0_117] : memref<9x8x8xf32, #tpu.memory_space<vmem>>, vector<1x8x8xf32>
    %134 = vector.shape_cast %133 : vector<1x8x8xf32> to vector<8x8xf32>
    %c0_118 = arith.constant 0 : index
    %c5_119 = arith.constant 5 : index
    %c0_120 = arith.constant 0 : index
    %c0_121 = arith.constant 0 : index
    %135 = vector.load %arg2[%c0_118, %c5_119, %c0_120, %c0_121] : memref<3x9x1x256xf32, #tpu.memory_space<vmem>>, vector<1x1x1x256xf32>
    %136 = vector.shape_cast %135 : vector<1x1x1x256xf32> to vector<1x256xf32>
    %137 = vector.broadcast %136 : vector<1x256xf32> to vector<8x256xf32>
    %138 = arith.mulf %132, %137 : vector<8x256xf32>
    %cst_122 = arith.constant dense<0.000000e+00> : vector<8x256xf32>
    %139 = tpu.matmul %134, %138, %cst_122 {dimension_numbers = #tpu.dot_dimension_numbers<[1], [0], [0], [1], [0, 0, 1, 1], [], []>} : vector<8x8xf32>, vector<8x256xf32>, vector<8x256xf32> -> vector<8x256xf32>
    %140 = arith.addf %131, %139 : vector<8x256xf32>
    %c241_i32_123 = arith.constant 241 : i32
    %141 = tpu.dynamic_rotate %88 by %c241_i32_123 dim 1 : vector<8x256xf32>, i32 -> vector<8x256xf32>
    %c6_124 = arith.constant 6 : index
    %c0_125 = arith.constant 0 : index
    %c0_126 = arith.constant 0 : index
    %142 = vector.load %arg7[%c6_124, %c0_125, %c0_126] : memref<9x8x8xf32, #tpu.memory_space<vmem>>, vector<1x8x8xf32>
    %143 = vector.shape_cast %142 : vector<1x8x8xf32> to vector<8x8xf32>
    %c0_127 = arith.constant 0 : index
    %c6_128 = arith.constant 6 : index
    %c0_129 = arith.constant 0 : index
    %c0_130 = arith.constant 0 : index
    %144 = vector.load %arg2[%c0_127, %c6_128, %c0_129, %c0_130] : memref<3x9x1x256xf32, #tpu.memory_space<vmem>>, vector<1x1x1x256xf32>
    %145 = vector.shape_cast %144 : vector<1x1x1x256xf32> to vector<1x256xf32>
    %146 = vector.broadcast %145 : vector<1x256xf32> to vector<8x256xf32>
    %147 = arith.mulf %141, %146 : vector<8x256xf32>
    %cst_131 = arith.constant dense<0.000000e+00> : vector<8x256xf32>
    %148 = tpu.matmul %143, %147, %cst_131 {dimension_numbers = #tpu.dot_dimension_numbers<[1], [0], [0], [1], [0, 0, 1, 1], [], []>} : vector<8x8xf32>, vector<8x256xf32>, vector<8x256xf32> -> vector<8x256xf32>
    %149 = arith.addf %140, %148 : vector<8x256xf32>
    %c240_i32_132 = arith.constant 240 : i32
    %150 = tpu.dynamic_rotate %88 by %c240_i32_132 dim 1 : vector<8x256xf32>, i32 -> vector<8x256xf32>
    %c7_133 = arith.constant 7 : index
    %c0_134 = arith.constant 0 : index
    %c0_135 = arith.constant 0 : index
    %151 = vector.load %arg7[%c7_133, %c0_134, %c0_135] : memref<9x8x8xf32, #tpu.memory_space<vmem>>, vector<1x8x8xf32>
    %152 = vector.shape_cast %151 : vector<1x8x8xf32> to vector<8x8xf32>
    %c0_136 = arith.constant 0 : index
    %c7_137 = arith.constant 7 : index
    %c0_138 = arith.constant 0 : index
    %c0_139 = arith.constant 0 : index
    %153 = vector.load %arg2[%c0_136, %c7_137, %c0_138, %c0_139] : memref<3x9x1x256xf32, #tpu.memory_space<vmem>>, vector<1x1x1x256xf32>
    %154 = vector.shape_cast %153 : vector<1x1x1x256xf32> to vector<1x256xf32>
    %155 = vector.broadcast %154 : vector<1x256xf32> to vector<8x256xf32>
    %156 = arith.mulf %150, %155 : vector<8x256xf32>
    %cst_140 = arith.constant dense<0.000000e+00> : vector<8x256xf32>
    %157 = tpu.matmul %152, %156, %cst_140 {dimension_numbers = #tpu.dot_dimension_numbers<[1], [0], [0], [1], [0, 0, 1, 1], [], []>} : vector<8x8xf32>, vector<8x256xf32>, vector<8x256xf32> -> vector<8x256xf32>
    %158 = arith.addf %149, %157 : vector<8x256xf32>
    %c239_i32_141 = arith.constant 239 : i32
    %159 = tpu.dynamic_rotate %88 by %c239_i32_141 dim 1 : vector<8x256xf32>, i32 -> vector<8x256xf32>
    %c8_142 = arith.constant 8 : index
    %c0_143 = arith.constant 0 : index
    %c0_144 = arith.constant 0 : index
    %160 = vector.load %arg7[%c8_142, %c0_143, %c0_144] : memref<9x8x8xf32, #tpu.memory_space<vmem>>, vector<1x8x8xf32>
    %161 = vector.shape_cast %160 : vector<1x8x8xf32> to vector<8x8xf32>
    %c0_145 = arith.constant 0 : index
    %c8_146 = arith.constant 8 : index
    %c0_147 = arith.constant 0 : index
    %c0_148 = arith.constant 0 : index
    %162 = vector.load %arg2[%c0_145, %c8_146, %c0_147, %c0_148] : memref<3x9x1x256xf32, #tpu.memory_space<vmem>>, vector<1x1x1x256xf32>
    %163 = vector.shape_cast %162 : vector<1x1x1x256xf32> to vector<1x256xf32>
    %164 = vector.broadcast %163 : vector<1x256xf32> to vector<8x256xf32>
    %165 = arith.mulf %159, %164 : vector<8x256xf32>
    %cst_149 = arith.constant dense<0.000000e+00> : vector<8x256xf32>
    %166 = tpu.matmul %161, %165, %cst_149 {dimension_numbers = #tpu.dot_dimension_numbers<[1], [0], [0], [1], [0, 0, 1, 1], [], []>} : vector<8x8xf32>, vector<8x256xf32>, vector<8x256xf32> -> vector<8x256xf32>
    %167 = arith.addf %158, %166 : vector<8x256xf32>
    %c0_150 = arith.constant 0 : index
    %c0_151 = arith.constant 0 : index
    %168 = vector.load %arg8[%c0_150, %c0_151] : memref<8x1xf32, #tpu.memory_space<vmem>>, vector<8x1xf32>
    %169 = vector.broadcast %168 : vector<8x1xf32> to vector<8x256xf32>
    %170 = arith.mulf %167, %169 : vector<8x256xf32>
    %c0_152 = arith.constant 0 : index
    %c0_153 = arith.constant 0 : index
    %171 = vector.load %arg9[%c0_152, %c0_153] : memref<8x1xf32, #tpu.memory_space<vmem>>, vector<8x1xf32>
    %172 = vector.broadcast %171 : vector<8x1xf32> to vector<8x256xf32>
    %173 = arith.addf %170, %172 : vector<8x256xf32>
    %cst_154 = arith.constant 0.000000e+00 : f32
    %174 = vector.broadcast %cst_154 : f32 to vector<8x256xf32>
    %175 = arith.maximumf %173, %174 : vector<8x256xf32>
    %c255_i32_155 = arith.constant 255 : i32
    %176 = tpu.dynamic_rotate %175 by %c255_i32_155 dim 1 : vector<8x256xf32>, i32 -> vector<8x256xf32>
    %177 = arith.maximumf %175, %176 : vector<8x256xf32>
    %c240_i32_156 = arith.constant 240 : i32
    %178 = tpu.dynamic_rotate %177 by %c240_i32_156 dim 1 : vector<8x256xf32>, i32 -> vector<8x256xf32>
    %179 = arith.maximumf %177, %178 : vector<8x256xf32>
    %c34_i32 = arith.constant 34 : i32
    %180 = tpu.dynamic_rotate %179 by %c34_i32 dim 1 : vector<8x256xf32>, i32 -> vector<8x256xf32>
    %c0_157 = arith.constant 0 : index
    %c0_158 = arith.constant 0 : index
    %c0_159 = arith.constant 0 : index
    %181 = vector.load %arg10[%c0_157, %c0_158, %c0_159] : memref<9x16x8xf32, #tpu.memory_space<vmem>>, vector<1x16x8xf32>
    %182 = vector.shape_cast %181 : vector<1x16x8xf32> to vector<16x8xf32>
    %c1_160 = arith.constant 1 : index
    %c0_161 = arith.constant 0 : index
    %c0_162 = arith.constant 0 : index
    %c0_163 = arith.constant 0 : index
    %183 = vector.load %arg2[%c1_160, %c0_161, %c0_162, %c0_163] : memref<3x9x1x256xf32, #tpu.memory_space<vmem>>, vector<1x1x1x256xf32>
    %184 = vector.shape_cast %183 : vector<1x1x1x256xf32> to vector<1x256xf32>
    %185 = vector.broadcast %184 : vector<1x256xf32> to vector<8x256xf32>
    %186 = arith.mulf %180, %185 : vector<8x256xf32>
    %cst_164 = arith.constant dense<0.000000e+00> : vector<16x256xf32>
    %187 = tpu.matmul %182, %186, %cst_164 {dimension_numbers = #tpu.dot_dimension_numbers<[1], [0], [0], [1], [0, 0, 1, 1], [], []>} : vector<16x8xf32>, vector<8x256xf32>, vector<16x256xf32> -> vector<16x256xf32>
    %c32_i32 = arith.constant 32 : i32
    %188 = tpu.dynamic_rotate %179 by %c32_i32 dim 1 : vector<8x256xf32>, i32 -> vector<8x256xf32>
    %c1_165 = arith.constant 1 : index
    %c0_166 = arith.constant 0 : index
    %c0_167 = arith.constant 0 : index
    %189 = vector.load %arg10[%c1_165, %c0_166, %c0_167] : memref<9x16x8xf32, #tpu.memory_space<vmem>>, vector<1x16x8xf32>
    %190 = vector.shape_cast %189 : vector<1x16x8xf32> to vector<16x8xf32>
    %c1_168 = arith.constant 1 : index
    %c1_169 = arith.constant 1 : index
    %c0_170 = arith.constant 0 : index
    %c0_171 = arith.constant 0 : index
    %191 = vector.load %arg2[%c1_168, %c1_169, %c0_170, %c0_171] : memref<3x9x1x256xf32, #tpu.memory_space<vmem>>, vector<1x1x1x256xf32>
    %192 = vector.shape_cast %191 : vector<1x1x1x256xf32> to vector<1x256xf32>
    %193 = vector.broadcast %192 : vector<1x256xf32> to vector<8x256xf32>
    %194 = arith.mulf %188, %193 : vector<8x256xf32>
    %cst_172 = arith.constant dense<0.000000e+00> : vector<16x256xf32>
    %195 = tpu.matmul %190, %194, %cst_172 {dimension_numbers = #tpu.dot_dimension_numbers<[1], [0], [0], [1], [0, 0, 1, 1], [], []>} : vector<16x8xf32>, vector<8x256xf32>, vector<16x256xf32> -> vector<16x256xf32>
    %196 = arith.addf %187, %195 : vector<16x256xf32>
    %c30_i32 = arith.constant 30 : i32
    %197 = tpu.dynamic_rotate %179 by %c30_i32 dim 1 : vector<8x256xf32>, i32 -> vector<8x256xf32>
    %c2_173 = arith.constant 2 : index
    %c0_174 = arith.constant 0 : index
    %c0_175 = arith.constant 0 : index
    %198 = vector.load %arg10[%c2_173, %c0_174, %c0_175] : memref<9x16x8xf32, #tpu.memory_space<vmem>>, vector<1x16x8xf32>
    %199 = vector.shape_cast %198 : vector<1x16x8xf32> to vector<16x8xf32>
    %c1_176 = arith.constant 1 : index
    %c2_177 = arith.constant 2 : index
    %c0_178 = arith.constant 0 : index
    %c0_179 = arith.constant 0 : index
    %200 = vector.load %arg2[%c1_176, %c2_177, %c0_178, %c0_179] : memref<3x9x1x256xf32, #tpu.memory_space<vmem>>, vector<1x1x1x256xf32>
    %201 = vector.shape_cast %200 : vector<1x1x1x256xf32> to vector<1x256xf32>
    %202 = vector.broadcast %201 : vector<1x256xf32> to vector<8x256xf32>
    %203 = arith.mulf %197, %202 : vector<8x256xf32>
    %cst_180 = arith.constant dense<0.000000e+00> : vector<16x256xf32>
    %204 = tpu.matmul %199, %203, %cst_180 {dimension_numbers = #tpu.dot_dimension_numbers<[1], [0], [0], [1], [0, 0, 1, 1], [], []>} : vector<16x8xf32>, vector<8x256xf32>, vector<16x256xf32> -> vector<16x256xf32>
    %205 = arith.addf %196, %204 : vector<16x256xf32>
    %c2_i32 = arith.constant 2 : i32
    %206 = tpu.dynamic_rotate %179 by %c2_i32 dim 1 : vector<8x256xf32>, i32 -> vector<8x256xf32>
    %c3_181 = arith.constant 3 : index
    %c0_182 = arith.constant 0 : index
    %c0_183 = arith.constant 0 : index
    %207 = vector.load %arg10[%c3_181, %c0_182, %c0_183] : memref<9x16x8xf32, #tpu.memory_space<vmem>>, vector<1x16x8xf32>
    %208 = vector.shape_cast %207 : vector<1x16x8xf32> to vector<16x8xf32>
    %c1_184 = arith.constant 1 : index
    %c3_185 = arith.constant 3 : index
    %c0_186 = arith.constant 0 : index
    %c0_187 = arith.constant 0 : index
    %209 = vector.load %arg2[%c1_184, %c3_185, %c0_186, %c0_187] : memref<3x9x1x256xf32, #tpu.memory_space<vmem>>, vector<1x1x1x256xf32>
    %210 = vector.shape_cast %209 : vector<1x1x1x256xf32> to vector<1x256xf32>
    %211 = vector.broadcast %210 : vector<1x256xf32> to vector<8x256xf32>
    %212 = arith.mulf %206, %211 : vector<8x256xf32>
    %cst_188 = arith.constant dense<0.000000e+00> : vector<16x256xf32>
    %213 = tpu.matmul %208, %212, %cst_188 {dimension_numbers = #tpu.dot_dimension_numbers<[1], [0], [0], [1], [0, 0, 1, 1], [], []>} : vector<16x8xf32>, vector<8x256xf32>, vector<16x256xf32> -> vector<16x256xf32>
    %214 = arith.addf %205, %213 : vector<16x256xf32>
    %c4_189 = arith.constant 4 : index
    %c0_190 = arith.constant 0 : index
    %c0_191 = arith.constant 0 : index
    %215 = vector.load %arg10[%c4_189, %c0_190, %c0_191] : memref<9x16x8xf32, #tpu.memory_space<vmem>>, vector<1x16x8xf32>
    %216 = vector.shape_cast %215 : vector<1x16x8xf32> to vector<16x8xf32>
    %c1_192 = arith.constant 1 : index
    %c4_193 = arith.constant 4 : index
    %c0_194 = arith.constant 0 : index
    %c0_195 = arith.constant 0 : index
    %217 = vector.load %arg2[%c1_192, %c4_193, %c0_194, %c0_195] : memref<3x9x1x256xf32, #tpu.memory_space<vmem>>, vector<1x1x1x256xf32>
    %218 = vector.shape_cast %217 : vector<1x1x1x256xf32> to vector<1x256xf32>
    %219 = vector.broadcast %218 : vector<1x256xf32> to vector<8x256xf32>
    %220 = arith.mulf %179, %219 : vector<8x256xf32>
    %cst_196 = arith.constant dense<0.000000e+00> : vector<16x256xf32>
    %221 = tpu.matmul %216, %220, %cst_196 {dimension_numbers = #tpu.dot_dimension_numbers<[1], [0], [0], [1], [0, 0, 1, 1], [], []>} : vector<16x8xf32>, vector<8x256xf32>, vector<16x256xf32> -> vector<16x256xf32>
    %222 = arith.addf %214, %221 : vector<16x256xf32>
    %c254_i32 = arith.constant 254 : i32
    %223 = tpu.dynamic_rotate %179 by %c254_i32 dim 1 : vector<8x256xf32>, i32 -> vector<8x256xf32>
    %c5_197 = arith.constant 5 : index
    %c0_198 = arith.constant 0 : index
    %c0_199 = arith.constant 0 : index
    %224 = vector.load %arg10[%c5_197, %c0_198, %c0_199] : memref<9x16x8xf32, #tpu.memory_space<vmem>>, vector<1x16x8xf32>
    %225 = vector.shape_cast %224 : vector<1x16x8xf32> to vector<16x8xf32>
    %c1_200 = arith.constant 1 : index
    %c5_201 = arith.constant 5 : index
    %c0_202 = arith.constant 0 : index
    %c0_203 = arith.constant 0 : index
    %226 = vector.load %arg2[%c1_200, %c5_201, %c0_202, %c0_203] : memref<3x9x1x256xf32, #tpu.memory_space<vmem>>, vector<1x1x1x256xf32>
    %227 = vector.shape_cast %226 : vector<1x1x1x256xf32> to vector<1x256xf32>
    %228 = vector.broadcast %227 : vector<1x256xf32> to vector<8x256xf32>
    %229 = arith.mulf %223, %228 : vector<8x256xf32>
    %cst_204 = arith.constant dense<0.000000e+00> : vector<16x256xf32>
    %230 = tpu.matmul %225, %229, %cst_204 {dimension_numbers = #tpu.dot_dimension_numbers<[1], [0], [0], [1], [0, 0, 1, 1], [], []>} : vector<16x8xf32>, vector<8x256xf32>, vector<16x256xf32> -> vector<16x256xf32>
    %231 = arith.addf %222, %230 : vector<16x256xf32>
    %c226_i32 = arith.constant 226 : i32
    %232 = tpu.dynamic_rotate %179 by %c226_i32 dim 1 : vector<8x256xf32>, i32 -> vector<8x256xf32>
    %c6_205 = arith.constant 6 : index
    %c0_206 = arith.constant 0 : index
    %c0_207 = arith.constant 0 : index
    %233 = vector.load %arg10[%c6_205, %c0_206, %c0_207] : memref<9x16x8xf32, #tpu.memory_space<vmem>>, vector<1x16x8xf32>
    %234 = vector.shape_cast %233 : vector<1x16x8xf32> to vector<16x8xf32>
    %c1_208 = arith.constant 1 : index
    %c6_209 = arith.constant 6 : index
    %c0_210 = arith.constant 0 : index
    %c0_211 = arith.constant 0 : index
    %235 = vector.load %arg2[%c1_208, %c6_209, %c0_210, %c0_211] : memref<3x9x1x256xf32, #tpu.memory_space<vmem>>, vector<1x1x1x256xf32>
    %236 = vector.shape_cast %235 : vector<1x1x1x256xf32> to vector<1x256xf32>
    %237 = vector.broadcast %236 : vector<1x256xf32> to vector<8x256xf32>
    %238 = arith.mulf %232, %237 : vector<8x256xf32>
    %cst_212 = arith.constant dense<0.000000e+00> : vector<16x256xf32>
    %239 = tpu.matmul %234, %238, %cst_212 {dimension_numbers = #tpu.dot_dimension_numbers<[1], [0], [0], [1], [0, 0, 1, 1], [], []>} : vector<16x8xf32>, vector<8x256xf32>, vector<16x256xf32> -> vector<16x256xf32>
    %240 = arith.addf %231, %239 : vector<16x256xf32>
    %c224_i32 = arith.constant 224 : i32
    %241 = tpu.dynamic_rotate %179 by %c224_i32 dim 1 : vector<8x256xf32>, i32 -> vector<8x256xf32>
    %c7_213 = arith.constant 7 : index
    %c0_214 = arith.constant 0 : index
    %c0_215 = arith.constant 0 : index
    %242 = vector.load %arg10[%c7_213, %c0_214, %c0_215] : memref<9x16x8xf32, #tpu.memory_space<vmem>>, vector<1x16x8xf32>
    %243 = vector.shape_cast %242 : vector<1x16x8xf32> to vector<16x8xf32>
    %c1_216 = arith.constant 1 : index
    %c7_217 = arith.constant 7 : index
    %c0_218 = arith.constant 0 : index
    %c0_219 = arith.constant 0 : index
    %244 = vector.load %arg2[%c1_216, %c7_217, %c0_218, %c0_219] : memref<3x9x1x256xf32, #tpu.memory_space<vmem>>, vector<1x1x1x256xf32>
    %245 = vector.shape_cast %244 : vector<1x1x1x256xf32> to vector<1x256xf32>
    %246 = vector.broadcast %245 : vector<1x256xf32> to vector<8x256xf32>
    %247 = arith.mulf %241, %246 : vector<8x256xf32>
    %cst_220 = arith.constant dense<0.000000e+00> : vector<16x256xf32>
    %248 = tpu.matmul %243, %247, %cst_220 {dimension_numbers = #tpu.dot_dimension_numbers<[1], [0], [0], [1], [0, 0, 1, 1], [], []>} : vector<16x8xf32>, vector<8x256xf32>, vector<16x256xf32> -> vector<16x256xf32>
    %249 = arith.addf %240, %248 : vector<16x256xf32>
    %c222_i32 = arith.constant 222 : i32
    %250 = tpu.dynamic_rotate %179 by %c222_i32 dim 1 : vector<8x256xf32>, i32 -> vector<8x256xf32>
    %c8_221 = arith.constant 8 : index
    %c0_222 = arith.constant 0 : index
    %c0_223 = arith.constant 0 : index
    %251 = vector.load %arg10[%c8_221, %c0_222, %c0_223] : memref<9x16x8xf32, #tpu.memory_space<vmem>>, vector<1x16x8xf32>
    %252 = vector.shape_cast %251 : vector<1x16x8xf32> to vector<16x8xf32>
    %c1_224 = arith.constant 1 : index
    %c8_225 = arith.constant 8 : index
    %c0_226 = arith.constant 0 : index
    %c0_227 = arith.constant 0 : index
    %253 = vector.load %arg2[%c1_224, %c8_225, %c0_226, %c0_227] : memref<3x9x1x256xf32, #tpu.memory_space<vmem>>, vector<1x1x1x256xf32>
    %254 = vector.shape_cast %253 : vector<1x1x1x256xf32> to vector<1x256xf32>
    %255 = vector.broadcast %254 : vector<1x256xf32> to vector<8x256xf32>
    %256 = arith.mulf %250, %255 : vector<8x256xf32>
    %cst_228 = arith.constant dense<0.000000e+00> : vector<16x256xf32>
    %257 = tpu.matmul %252, %256, %cst_228 {dimension_numbers = #tpu.dot_dimension_numbers<[1], [0], [0], [1], [0, 0, 1, 1], [], []>} : vector<16x8xf32>, vector<8x256xf32>, vector<16x256xf32> -> vector<16x256xf32>
    %258 = arith.addf %249, %257 : vector<16x256xf32>
    %c0_229 = arith.constant 0 : index
    %c0_230 = arith.constant 0 : index
    %259 = vector.load %arg11[%c0_229, %c0_230] : memref<16x1xf32, #tpu.memory_space<vmem>>, vector<16x1xf32>
    %260 = vector.broadcast %259 : vector<16x1xf32> to vector<16x256xf32>
    %261 = arith.mulf %258, %260 : vector<16x256xf32>
    %c0_231 = arith.constant 0 : index
    %c0_232 = arith.constant 0 : index
    %262 = vector.load %arg12[%c0_231, %c0_232] : memref<16x1xf32, #tpu.memory_space<vmem>>, vector<16x1xf32>
    %263 = vector.broadcast %262 : vector<16x1xf32> to vector<16x256xf32>
    %264 = arith.addf %261, %263 : vector<16x256xf32>
    %cst_233 = arith.constant 0.000000e+00 : f32
    %265 = vector.broadcast %cst_233 : f32 to vector<16x256xf32>
    %266 = arith.maximumf %264, %265 : vector<16x256xf32>
    %c34_i32_234 = arith.constant 34 : i32
    %267 = tpu.dynamic_rotate %266 by %c34_i32_234 dim 1 : vector<16x256xf32>, i32 -> vector<16x256xf32>
    %c0_235 = arith.constant 0 : index
    %c0_236 = arith.constant 0 : index
    %c0_237 = arith.constant 0 : index
    %268 = vector.load %arg13[%c0_235, %c0_236, %c0_237] : memref<9x16x16xf32, #tpu.memory_space<vmem>>, vector<1x16x16xf32>
    %269 = vector.shape_cast %268 : vector<1x16x16xf32> to vector<16x16xf32>
    %c1_238 = arith.constant 1 : index
    %c0_239 = arith.constant 0 : index
    %c0_240 = arith.constant 0 : index
    %c0_241 = arith.constant 0 : index
    %270 = vector.load %arg2[%c1_238, %c0_239, %c0_240, %c0_241] : memref<3x9x1x256xf32, #tpu.memory_space<vmem>>, vector<1x1x1x256xf32>
    %271 = vector.shape_cast %270 : vector<1x1x1x256xf32> to vector<1x256xf32>
    %272 = vector.broadcast %271 : vector<1x256xf32> to vector<16x256xf32>
    %273 = arith.mulf %267, %272 : vector<16x256xf32>
    %cst_242 = arith.constant dense<0.000000e+00> : vector<16x256xf32>
    %274 = tpu.matmul %269, %273, %cst_242 {dimension_numbers = #tpu.dot_dimension_numbers<[1], [0], [0], [1], [0, 0, 1, 1], [], []>} : vector<16x16xf32>, vector<16x256xf32>, vector<16x256xf32> -> vector<16x256xf32>
    %c32_i32_243 = arith.constant 32 : i32
    %275 = tpu.dynamic_rotate %266 by %c32_i32_243 dim 1 : vector<16x256xf32>, i32 -> vector<16x256xf32>
    %c1_244 = arith.constant 1 : index
    %c0_245 = arith.constant 0 : index
    %c0_246 = arith.constant 0 : index
    %276 = vector.load %arg13[%c1_244, %c0_245, %c0_246] : memref<9x16x16xf32, #tpu.memory_space<vmem>>, vector<1x16x16xf32>
    %277 = vector.shape_cast %276 : vector<1x16x16xf32> to vector<16x16xf32>
    %c1_247 = arith.constant 1 : index
    %c1_248 = arith.constant 1 : index
    %c0_249 = arith.constant 0 : index
    %c0_250 = arith.constant 0 : index
    %278 = vector.load %arg2[%c1_247, %c1_248, %c0_249, %c0_250] : memref<3x9x1x256xf32, #tpu.memory_space<vmem>>, vector<1x1x1x256xf32>
    %279 = vector.shape_cast %278 : vector<1x1x1x256xf32> to vector<1x256xf32>
    %280 = vector.broadcast %279 : vector<1x256xf32> to vector<16x256xf32>
    %281 = arith.mulf %275, %280 : vector<16x256xf32>
    %cst_251 = arith.constant dense<0.000000e+00> : vector<16x256xf32>
    %282 = tpu.matmul %277, %281, %cst_251 {dimension_numbers = #tpu.dot_dimension_numbers<[1], [0], [0], [1], [0, 0, 1, 1], [], []>} : vector<16x16xf32>, vector<16x256xf32>, vector<16x256xf32> -> vector<16x256xf32>
    %283 = arith.addf %274, %282 : vector<16x256xf32>
    %c30_i32_252 = arith.constant 30 : i32
    %284 = tpu.dynamic_rotate %266 by %c30_i32_252 dim 1 : vector<16x256xf32>, i32 -> vector<16x256xf32>
    %c2_253 = arith.constant 2 : index
    %c0_254 = arith.constant 0 : index
    %c0_255 = arith.constant 0 : index
    %285 = vector.load %arg13[%c2_253, %c0_254, %c0_255] : memref<9x16x16xf32, #tpu.memory_space<vmem>>, vector<1x16x16xf32>
    %286 = vector.shape_cast %285 : vector<1x16x16xf32> to vector<16x16xf32>
    %c1_256 = arith.constant 1 : index
    %c2_257 = arith.constant 2 : index
    %c0_258 = arith.constant 0 : index
    %c0_259 = arith.constant 0 : index
    %287 = vector.load %arg2[%c1_256, %c2_257, %c0_258, %c0_259] : memref<3x9x1x256xf32, #tpu.memory_space<vmem>>, vector<1x1x1x256xf32>
    %288 = vector.shape_cast %287 : vector<1x1x1x256xf32> to vector<1x256xf32>
    %289 = vector.broadcast %288 : vector<1x256xf32> to vector<16x256xf32>
    %290 = arith.mulf %284, %289 : vector<16x256xf32>
    %cst_260 = arith.constant dense<0.000000e+00> : vector<16x256xf32>
    %291 = tpu.matmul %286, %290, %cst_260 {dimension_numbers = #tpu.dot_dimension_numbers<[1], [0], [0], [1], [0, 0, 1, 1], [], []>} : vector<16x16xf32>, vector<16x256xf32>, vector<16x256xf32> -> vector<16x256xf32>
    %292 = arith.addf %283, %291 : vector<16x256xf32>
    %c2_i32_261 = arith.constant 2 : i32
    %293 = tpu.dynamic_rotate %266 by %c2_i32_261 dim 1 : vector<16x256xf32>, i32 -> vector<16x256xf32>
    %c3_262 = arith.constant 3 : index
    %c0_263 = arith.constant 0 : index
    %c0_264 = arith.constant 0 : index
    %294 = vector.load %arg13[%c3_262, %c0_263, %c0_264] : memref<9x16x16xf32, #tpu.memory_space<vmem>>, vector<1x16x16xf32>
    %295 = vector.shape_cast %294 : vector<1x16x16xf32> to vector<16x16xf32>
    %c1_265 = arith.constant 1 : index
    %c3_266 = arith.constant 3 : index
    %c0_267 = arith.constant 0 : index
    %c0_268 = arith.constant 0 : index
    %296 = vector.load %arg2[%c1_265, %c3_266, %c0_267, %c0_268] : memref<3x9x1x256xf32, #tpu.memory_space<vmem>>, vector<1x1x1x256xf32>
    %297 = vector.shape_cast %296 : vector<1x1x1x256xf32> to vector<1x256xf32>
    %298 = vector.broadcast %297 : vector<1x256xf32> to vector<16x256xf32>
    %299 = arith.mulf %293, %298 : vector<16x256xf32>
    %cst_269 = arith.constant dense<0.000000e+00> : vector<16x256xf32>
    %300 = tpu.matmul %295, %299, %cst_269 {dimension_numbers = #tpu.dot_dimension_numbers<[1], [0], [0], [1], [0, 0, 1, 1], [], []>} : vector<16x16xf32>, vector<16x256xf32>, vector<16x256xf32> -> vector<16x256xf32>
    %301 = arith.addf %292, %300 : vector<16x256xf32>
    %c4_270 = arith.constant 4 : index
    %c0_271 = arith.constant 0 : index
    %c0_272 = arith.constant 0 : index
    %302 = vector.load %arg13[%c4_270, %c0_271, %c0_272] : memref<9x16x16xf32, #tpu.memory_space<vmem>>, vector<1x16x16xf32>
    %303 = vector.shape_cast %302 : vector<1x16x16xf32> to vector<16x16xf32>
    %c1_273 = arith.constant 1 : index
    %c4_274 = arith.constant 4 : index
    %c0_275 = arith.constant 0 : index
    %c0_276 = arith.constant 0 : index
    %304 = vector.load %arg2[%c1_273, %c4_274, %c0_275, %c0_276] : memref<3x9x1x256xf32, #tpu.memory_space<vmem>>, vector<1x1x1x256xf32>
    %305 = vector.shape_cast %304 : vector<1x1x1x256xf32> to vector<1x256xf32>
    %306 = vector.broadcast %305 : vector<1x256xf32> to vector<16x256xf32>
    %307 = arith.mulf %266, %306 : vector<16x256xf32>
    %cst_277 = arith.constant dense<0.000000e+00> : vector<16x256xf32>
    %308 = tpu.matmul %303, %307, %cst_277 {dimension_numbers = #tpu.dot_dimension_numbers<[1], [0], [0], [1], [0, 0, 1, 1], [], []>} : vector<16x16xf32>, vector<16x256xf32>, vector<16x256xf32> -> vector<16x256xf32>
    %309 = arith.addf %301, %308 : vector<16x256xf32>
    %c254_i32_278 = arith.constant 254 : i32
    %310 = tpu.dynamic_rotate %266 by %c254_i32_278 dim 1 : vector<16x256xf32>, i32 -> vector<16x256xf32>
    %c5_279 = arith.constant 5 : index
    %c0_280 = arith.constant 0 : index
    %c0_281 = arith.constant 0 : index
    %311 = vector.load %arg13[%c5_279, %c0_280, %c0_281] : memref<9x16x16xf32, #tpu.memory_space<vmem>>, vector<1x16x16xf32>
    %312 = vector.shape_cast %311 : vector<1x16x16xf32> to vector<16x16xf32>
    %c1_282 = arith.constant 1 : index
    %c5_283 = arith.constant 5 : index
    %c0_284 = arith.constant 0 : index
    %c0_285 = arith.constant 0 : index
    %313 = vector.load %arg2[%c1_282, %c5_283, %c0_284, %c0_285] : memref<3x9x1x256xf32, #tpu.memory_space<vmem>>, vector<1x1x1x256xf32>
    %314 = vector.shape_cast %313 : vector<1x1x1x256xf32> to vector<1x256xf32>
    %315 = vector.broadcast %314 : vector<1x256xf32> to vector<16x256xf32>
    %316 = arith.mulf %310, %315 : vector<16x256xf32>
    %cst_286 = arith.constant dense<0.000000e+00> : vector<16x256xf32>
    %317 = tpu.matmul %312, %316, %cst_286 {dimension_numbers = #tpu.dot_dimension_numbers<[1], [0], [0], [1], [0, 0, 1, 1], [], []>} : vector<16x16xf32>, vector<16x256xf32>, vector<16x256xf32> -> vector<16x256xf32>
    %318 = arith.addf %309, %317 : vector<16x256xf32>
    %c226_i32_287 = arith.constant 226 : i32
    %319 = tpu.dynamic_rotate %266 by %c226_i32_287 dim 1 : vector<16x256xf32>, i32 -> vector<16x256xf32>
    %c6_288 = arith.constant 6 : index
    %c0_289 = arith.constant 0 : index
    %c0_290 = arith.constant 0 : index
    %320 = vector.load %arg13[%c6_288, %c0_289, %c0_290] : memref<9x16x16xf32, #tpu.memory_space<vmem>>, vector<1x16x16xf32>
    %321 = vector.shape_cast %320 : vector<1x16x16xf32> to vector<16x16xf32>
    %c1_291 = arith.constant 1 : index
    %c6_292 = arith.constant 6 : index
    %c0_293 = arith.constant 0 : index
    %c0_294 = arith.constant 0 : index
    %322 = vector.load %arg2[%c1_291, %c6_292, %c0_293, %c0_294] : memref<3x9x1x256xf32, #tpu.memory_space<vmem>>, vector<1x1x1x256xf32>
    %323 = vector.shape_cast %322 : vector<1x1x1x256xf32> to vector<1x256xf32>
    %324 = vector.broadcast %323 : vector<1x256xf32> to vector<16x256xf32>
    %325 = arith.mulf %319, %324 : vector<16x256xf32>
    %cst_295 = arith.constant dense<0.000000e+00> : vector<16x256xf32>
    %326 = tpu.matmul %321, %325, %cst_295 {dimension_numbers = #tpu.dot_dimension_numbers<[1], [0], [0], [1], [0, 0, 1, 1], [], []>} : vector<16x16xf32>, vector<16x256xf32>, vector<16x256xf32> -> vector<16x256xf32>
    %327 = arith.addf %318, %326 : vector<16x256xf32>
    %c224_i32_296 = arith.constant 224 : i32
    %328 = tpu.dynamic_rotate %266 by %c224_i32_296 dim 1 : vector<16x256xf32>, i32 -> vector<16x256xf32>
    %c7_297 = arith.constant 7 : index
    %c0_298 = arith.constant 0 : index
    %c0_299 = arith.constant 0 : index
    %329 = vector.load %arg13[%c7_297, %c0_298, %c0_299] : memref<9x16x16xf32, #tpu.memory_space<vmem>>, vector<1x16x16xf32>
    %330 = vector.shape_cast %329 : vector<1x16x16xf32> to vector<16x16xf32>
    %c1_300 = arith.constant 1 : index
    %c7_301 = arith.constant 7 : index
    %c0_302 = arith.constant 0 : index
    %c0_303 = arith.constant 0 : index
    %331 = vector.load %arg2[%c1_300, %c7_301, %c0_302, %c0_303] : memref<3x9x1x256xf32, #tpu.memory_space<vmem>>, vector<1x1x1x256xf32>
    %332 = vector.shape_cast %331 : vector<1x1x1x256xf32> to vector<1x256xf32>
    %333 = vector.broadcast %332 : vector<1x256xf32> to vector<16x256xf32>
    %334 = arith.mulf %328, %333 : vector<16x256xf32>
    %cst_304 = arith.constant dense<0.000000e+00> : vector<16x256xf32>
    %335 = tpu.matmul %330, %334, %cst_304 {dimension_numbers = #tpu.dot_dimension_numbers<[1], [0], [0], [1], [0, 0, 1, 1], [], []>} : vector<16x16xf32>, vector<16x256xf32>, vector<16x256xf32> -> vector<16x256xf32>
    %336 = arith.addf %327, %335 : vector<16x256xf32>
    %c222_i32_305 = arith.constant 222 : i32
    %337 = tpu.dynamic_rotate %266 by %c222_i32_305 dim 1 : vector<16x256xf32>, i32 -> vector<16x256xf32>
    %c8_306 = arith.constant 8 : index
    %c0_307 = arith.constant 0 : index
    %c0_308 = arith.constant 0 : index
    %338 = vector.load %arg13[%c8_306, %c0_307, %c0_308] : memref<9x16x16xf32, #tpu.memory_space<vmem>>, vector<1x16x16xf32>
    %339 = vector.shape_cast %338 : vector<1x16x16xf32> to vector<16x16xf32>
    %c1_309 = arith.constant 1 : index
    %c8_310 = arith.constant 8 : index
    %c0_311 = arith.constant 0 : index
    %c0_312 = arith.constant 0 : index
    %340 = vector.load %arg2[%c1_309, %c8_310, %c0_311, %c0_312] : memref<3x9x1x256xf32, #tpu.memory_space<vmem>>, vector<1x1x1x256xf32>
    %341 = vector.shape_cast %340 : vector<1x1x1x256xf32> to vector<1x256xf32>
    %342 = vector.broadcast %341 : vector<1x256xf32> to vector<16x256xf32>
    %343 = arith.mulf %337, %342 : vector<16x256xf32>
    %cst_313 = arith.constant dense<0.000000e+00> : vector<16x256xf32>
    %344 = tpu.matmul %339, %343, %cst_313 {dimension_numbers = #tpu.dot_dimension_numbers<[1], [0], [0], [1], [0, 0, 1, 1], [], []>} : vector<16x16xf32>, vector<16x256xf32>, vector<16x256xf32> -> vector<16x256xf32>
    %345 = arith.addf %336, %344 : vector<16x256xf32>
    %c0_314 = arith.constant 0 : index
    %c0_315 = arith.constant 0 : index
    %346 = vector.load %arg14[%c0_314, %c0_315] : memref<16x1xf32, #tpu.memory_space<vmem>>, vector<16x1xf32>
    %347 = vector.broadcast %346 : vector<16x1xf32> to vector<16x256xf32>
    %348 = arith.mulf %345, %347 : vector<16x256xf32>
    %c0_316 = arith.constant 0 : index
    %c0_317 = arith.constant 0 : index
    %349 = vector.load %arg15[%c0_316, %c0_317] : memref<16x1xf32, #tpu.memory_space<vmem>>, vector<16x1xf32>
    %350 = vector.broadcast %349 : vector<16x1xf32> to vector<16x256xf32>
    %351 = arith.addf %348, %350 : vector<16x256xf32>
    %cst_318 = arith.constant 0.000000e+00 : f32
    %352 = vector.broadcast %cst_318 : f32 to vector<16x256xf32>
    %353 = arith.maximumf %351, %352 : vector<16x256xf32>
    %c254_i32_319 = arith.constant 254 : i32
    %354 = tpu.dynamic_rotate %353 by %c254_i32_319 dim 1 : vector<16x256xf32>, i32 -> vector<16x256xf32>
    %355 = arith.maximumf %353, %354 : vector<16x256xf32>
    %c224_i32_320 = arith.constant 224 : i32
    %356 = tpu.dynamic_rotate %355 by %c224_i32_320 dim 1 : vector<16x256xf32>, i32 -> vector<16x256xf32>
    %357 = arith.maximumf %355, %356 : vector<16x256xf32>
    %c0_321 = arith.constant 0 : index
    %c0_322 = arith.constant 0 : index
    %c0_323 = arith.constant 0 : index
    %358 = vector.load %arg32[%c0_321, %c0_322, %c0_323] : memref<1x16x256xf32, #tpu.memory_space<vmem>>, vector<1x16x256xf32>
    %359 = vector.shape_cast %358 : vector<1x16x256xf32> to vector<16x256xf32>
    %360 = vector.shape_cast %357 : vector<16x256xf32> to vector<1x16x256xf32>
    tpu.vector_store %arg32[%c0_321, %c0_322, %c0_323], %360 {strides = array<i32>} : memref<1x16x256xf32, #tpu.memory_space<vmem>>, vector<1x16x256xf32>,
    %c68_i32 = arith.constant 68 : i32
    %361 = tpu.dynamic_rotate %357 by %c68_i32 dim 1 : vector<16x256xf32>, i32 -> vector<16x256xf32>
    %c0_324 = arith.constant 0 : index
    %c0_325 = arith.constant 0 : index
    %c0_326 = arith.constant 0 : index
    %362 = vector.load %arg16[%c0_324, %c0_325, %c0_326] : memref<9x8x16xf32, #tpu.memory_space<vmem>>, vector<1x8x16xf32>
    %363 = vector.shape_cast %362 : vector<1x8x16xf32> to vector<8x16xf32>
    %c2_327 = arith.constant 2 : index
    %c0_328 = arith.constant 0 : index
    %c0_329 = arith.constant 0 : index
    %c0_330 = arith.constant 0 : index
    %364 = vector.load %arg2[%c2_327, %c0_328, %c0_329, %c0_330] : memref<3x9x1x256xf32, #tpu.memory_space<vmem>>, vector<1x1x1x256xf32>
    %365 = vector.shape_cast %364 : vector<1x1x1x256xf32> to vector<1x256xf32>
    %366 = vector.broadcast %365 : vector<1x256xf32> to vector<16x256xf32>
    %367 = arith.mulf %361, %366 : vector<16x256xf32>
    %cst_331 = arith.constant dense<0.000000e+00> : vector<8x256xf32>
    %368 = tpu.matmul %363, %367, %cst_331 {dimension_numbers = #tpu.dot_dimension_numbers<[1], [0], [0], [1], [0, 0, 1, 1], [], []>} : vector<8x16xf32>, vector<16x256xf32>, vector<8x256xf32> -> vector<8x256xf32>
    %c64_i32 = arith.constant 64 : i32
    %369 = tpu.dynamic_rotate %357 by %c64_i32 dim 1 : vector<16x256xf32>, i32 -> vector<16x256xf32>
    %c1_332 = arith.constant 1 : index
    %c0_333 = arith.constant 0 : index
    %c0_334 = arith.constant 0 : index
    %370 = vector.load %arg16[%c1_332, %c0_333, %c0_334] : memref<9x8x16xf32, #tpu.memory_space<vmem>>, vector<1x8x16xf32>
    %371 = vector.shape_cast %370 : vector<1x8x16xf32> to vector<8x16xf32>
    %c2_335 = arith.constant 2 : index
    %c1_336 = arith.constant 1 : index
    %c0_337 = arith.constant 0 : index
    %c0_338 = arith.constant 0 : index
    %372 = vector.load %arg2[%c2_335, %c1_336, %c0_337, %c0_338] : memref<3x9x1x256xf32, #tpu.memory_space<vmem>>, vector<1x1x1x256xf32>
    %373 = vector.shape_cast %372 : vector<1x1x1x256xf32> to vector<1x256xf32>
    %374 = vector.broadcast %373 : vector<1x256xf32> to vector<16x256xf32>
    %375 = arith.mulf %369, %374 : vector<16x256xf32>
    %cst_339 = arith.constant dense<0.000000e+00> : vector<8x256xf32>
    %376 = tpu.matmul %371, %375, %cst_339 {dimension_numbers = #tpu.dot_dimension_numbers<[1], [0], [0], [1], [0, 0, 1, 1], [], []>} : vector<8x16xf32>, vector<16x256xf32>, vector<8x256xf32> -> vector<8x256xf32>
    %377 = arith.addf %368, %376 : vector<8x256xf32>
    %c60_i32 = arith.constant 60 : i32
    %378 = tpu.dynamic_rotate %357 by %c60_i32 dim 1 : vector<16x256xf32>, i32 -> vector<16x256xf32>
    %c2_340 = arith.constant 2 : index
    %c0_341 = arith.constant 0 : index
    %c0_342 = arith.constant 0 : index
    %379 = vector.load %arg16[%c2_340, %c0_341, %c0_342] : memref<9x8x16xf32, #tpu.memory_space<vmem>>, vector<1x8x16xf32>
    %380 = vector.shape_cast %379 : vector<1x8x16xf32> to vector<8x16xf32>
    %c2_343 = arith.constant 2 : index
    %c2_344 = arith.constant 2 : index
    %c0_345 = arith.constant 0 : index
    %c0_346 = arith.constant 0 : index
    %381 = vector.load %arg2[%c2_343, %c2_344, %c0_345, %c0_346] : memref<3x9x1x256xf32, #tpu.memory_space<vmem>>, vector<1x1x1x256xf32>
    %382 = vector.shape_cast %381 : vector<1x1x1x256xf32> to vector<1x256xf32>
    %383 = vector.broadcast %382 : vector<1x256xf32> to vector<16x256xf32>
    %384 = arith.mulf %378, %383 : vector<16x256xf32>
    %cst_347 = arith.constant dense<0.000000e+00> : vector<8x256xf32>
    %385 = tpu.matmul %380, %384, %cst_347 {dimension_numbers = #tpu.dot_dimension_numbers<[1], [0], [0], [1], [0, 0, 1, 1], [], []>} : vector<8x16xf32>, vector<16x256xf32>, vector<8x256xf32> -> vector<8x256xf32>
    %386 = arith.addf %377, %385 : vector<8x256xf32>
    %c4_i32 = arith.constant 4 : i32
    %387 = tpu.dynamic_rotate %357 by %c4_i32 dim 1 : vector<16x256xf32>, i32 -> vector<16x256xf32>
    %c3_348 = arith.constant 3 : index
    %c0_349 = arith.constant 0 : index
    %c0_350 = arith.constant 0 : index
    %388 = vector.load %arg16[%c3_348, %c0_349, %c0_350] : memref<9x8x16xf32, #tpu.memory_space<vmem>>, vector<1x8x16xf32>
    %389 = vector.shape_cast %388 : vector<1x8x16xf32> to vector<8x16xf32>
    %c2_351 = arith.constant 2 : index
    %c3_352 = arith.constant 3 : index
    %c0_353 = arith.constant 0 : index
    %c0_354 = arith.constant 0 : index
    %390 = vector.load %arg2[%c2_351, %c3_352, %c0_353, %c0_354] : memref<3x9x1x256xf32, #tpu.memory_space<vmem>>, vector<1x1x1x256xf32>
    %391 = vector.shape_cast %390 : vector<1x1x1x256xf32> to vector<1x256xf32>
    %392 = vector.broadcast %391 : vector<1x256xf32> to vector<16x256xf32>
    %393 = arith.mulf %387, %392 : vector<16x256xf32>
    %cst_355 = arith.constant dense<0.000000e+00> : vector<8x256xf32>
    %394 = tpu.matmul %389, %393, %cst_355 {dimension_numbers = #tpu.dot_dimension_numbers<[1], [0], [0], [1], [0, 0, 1, 1], [], []>} : vector<8x16xf32>, vector<16x256xf32>, vector<8x256xf32> -> vector<8x256xf32>
    %395 = arith.addf %386, %394 : vector<8x256xf32>
    %c4_356 = arith.constant 4 : index
    %c0_357 = arith.constant 0 : index
    %c0_358 = arith.constant 0 : index
    %396 = vector.load %arg16[%c4_356, %c0_357, %c0_358] : memref<9x8x16xf32, #tpu.memory_space<vmem>>, vector<1x8x16xf32>
    %397 = vector.shape_cast %396 : vector<1x8x16xf32> to vector<8x16xf32>
    %c2_359 = arith.constant 2 : index
    %c4_360 = arith.constant 4 : index
    %c0_361 = arith.constant 0 : index
    %c0_362 = arith.constant 0 : index
    %398 = vector.load %arg2[%c2_359, %c4_360, %c0_361, %c0_362] : memref<3x9x1x256xf32, #tpu.memory_space<vmem>>, vector<1x1x1x256xf32>
    %399 = vector.shape_cast %398 : vector<1x1x1x256xf32> to vector<1x256xf32>
    %400 = vector.broadcast %399 : vector<1x256xf32> to vector<16x256xf32>
    %401 = arith.mulf %357, %400 : vector<16x256xf32>
    %cst_363 = arith.constant dense<0.000000e+00> : vector<8x256xf32>
    %402 = tpu.matmul %397, %401, %cst_363 {dimension_numbers = #tpu.dot_dimension_numbers<[1], [0], [0], [1], [0, 0, 1, 1], [], []>} : vector<8x16xf32>, vector<16x256xf32>, vector<8x256xf32> -> vector<8x256xf32>
    %403 = arith.addf %395, %402 : vector<8x256xf32>
    %c252_i32 = arith.constant 252 : i32
    %404 = tpu.dynamic_rotate %357 by %c252_i32 dim 1 : vector<16x256xf32>, i32 -> vector<16x256xf32>
    %c5_364 = arith.constant 5 : index
    %c0_365 = arith.constant 0 : index
    %c0_366 = arith.constant 0 : index
    %405 = vector.load %arg16[%c5_364, %c0_365, %c0_366] : memref<9x8x16xf32, #tpu.memory_space<vmem>>, vector<1x8x16xf32>
    %406 = vector.shape_cast %405 : vector<1x8x16xf32> to vector<8x16xf32>
    %c2_367 = arith.constant 2 : index
    %c5_368 = arith.constant 5 : index
    %c0_369 = arith.constant 0 : index
    %c0_370 = arith.constant 0 : index
    %407 = vector.load %arg2[%c2_367, %c5_368, %c0_369, %c0_370] : memref<3x9x1x256xf32, #tpu.memory_space<vmem>>, vector<1x1x1x256xf32>
    %408 = vector.shape_cast %407 : vector<1x1x1x256xf32> to vector<1x256xf32>
    %409 = vector.broadcast %408 : vector<1x256xf32> to vector<16x256xf32>
    %410 = arith.mulf %404, %409 : vector<16x256xf32>
    %cst_371 = arith.constant dense<0.000000e+00> : vector<8x256xf32>
    %411 = tpu.matmul %406, %410, %cst_371 {dimension_numbers = #tpu.dot_dimension_numbers<[1], [0], [0], [1], [0, 0, 1, 1], [], []>} : vector<8x16xf32>, vector<16x256xf32>, vector<8x256xf32> -> vector<8x256xf32>
    %412 = arith.addf %403, %411 : vector<8x256xf32>
    %c196_i32 = arith.constant 196 : i32
    %413 = tpu.dynamic_rotate %357 by %c196_i32 dim 1 : vector<16x256xf32>, i32 -> vector<16x256xf32>
    %c6_372 = arith.constant 6 : index
    %c0_373 = arith.constant 0 : index
    %c0_374 = arith.constant 0 : index
    %414 = vector.load %arg16[%c6_372, %c0_373, %c0_374] : memref<9x8x16xf32, #tpu.memory_space<vmem>>, vector<1x8x16xf32>
    %415 = vector.shape_cast %414 : vector<1x8x16xf32> to vector<8x16xf32>
    %c2_375 = arith.constant 2 : index
    %c6_376 = arith.constant 6 : index
    %c0_377 = arith.constant 0 : index
    %c0_378 = arith.constant 0 : index
    %416 = vector.load %arg2[%c2_375, %c6_376, %c0_377, %c0_378] : memref<3x9x1x256xf32, #tpu.memory_space<vmem>>, vector<1x1x1x256xf32>
    %417 = vector.shape_cast %416 : vector<1x1x1x256xf32> to vector<1x256xf32>
    %418 = vector.broadcast %417 : vector<1x256xf32> to vector<16x256xf32>
    %419 = arith.mulf %413, %418 : vector<16x256xf32>
    %cst_379 = arith.constant dense<0.000000e+00> : vector<8x256xf32>
    %420 = tpu.matmul %415, %419, %cst_379 {dimension_numbers = #tpu.dot_dimension_numbers<[1], [0], [0], [1], [0, 0, 1, 1], [], []>} : vector<8x16xf32>, vector<16x256xf32>, vector<8x256xf32> -> vector<8x256xf32>
    %421 = arith.addf %412, %420 : vector<8x256xf32>
    %c192_i32 = arith.constant 192 : i32
    %422 = tpu.dynamic_rotate %357 by %c192_i32 dim 1 : vector<16x256xf32>, i32 -> vector<16x256xf32>
    %c7_380 = arith.constant 7 : index
    %c0_381 = arith.constant 0 : index
    %c0_382 = arith.constant 0 : index
    %423 = vector.load %arg16[%c7_380, %c0_381, %c0_382] : memref<9x8x16xf32, #tpu.memory_space<vmem>>, vector<1x8x16xf32>
    %424 = vector.shape_cast %423 : vector<1x8x16xf32> to vector<8x16xf32>
    %c2_383 = arith.constant 2 : index
    %c7_384 = arith.constant 7 : index
    %c0_385 = arith.constant 0 : index
    %c0_386 = arith.constant 0 : index
    %425 = vector.load %arg2[%c2_383, %c7_384, %c0_385, %c0_386] : memref<3x9x1x256xf32, #tpu.memory_space<vmem>>, vector<1x1x1x256xf32>
    %426 = vector.shape_cast %425 : vector<1x1x1x256xf32> to vector<1x256xf32>
    %427 = vector.broadcast %426 : vector<1x256xf32> to vector<16x256xf32>
    %428 = arith.mulf %422, %427 : vector<16x256xf32>
    %cst_387 = arith.constant dense<0.000000e+00> : vector<8x256xf32>
    %429 = tpu.matmul %424, %428, %cst_387 {dimension_numbers = #tpu.dot_dimension_numbers<[1], [0], [0], [1], [0, 0, 1, 1], [], []>} : vector<8x16xf32>, vector<16x256xf32>, vector<8x256xf32> -> vector<8x256xf32>
    %430 = arith.addf %421, %429 : vector<8x256xf32>
    %c188_i32 = arith.constant 188 : i32
    %431 = tpu.dynamic_rotate %357 by %c188_i32 dim 1 : vector<16x256xf32>, i32 -> vector<16x256xf32>
    %c8_388 = arith.constant 8 : index
    %c0_389 = arith.constant 0 : index
    %c0_390 = arith.constant 0 : index
    %432 = vector.load %arg16[%c8_388, %c0_389, %c0_390] : memref<9x8x16xf32, #tpu.memory_space<vmem>>, vector<1x8x16xf32>
    %433 = vector.shape_cast %432 : vector<1x8x16xf32> to vector<8x16xf32>
    %c2_391 = arith.constant 2 : index
    %c8_392 = arith.constant 8 : index
    %c0_393 = arith.constant 0 : index
    %c0_394 = arith.constant 0 : index
    %434 = vector.load %arg2[%c2_391, %c8_392, %c0_393, %c0_394] : memref<3x9x1x256xf32, #tpu.memory_space<vmem>>, vector<1x1x1x256xf32>
    %435 = vector.shape_cast %434 : vector<1x1x1x256xf32> to vector<1x256xf32>
    %436 = vector.broadcast %435 : vector<1x256xf32> to vector<16x256xf32>
    %437 = arith.mulf %431, %436 : vector<16x256xf32>
    %cst_395 = arith.constant dense<0.000000e+00> : vector<8x256xf32>
    %438 = tpu.matmul %433, %437, %cst_395 {dimension_numbers = #tpu.dot_dimension_numbers<[1], [0], [0], [1], [0, 0, 1, 1], [], []>} : vector<8x16xf32>, vector<16x256xf32>, vector<8x256xf32> -> vector<8x256xf32>
    %439 = arith.addf %430, %438 : vector<8x256xf32>
    %c0_396 = arith.constant 0 : index
    %c0_397 = arith.constant 0 : index
    %440 = vector.load %arg17[%c0_396, %c0_397] : memref<8x1xf32, #tpu.memory_space<vmem>>, vector<8x1xf32>
    %441 = vector.broadcast %440 : vector<8x1xf32> to vector<8x256xf32>
    %442 = arith.mulf %439, %441 : vector<8x256xf32>
    %c0_398 = arith.constant 0 : index
    %c0_399 = arith.constant 0 : index
    %443 = vector.load %arg18[%c0_398, %c0_399] : memref<8x1xf32, #tpu.memory_space<vmem>>, vector<8x1xf32>
    %444 = vector.broadcast %443 : vector<8x1xf32> to vector<8x256xf32>
    %445 = arith.addf %442, %444 : vector<8x256xf32>
    %cst_400 = arith.constant 0.000000e+00 : f32
    %446 = vector.broadcast %cst_400 : f32 to vector<8x256xf32>
    %447 = arith.maximumf %445, %446 : vector<8x256xf32>
    %c68_i32_401 = arith.constant 68 : i32
    %448 = tpu.dynamic_rotate %447 by %c68_i32_401 dim 1 : vector<8x256xf32>, i32 -> vector<8x256xf32>
    %c0_402 = arith.constant 0 : index
    %c0_403 = arith.constant 0 : index
    %c0_404 = arith.constant 0 : index
    %449 = vector.load %arg19[%c0_402, %c0_403, %c0_404] : memref<9x8x8xf32, #tpu.memory_space<vmem>>, vector<1x8x8xf32>
    %450 = vector.shape_cast %449 : vector<1x8x8xf32> to vector<8x8xf32>
    %c2_405 = arith.constant 2 : index
    %c0_406 = arith.constant 0 : index
    %c0_407 = arith.constant 0 : index
    %c0_408 = arith.constant 0 : index
    %451 = vector.load %arg2[%c2_405, %c0_406, %c0_407, %c0_408] : memref<3x9x1x256xf32, #tpu.memory_space<vmem>>, vector<1x1x1x256xf32>
    %452 = vector.shape_cast %451 : vector<1x1x1x256xf32> to vector<1x256xf32>
    %453 = vector.broadcast %452 : vector<1x256xf32> to vector<8x256xf32>
    %454 = arith.mulf %448, %453 : vector<8x256xf32>
    %cst_409 = arith.constant dense<0.000000e+00> : vector<8x256xf32>
    %455 = tpu.matmul %450, %454, %cst_409 {dimension_numbers = #tpu.dot_dimension_numbers<[1], [0], [0], [1], [0, 0, 1, 1], [], []>} : vector<8x8xf32>, vector<8x256xf32>, vector<8x256xf32> -> vector<8x256xf32>
    %c64_i32_410 = arith.constant 64 : i32
    %456 = tpu.dynamic_rotate %447 by %c64_i32_410 dim 1 : vector<8x256xf32>, i32 -> vector<8x256xf32>
    %c1_411 = arith.constant 1 : index
    %c0_412 = arith.constant 0 : index
    %c0_413 = arith.constant 0 : index
    %457 = vector.load %arg19[%c1_411, %c0_412, %c0_413] : memref<9x8x8xf32, #tpu.memory_space<vmem>>, vector<1x8x8xf32>
    %458 = vector.shape_cast %457 : vector<1x8x8xf32> to vector<8x8xf32>
    %c2_414 = arith.constant 2 : index
    %c1_415 = arith.constant 1 : index
    %c0_416 = arith.constant 0 : index
    %c0_417 = arith.constant 0 : index
    %459 = vector.load %arg2[%c2_414, %c1_415, %c0_416, %c0_417] : memref<3x9x1x256xf32, #tpu.memory_space<vmem>>, vector<1x1x1x256xf32>
    %460 = vector.shape_cast %459 : vector<1x1x1x256xf32> to vector<1x256xf32>
    %461 = vector.broadcast %460 : vector<1x256xf32> to vector<8x256xf32>
    %462 = arith.mulf %456, %461 : vector<8x256xf32>
    %cst_418 = arith.constant dense<0.000000e+00> : vector<8x256xf32>
    %463 = tpu.matmul %458, %462, %cst_418 {dimension_numbers = #tpu.dot_dimension_numbers<[1], [0], [0], [1], [0, 0, 1, 1], [], []>} : vector<8x8xf32>, vector<8x256xf32>, vector<8x256xf32> -> vector<8x256xf32>
    %464 = arith.addf %455, %463 : vector<8x256xf32>
    %c60_i32_419 = arith.constant 60 : i32
    %465 = tpu.dynamic_rotate %447 by %c60_i32_419 dim 1 : vector<8x256xf32>, i32 -> vector<8x256xf32>
    %c2_420 = arith.constant 2 : index
    %c0_421 = arith.constant 0 : index
    %c0_422 = arith.constant 0 : index
    %466 = vector.load %arg19[%c2_420, %c0_421, %c0_422] : memref<9x8x8xf32, #tpu.memory_space<vmem>>, vector<1x8x8xf32>
    %467 = vector.shape_cast %466 : vector<1x8x8xf32> to vector<8x8xf32>
    %c2_423 = arith.constant 2 : index
    %c2_424 = arith.constant 2 : index
    %c0_425 = arith.constant 0 : index
    %c0_426 = arith.constant 0 : index
    %468 = vector.load %arg2[%c2_423, %c2_424, %c0_425, %c0_426] : memref<3x9x1x256xf32, #tpu.memory_space<vmem>>, vector<1x1x1x256xf32>
    %469 = vector.shape_cast %468 : vector<1x1x1x256xf32> to vector<1x256xf32>
    %470 = vector.broadcast %469 : vector<1x256xf32> to vector<8x256xf32>
    %471 = arith.mulf %465, %470 : vector<8x256xf32>
    %cst_427 = arith.constant dense<0.000000e+00> : vector<8x256xf32>
    %472 = tpu.matmul %467, %471, %cst_427 {dimension_numbers = #tpu.dot_dimension_numbers<[1], [0], [0], [1], [0, 0, 1, 1], [], []>} : vector<8x8xf32>, vector<8x256xf32>, vector<8x256xf32> -> vector<8x256xf32>
    %473 = arith.addf %464, %472 : vector<8x256xf32>
    %c4_i32_428 = arith.constant 4 : i32
    %474 = tpu.dynamic_rotate %447 by %c4_i32_428 dim 1 : vector<8x256xf32>, i32 -> vector<8x256xf32>
    %c3_429 = arith.constant 3 : index
    %c0_430 = arith.constant 0 : index
    %c0_431 = arith.constant 0 : index
    %475 = vector.load %arg19[%c3_429, %c0_430, %c0_431] : memref<9x8x8xf32, #tpu.memory_space<vmem>>, vector<1x8x8xf32>
    %476 = vector.shape_cast %475 : vector<1x8x8xf32> to vector<8x8xf32>
    %c2_432 = arith.constant 2 : index
    %c3_433 = arith.constant 3 : index
    %c0_434 = arith.constant 0 : index
    %c0_435 = arith.constant 0 : index
    %477 = vector.load %arg2[%c2_432, %c3_433, %c0_434, %c0_435] : memref<3x9x1x256xf32, #tpu.memory_space<vmem>>, vector<1x1x1x256xf32>
    %478 = vector.shape_cast %477 : vector<1x1x1x256xf32> to vector<1x256xf32>
    %479 = vector.broadcast %478 : vector<1x256xf32> to vector<8x256xf32>
    %480 = arith.mulf %474, %479 : vector<8x256xf32>
    %cst_436 = arith.constant dense<0.000000e+00> : vector<8x256xf32>
    %481 = tpu.matmul %476, %480, %cst_436 {dimension_numbers = #tpu.dot_dimension_numbers<[1], [0], [0], [1], [0, 0, 1, 1], [], []>} : vector<8x8xf32>, vector<8x256xf32>, vector<8x256xf32> -> vector<8x256xf32>
    %482 = arith.addf %473, %481 : vector<8x256xf32>
    %c4_437 = arith.constant 4 : index
    %c0_438 = arith.constant 0 : index
    %c0_439 = arith.constant 0 : index
    %483 = vector.load %arg19[%c4_437, %c0_438, %c0_439] : memref<9x8x8xf32, #tpu.memory_space<vmem>>, vector<1x8x8xf32>
    %484 = vector.shape_cast %483 : vector<1x8x8xf32> to vector<8x8xf32>
    %c2_440 = arith.constant 2 : index
    %c4_441 = arith.constant 4 : index
    %c0_442 = arith.constant 0 : index
    %c0_443 = arith.constant 0 : index
    %485 = vector.load %arg2[%c2_440, %c4_441, %c0_442, %c0_443] : memref<3x9x1x256xf32, #tpu.memory_space<vmem>>, vector<1x1x1x256xf32>
    %486 = vector.shape_cast %485 : vector<1x1x1x256xf32> to vector<1x256xf32>
    %487 = vector.broadcast %486 : vector<1x256xf32> to vector<8x256xf32>
    %488 = arith.mulf %447, %487 : vector<8x256xf32>
    %cst_444 = arith.constant dense<0.000000e+00> : vector<8x256xf32>
    %489 = tpu.matmul %484, %488, %cst_444 {dimension_numbers = #tpu.dot_dimension_numbers<[1], [0], [0], [1], [0, 0, 1, 1], [], []>} : vector<8x8xf32>, vector<8x256xf32>, vector<8x256xf32> -> vector<8x256xf32>
    %490 = arith.addf %482, %489 : vector<8x256xf32>
    %c252_i32_445 = arith.constant 252 : i32
    %491 = tpu.dynamic_rotate %447 by %c252_i32_445 dim 1 : vector<8x256xf32>, i32 -> vector<8x256xf32>
    %c5_446 = arith.constant 5 : index
    %c0_447 = arith.constant 0 : index
    %c0_448 = arith.constant 0 : index
    %492 = vector.load %arg19[%c5_446, %c0_447, %c0_448] : memref<9x8x8xf32, #tpu.memory_space<vmem>>, vector<1x8x8xf32>
    %493 = vector.shape_cast %492 : vector<1x8x8xf32> to vector<8x8xf32>
    %c2_449 = arith.constant 2 : index
    %c5_450 = arith.constant 5 : index
    %c0_451 = arith.constant 0 : index
    %c0_452 = arith.constant 0 : index
    %494 = vector.load %arg2[%c2_449, %c5_450, %c0_451, %c0_452] : memref<3x9x1x256xf32, #tpu.memory_space<vmem>>, vector<1x1x1x256xf32>
    %495 = vector.shape_cast %494 : vector<1x1x1x256xf32> to vector<1x256xf32>
    %496 = vector.broadcast %495 : vector<1x256xf32> to vector<8x256xf32>
    %497 = arith.mulf %491, %496 : vector<8x256xf32>
    %cst_453 = arith.constant dense<0.000000e+00> : vector<8x256xf32>
    %498 = tpu.matmul %493, %497, %cst_453 {dimension_numbers = #tpu.dot_dimension_numbers<[1], [0], [0], [1], [0, 0, 1, 1], [], []>} : vector<8x8xf32>, vector<8x256xf32>, vector<8x256xf32> -> vector<8x256xf32>
    %499 = arith.addf %490, %498 : vector<8x256xf32>
    %c196_i32_454 = arith.constant 196 : i32
    %500 = tpu.dynamic_rotate %447 by %c196_i32_454 dim 1 : vector<8x256xf32>, i32 -> vector<8x256xf32>
    %c6_455 = arith.constant 6 : index
    %c0_456 = arith.constant 0 : index
    %c0_457 = arith.constant 0 : index
    %501 = vector.load %arg19[%c6_455, %c0_456, %c0_457] : memref<9x8x8xf32, #tpu.memory_space<vmem>>, vector<1x8x8xf32>
    %502 = vector.shape_cast %501 : vector<1x8x8xf32> to vector<8x8xf32>
    %c2_458 = arith.constant 2 : index
    %c6_459 = arith.constant 6 : index
    %c0_460 = arith.constant 0 : index
    %c0_461 = arith.constant 0 : index
    %503 = vector.load %arg2[%c2_458, %c6_459, %c0_460, %c0_461] : memref<3x9x1x256xf32, #tpu.memory_space<vmem>>, vector<1x1x1x256xf32>
    %504 = vector.shape_cast %503 : vector<1x1x1x256xf32> to vector<1x256xf32>
    %505 = vector.broadcast %504 : vector<1x256xf32> to vector<8x256xf32>
    %506 = arith.mulf %500, %505 : vector<8x256xf32>
    %cst_462 = arith.constant dense<0.000000e+00> : vector<8x256xf32>
    %507 = tpu.matmul %502, %506, %cst_462 {dimension_numbers = #tpu.dot_dimension_numbers<[1], [0], [0], [1], [0, 0, 1, 1], [], []>} : vector<8x8xf32>, vector<8x256xf32>, vector<8x256xf32> -> vector<8x256xf32>
    %508 = arith.addf %499, %507 : vector<8x256xf32>
    %c192_i32_463 = arith.constant 192 : i32
    %509 = tpu.dynamic_rotate %447 by %c192_i32_463 dim 1 : vector<8x256xf32>, i32 -> vector<8x256xf32>
    %c7_464 = arith.constant 7 : index
    %c0_465 = arith.constant 0 : index
    %c0_466 = arith.constant 0 : index
    %510 = vector.load %arg19[%c7_464, %c0_465, %c0_466] : memref<9x8x8xf32, #tpu.memory_space<vmem>>, vector<1x8x8xf32>
    %511 = vector.shape_cast %510 : vector<1x8x8xf32> to vector<8x8xf32>
    %c2_467 = arith.constant 2 : index
    %c7_468 = arith.constant 7 : index
    %c0_469 = arith.constant 0 : index
    %c0_470 = arith.constant 0 : index
    %512 = vector.load %arg2[%c2_467, %c7_468, %c0_469, %c0_470] : memref<3x9x1x256xf32, #tpu.memory_space<vmem>>, vector<1x1x1x256xf32>
    %513 = vector.shape_cast %512 : vector<1x1x1x256xf32> to vector<1x256xf32>
    %514 = vector.broadcast %513 : vector<1x256xf32> to vector<8x256xf32>
    %515 = arith.mulf %509, %514 : vector<8x256xf32>
    %cst_471 = arith.constant dense<0.000000e+00> : vector<8x256xf32>
    %516 = tpu.matmul %511, %515, %cst_471 {dimension_numbers = #tpu.dot_dimension_numbers<[1], [0], [0], [1], [0, 0, 1, 1], [], []>} : vector<8x8xf32>, vector<8x256xf32>, vector<8x256xf32> -> vector<8x256xf32>
    %517 = arith.addf %508, %516 : vector<8x256xf32>
    %c188_i32_472 = arith.constant 188 : i32
    %518 = tpu.dynamic_rotate %447 by %c188_i32_472 dim 1 : vector<8x256xf32>, i32 -> vector<8x256xf32>
    %c8_473 = arith.constant 8 : index
    %c0_474 = arith.constant 0 : index
    %c0_475 = arith.constant 0 : index
    %519 = vector.load %arg19[%c8_473, %c0_474, %c0_475] : memref<9x8x8xf32, #tpu.memory_space<vmem>>, vector<1x8x8xf32>
    %520 = vector.shape_cast %519 : vector<1x8x8xf32> to vector<8x8xf32>
    %c2_476 = arith.constant 2 : index
    %c8_477 = arith.constant 8 : index
    %c0_478 = arith.constant 0 : index
    %c0_479 = arith.constant 0 : index
    %521 = vector.load %arg2[%c2_476, %c8_477, %c0_478, %c0_479] : memref<3x9x1x256xf32, #tpu.memory_space<vmem>>, vector<1x1x1x256xf32>
    %522 = vector.shape_cast %521 : vector<1x1x1x256xf32> to vector<1x256xf32>
    %523 = vector.broadcast %522 : vector<1x256xf32> to vector<8x256xf32>
    %524 = arith.mulf %518, %523 : vector<8x256xf32>
    %cst_480 = arith.constant dense<0.000000e+00> : vector<8x256xf32>
    %525 = tpu.matmul %520, %524, %cst_480 {dimension_numbers = #tpu.dot_dimension_numbers<[1], [0], [0], [1], [0, 0, 1, 1], [], []>} : vector<8x8xf32>, vector<8x256xf32>, vector<8x256xf32> -> vector<8x256xf32>
    %526 = arith.addf %517, %525 : vector<8x256xf32>
    %c0_481 = arith.constant 0 : index
    %c0_482 = arith.constant 0 : index
    %527 = vector.load %arg20[%c0_481, %c0_482] : memref<8x1xf32, #tpu.memory_space<vmem>>, vector<8x1xf32>
    %528 = vector.broadcast %527 : vector<8x1xf32> to vector<8x256xf32>
    %529 = arith.mulf %526, %528 : vector<8x256xf32>
    %c0_483 = arith.constant 0 : index
    %c0_484 = arith.constant 0 : index
    %530 = vector.load %arg21[%c0_483, %c0_484] : memref<8x1xf32, #tpu.memory_space<vmem>>, vector<8x1xf32>
    %531 = vector.broadcast %530 : vector<8x1xf32> to vector<8x256xf32>
    %532 = arith.addf %529, %531 : vector<8x256xf32>
    %cst_485 = arith.constant 0.000000e+00 : f32
    %533 = vector.broadcast %cst_485 : f32 to vector<8x256xf32>
    %534 = arith.maximumf %532, %533 : vector<8x256xf32>
    %c0_486 = arith.constant 0 : index
    %c0_487 = arith.constant 0 : index
    %c0_488 = arith.constant 0 : index
    %535 = vector.load %arg22[%c0_486, %c0_487, %c0_488] : memref<4x8x8xf32, #tpu.memory_space<vmem>>, vector<1x8x8xf32>
    %536 = vector.shape_cast %535 : vector<1x8x8xf32> to vector<8x8xf32>
    %cst_489 = arith.constant dense<0.000000e+00> : vector<8x256xf32>
    %537 = tpu.matmul %536, %534, %cst_489 {dimension_numbers = #tpu.dot_dimension_numbers<[1], [0], [0], [1], [0, 0, 1, 1], [], []>} : vector<8x8xf32>, vector<8x256xf32>, vector<8x256xf32> -> vector<8x256xf32>
    %c0_490 = arith.constant 0 : index
    %c0_491 = arith.constant 0 : index
    %c0_492 = arith.constant 0 : index
    %c0_493 = arith.constant 0 : index
    %538 = vector.load %arg3[%c0_490, %c0_491, %c0_492, %c0_493] : memref<2x4x1x256xf32, #tpu.memory_space<vmem>>, vector<1x1x1x256xf32>
    %539 = vector.shape_cast %538 : vector<1x1x1x256xf32> to vector<1x256xf32>
    %540 = vector.broadcast %539 : vector<1x256xf32> to vector<8x256xf32>
    %541 = arith.mulf %537, %540 : vector<8x256xf32>
    %c1_494 = arith.constant 1 : index
    %c0_495 = arith.constant 0 : index
    %c0_496 = arith.constant 0 : index
    %542 = vector.load %arg22[%c1_494, %c0_495, %c0_496] : memref<4x8x8xf32, #tpu.memory_space<vmem>>, vector<1x8x8xf32>
    %543 = vector.shape_cast %542 : vector<1x8x8xf32> to vector<8x8xf32>
    %cst_497 = arith.constant dense<0.000000e+00> : vector<8x256xf32>
    %544 = tpu.matmul %543, %534, %cst_497 {dimension_numbers = #tpu.dot_dimension_numbers<[1], [0], [0], [1], [0, 0, 1, 1], [], []>} : vector<8x8xf32>, vector<8x256xf32>, vector<8x256xf32> -> vector<8x256xf32>
    %c2_i32_498 = arith.constant 2 : i32
    %545 = tpu.dynamic_rotate %544 by %c2_i32_498 dim 1 : vector<8x256xf32>, i32 -> vector<8x256xf32>
    %c0_499 = arith.constant 0 : index
    %c1_500 = arith.constant 1 : index
    %c0_501 = arith.constant 0 : index
    %c0_502 = arith.constant 0 : index
    %546 = vector.load %arg3[%c0_499, %c1_500, %c0_501, %c0_502] : memref<2x4x1x256xf32, #tpu.memory_space<vmem>>, vector<1x1x1x256xf32>
    %547 = vector.shape_cast %546 : vector<1x1x1x256xf32> to vector<1x256xf32>
    %548 = vector.broadcast %547 : vector<1x256xf32> to vector<8x256xf32>
    %549 = arith.mulf %545, %548 : vector<8x256xf32>
    %550 = arith.addf %541, %549 : vector<8x256xf32>
    %c2_503 = arith.constant 2 : index
    %c0_504 = arith.constant 0 : index
    %c0_505 = arith.constant 0 : index
    %551 = vector.load %arg22[%c2_503, %c0_504, %c0_505] : memref<4x8x8xf32, #tpu.memory_space<vmem>>, vector<1x8x8xf32>
    %552 = vector.shape_cast %551 : vector<1x8x8xf32> to vector<8x8xf32>
    %cst_506 = arith.constant dense<0.000000e+00> : vector<8x256xf32>
    %553 = tpu.matmul %552, %534, %cst_506 {dimension_numbers = #tpu.dot_dimension_numbers<[1], [0], [0], [1], [0, 0, 1, 1], [], []>} : vector<8x8xf32>, vector<8x256xf32>, vector<8x256xf32> -> vector<8x256xf32>
    %c32_i32_507 = arith.constant 32 : i32
    %554 = tpu.dynamic_rotate %553 by %c32_i32_507 dim 1 : vector<8x256xf32>, i32 -> vector<8x256xf32>
    %c0_508 = arith.constant 0 : index
    %c2_509 = arith.constant 2 : index
    %c0_510 = arith.constant 0 : index
    %c0_511 = arith.constant 0 : index
    %555 = vector.load %arg3[%c0_508, %c2_509, %c0_510, %c0_511] : memref<2x4x1x256xf32, #tpu.memory_space<vmem>>, vector<1x1x1x256xf32>
    %556 = vector.shape_cast %555 : vector<1x1x1x256xf32> to vector<1x256xf32>
    %557 = vector.broadcast %556 : vector<1x256xf32> to vector<8x256xf32>
    %558 = arith.mulf %554, %557 : vector<8x256xf32>
    %559 = arith.addf %550, %558 : vector<8x256xf32>
    %c3_512 = arith.constant 3 : index
    %c0_513 = arith.constant 0 : index
    %c0_514 = arith.constant 0 : index
    %560 = vector.load %arg22[%c3_512, %c0_513, %c0_514] : memref<4x8x8xf32, #tpu.memory_space<vmem>>, vector<1x8x8xf32>
    %561 = vector.shape_cast %560 : vector<1x8x8xf32> to vector<8x8xf32>
    %cst_515 = arith.constant dense<0.000000e+00> : vector<8x256xf32>
    %562 = tpu.matmul %561, %534, %cst_515 {dimension_numbers = #tpu.dot_dimension_numbers<[1], [0], [0], [1], [0, 0, 1, 1], [], []>} : vector<8x8xf32>, vector<8x256xf32>, vector<8x256xf32> -> vector<8x256xf32>
    %c34_i32_516 = arith.constant 34 : i32
    %563 = tpu.dynamic_rotate %562 by %c34_i32_516 dim 1 : vector<8x256xf32>, i32 -> vector<8x256xf32>
    %c0_517 = arith.constant 0 : index
    %c3_518 = arith.constant 3 : index
    %c0_519 = arith.constant 0 : index
    %c0_520 = arith.constant 0 : index
    %564 = vector.load %arg3[%c0_517, %c3_518, %c0_519, %c0_520] : memref<2x4x1x256xf32, #tpu.memory_space<vmem>>, vector<1x1x1x256xf32>
    %565 = vector.shape_cast %564 : vector<1x1x1x256xf32> to vector<1x256xf32>
    %566 = vector.broadcast %565 : vector<1x256xf32> to vector<8x256xf32>
    %567 = arith.mulf %563, %566 : vector<8x256xf32>
    %568 = arith.addf %559, %567 : vector<8x256xf32>
    %c0_521 = arith.constant 0 : index
    %c0_522 = arith.constant 0 : index
    %569 = vector.load %arg23[%c0_521, %c0_522] : memref<8x1xf32, #tpu.memory_space<vmem>>, vector<8x1xf32>
    %570 = vector.broadcast %569 : vector<8x1xf32> to vector<8x256xf32>
    %571 = arith.addf %568, %570 : vector<8x256xf32>
    %c34_i32_523 = arith.constant 34 : i32
    %572 = tpu.dynamic_rotate %571 by %c34_i32_523 dim 1 : vector<8x256xf32>, i32 -> vector<8x256xf32>
    %c0_524 = arith.constant 0 : index
    %c0_525 = arith.constant 0 : index
    %c0_526 = arith.constant 0 : index
    %573 = vector.load %arg24[%c0_524, %c0_525, %c0_526] : memref<9x4x8xf32, #tpu.memory_space<vmem>>, vector<1x4x8xf32>
    %574 = vector.shape_cast %573 : vector<1x4x8xf32> to vector<4x8xf32>
    %c1_527 = arith.constant 1 : index
    %c0_528 = arith.constant 0 : index
    %c0_529 = arith.constant 0 : index
    %c0_530 = arith.constant 0 : index
    %575 = vector.load %arg2[%c1_527, %c0_528, %c0_529, %c0_530] : memref<3x9x1x256xf32, #tpu.memory_space<vmem>>, vector<1x1x1x256xf32>
    %576 = vector.shape_cast %575 : vector<1x1x1x256xf32> to vector<1x256xf32>
    %577 = vector.broadcast %576 : vector<1x256xf32> to vector<8x256xf32>
    %578 = arith.mulf %572, %577 : vector<8x256xf32>
    %cst_531 = arith.constant dense<0.000000e+00> : vector<4x256xf32>
    %579 = tpu.matmul %574, %578, %cst_531 {dimension_numbers = #tpu.dot_dimension_numbers<[1], [0], [0], [1], [0, 0, 1, 1], [], []>} : vector<4x8xf32>, vector<8x256xf32>, vector<4x256xf32> -> vector<4x256xf32>
    %c32_i32_532 = arith.constant 32 : i32
    %580 = tpu.dynamic_rotate %571 by %c32_i32_532 dim 1 : vector<8x256xf32>, i32 -> vector<8x256xf32>
    %c1_533 = arith.constant 1 : index
    %c0_534 = arith.constant 0 : index
    %c0_535 = arith.constant 0 : index
    %581 = vector.load %arg24[%c1_533, %c0_534, %c0_535] : memref<9x4x8xf32, #tpu.memory_space<vmem>>, vector<1x4x8xf32>
    %582 = vector.shape_cast %581 : vector<1x4x8xf32> to vector<4x8xf32>
    %c1_536 = arith.constant 1 : index
    %c1_537 = arith.constant 1 : index
    %c0_538 = arith.constant 0 : index
    %c0_539 = arith.constant 0 : index
    %583 = vector.load %arg2[%c1_536, %c1_537, %c0_538, %c0_539] : memref<3x9x1x256xf32, #tpu.memory_space<vmem>>, vector<1x1x1x256xf32>
    %584 = vector.shape_cast %583 : vector<1x1x1x256xf32> to vector<1x256xf32>
    %585 = vector.broadcast %584 : vector<1x256xf32> to vector<8x256xf32>
    %586 = arith.mulf %580, %585 : vector<8x256xf32>
    %cst_540 = arith.constant dense<0.000000e+00> : vector<4x256xf32>
    %587 = tpu.matmul %582, %586, %cst_540 {dimension_numbers = #tpu.dot_dimension_numbers<[1], [0], [0], [1], [0, 0, 1, 1], [], []>} : vector<4x8xf32>, vector<8x256xf32>, vector<4x256xf32> -> vector<4x256xf32>
    %588 = arith.addf %579, %587 : vector<4x256xf32>
    %c30_i32_541 = arith.constant 30 : i32
    %589 = tpu.dynamic_rotate %571 by %c30_i32_541 dim 1 : vector<8x256xf32>, i32 -> vector<8x256xf32>
    %c2_542 = arith.constant 2 : index
    %c0_543 = arith.constant 0 : index
    %c0_544 = arith.constant 0 : index
    %590 = vector.load %arg24[%c2_542, %c0_543, %c0_544] : memref<9x4x8xf32, #tpu.memory_space<vmem>>, vector<1x4x8xf32>
    %591 = vector.shape_cast %590 : vector<1x4x8xf32> to vector<4x8xf32>
    %c1_545 = arith.constant 1 : index
    %c2_546 = arith.constant 2 : index
    %c0_547 = arith.constant 0 : index
    %c0_548 = arith.constant 0 : index
    %592 = vector.load %arg2[%c1_545, %c2_546, %c0_547, %c0_548] : memref<3x9x1x256xf32, #tpu.memory_space<vmem>>, vector<1x1x1x256xf32>
    %593 = vector.shape_cast %592 : vector<1x1x1x256xf32> to vector<1x256xf32>
    %594 = vector.broadcast %593 : vector<1x256xf32> to vector<8x256xf32>
    %595 = arith.mulf %589, %594 : vector<8x256xf32>
    %cst_549 = arith.constant dense<0.000000e+00> : vector<4x256xf32>
    %596 = tpu.matmul %591, %595, %cst_549 {dimension_numbers = #tpu.dot_dimension_numbers<[1], [0], [0], [1], [0, 0, 1, 1], [], []>} : vector<4x8xf32>, vector<8x256xf32>, vector<4x256xf32> -> vector<4x256xf32>
    %597 = arith.addf %588, %596 : vector<4x256xf32>
    %c2_i32_550 = arith.constant 2 : i32
    %598 = tpu.dynamic_rotate %571 by %c2_i32_550 dim 1 : vector<8x256xf32>, i32 -> vector<8x256xf32>
    %c3_551 = arith.constant 3 : index
    %c0_552 = arith.constant 0 : index
    %c0_553 = arith.constant 0 : index
    %599 = vector.load %arg24[%c3_551, %c0_552, %c0_553] : memref<9x4x8xf32, #tpu.memory_space<vmem>>, vector<1x4x8xf32>
    %600 = vector.shape_cast %599 : vector<1x4x8xf32> to vector<4x8xf32>
    %c1_554 = arith.constant 1 : index
    %c3_555 = arith.constant 3 : index
    %c0_556 = arith.constant 0 : index
    %c0_557 = arith.constant 0 : index
    %601 = vector.load %arg2[%c1_554, %c3_555, %c0_556, %c0_557] : memref<3x9x1x256xf32, #tpu.memory_space<vmem>>, vector<1x1x1x256xf32>
    %602 = vector.shape_cast %601 : vector<1x1x1x256xf32> to vector<1x256xf32>
    %603 = vector.broadcast %602 : vector<1x256xf32> to vector<8x256xf32>
    %604 = arith.mulf %598, %603 : vector<8x256xf32>
    %cst_558 = arith.constant dense<0.000000e+00> : vector<4x256xf32>
    %605 = tpu.matmul %600, %604, %cst_558 {dimension_numbers = #tpu.dot_dimension_numbers<[1], [0], [0], [1], [0, 0, 1, 1], [], []>} : vector<4x8xf32>, vector<8x256xf32>, vector<4x256xf32> -> vector<4x256xf32>
    %606 = arith.addf %597, %605 : vector<4x256xf32>
    %c4_559 = arith.constant 4 : index
    %c0_560 = arith.constant 0 : index
    %c0_561 = arith.constant 0 : index
    %607 = vector.load %arg24[%c4_559, %c0_560, %c0_561] : memref<9x4x8xf32, #tpu.memory_space<vmem>>, vector<1x4x8xf32>
    %608 = vector.shape_cast %607 : vector<1x4x8xf32> to vector<4x8xf32>
    %c1_562 = arith.constant 1 : index
    %c4_563 = arith.constant 4 : index
    %c0_564 = arith.constant 0 : index
    %c0_565 = arith.constant 0 : index
    %609 = vector.load %arg2[%c1_562, %c4_563, %c0_564, %c0_565] : memref<3x9x1x256xf32, #tpu.memory_space<vmem>>, vector<1x1x1x256xf32>
    %610 = vector.shape_cast %609 : vector<1x1x1x256xf32> to vector<1x256xf32>
    %611 = vector.broadcast %610 : vector<1x256xf32> to vector<8x256xf32>
    %612 = arith.mulf %571, %611 : vector<8x256xf32>
    %cst_566 = arith.constant dense<0.000000e+00> : vector<4x256xf32>
    %613 = tpu.matmul %608, %612, %cst_566 {dimension_numbers = #tpu.dot_dimension_numbers<[1], [0], [0], [1], [0, 0, 1, 1], [], []>} : vector<4x8xf32>, vector<8x256xf32>, vector<4x256xf32> -> vector<4x256xf32>
    %614 = arith.addf %606, %613 : vector<4x256xf32>
    %c254_i32_567 = arith.constant 254 : i32
    %615 = tpu.dynamic_rotate %571 by %c254_i32_567 dim 1 : vector<8x256xf32>, i32 -> vector<8x256xf32>
    %c5_568 = arith.constant 5 : index
    %c0_569 = arith.constant 0 : index
    %c0_570 = arith.constant 0 : index
    %616 = vector.load %arg24[%c5_568, %c0_569, %c0_570] : memref<9x4x8xf32, #tpu.memory_space<vmem>>, vector<1x4x8xf32>
    %617 = vector.shape_cast %616 : vector<1x4x8xf32> to vector<4x8xf32>
    %c1_571 = arith.constant 1 : index
    %c5_572 = arith.constant 5 : index
    %c0_573 = arith.constant 0 : index
    %c0_574 = arith.constant 0 : index
    %618 = vector.load %arg2[%c1_571, %c5_572, %c0_573, %c0_574] : memref<3x9x1x256xf32, #tpu.memory_space<vmem>>, vector<1x1x1x256xf32>
    %619 = vector.shape_cast %618 : vector<1x1x1x256xf32> to vector<1x256xf32>
    %620 = vector.broadcast %619 : vector<1x256xf32> to vector<8x256xf32>
    %621 = arith.mulf %615, %620 : vector<8x256xf32>
    %cst_575 = arith.constant dense<0.000000e+00> : vector<4x256xf32>
    %622 = tpu.matmul %617, %621, %cst_575 {dimension_numbers = #tpu.dot_dimension_numbers<[1], [0], [0], [1], [0, 0, 1, 1], [], []>} : vector<4x8xf32>, vector<8x256xf32>, vector<4x256xf32> -> vector<4x256xf32>
    %623 = arith.addf %614, %622 : vector<4x256xf32>
    %c226_i32_576 = arith.constant 226 : i32
    %624 = tpu.dynamic_rotate %571 by %c226_i32_576 dim 1 : vector<8x256xf32>, i32 -> vector<8x256xf32>
    %c6_577 = arith.constant 6 : index
    %c0_578 = arith.constant 0 : index
    %c0_579 = arith.constant 0 : index
    %625 = vector.load %arg24[%c6_577, %c0_578, %c0_579] : memref<9x4x8xf32, #tpu.memory_space<vmem>>, vector<1x4x8xf32>
    %626 = vector.shape_cast %625 : vector<1x4x8xf32> to vector<4x8xf32>
    %c1_580 = arith.constant 1 : index
    %c6_581 = arith.constant 6 : index
    %c0_582 = arith.constant 0 : index
    %c0_583 = arith.constant 0 : index
    %627 = vector.load %arg2[%c1_580, %c6_581, %c0_582, %c0_583] : memref<3x9x1x256xf32, #tpu.memory_space<vmem>>, vector<1x1x1x256xf32>
    %628 = vector.shape_cast %627 : vector<1x1x1x256xf32> to vector<1x256xf32>
    %629 = vector.broadcast %628 : vector<1x256xf32> to vector<8x256xf32>
    %630 = arith.mulf %624, %629 : vector<8x256xf32>
    %cst_584 = arith.constant dense<0.000000e+00> : vector<4x256xf32>
    %631 = tpu.matmul %626, %630, %cst_584 {dimension_numbers = #tpu.dot_dimension_numbers<[1], [0], [0], [1], [0, 0, 1, 1], [], []>} : vector<4x8xf32>, vector<8x256xf32>, vector<4x256xf32> -> vector<4x256xf32>
    %632 = arith.addf %623, %631 : vector<4x256xf32>
    %c224_i32_585 = arith.constant 224 : i32
    %633 = tpu.dynamic_rotate %571 by %c224_i32_585 dim 1 : vector<8x256xf32>, i32 -> vector<8x256xf32>
    %c7_586 = arith.constant 7 : index
    %c0_587 = arith.constant 0 : index
    %c0_588 = arith.constant 0 : index
    %634 = vector.load %arg24[%c7_586, %c0_587, %c0_588] : memref<9x4x8xf32, #tpu.memory_space<vmem>>, vector<1x4x8xf32>
    %635 = vector.shape_cast %634 : vector<1x4x8xf32> to vector<4x8xf32>
    %c1_589 = arith.constant 1 : index
    %c7_590 = arith.constant 7 : index
    %c0_591 = arith.constant 0 : index
    %c0_592 = arith.constant 0 : index
    %636 = vector.load %arg2[%c1_589, %c7_590, %c0_591, %c0_592] : memref<3x9x1x256xf32, #tpu.memory_space<vmem>>, vector<1x1x1x256xf32>
    %637 = vector.shape_cast %636 : vector<1x1x1x256xf32> to vector<1x256xf32>
    %638 = vector.broadcast %637 : vector<1x256xf32> to vector<8x256xf32>
    %639 = arith.mulf %633, %638 : vector<8x256xf32>
    %cst_593 = arith.constant dense<0.000000e+00> : vector<4x256xf32>
    %640 = tpu.matmul %635, %639, %cst_593 {dimension_numbers = #tpu.dot_dimension_numbers<[1], [0], [0], [1], [0, 0, 1, 1], [], []>} : vector<4x8xf32>, vector<8x256xf32>, vector<4x256xf32> -> vector<4x256xf32>
    %641 = arith.addf %632, %640 : vector<4x256xf32>
    %c222_i32_594 = arith.constant 222 : i32
    %642 = tpu.dynamic_rotate %571 by %c222_i32_594 dim 1 : vector<8x256xf32>, i32 -> vector<8x256xf32>
    %c8_595 = arith.constant 8 : index
    %c0_596 = arith.constant 0 : index
    %c0_597 = arith.constant 0 : index
    %643 = vector.load %arg24[%c8_595, %c0_596, %c0_597] : memref<9x4x8xf32, #tpu.memory_space<vmem>>, vector<1x4x8xf32>
    %644 = vector.shape_cast %643 : vector<1x4x8xf32> to vector<4x8xf32>
    %c1_598 = arith.constant 1 : index
    %c8_599 = arith.constant 8 : index
    %c0_600 = arith.constant 0 : index
    %c0_601 = arith.constant 0 : index
    %645 = vector.load %arg2[%c1_598, %c8_599, %c0_600, %c0_601] : memref<3x9x1x256xf32, #tpu.memory_space<vmem>>, vector<1x1x1x256xf32>
    %646 = vector.shape_cast %645 : vector<1x1x1x256xf32> to vector<1x256xf32>
    %647 = vector.broadcast %646 : vector<1x256xf32> to vector<8x256xf32>
    %648 = arith.mulf %642, %647 : vector<8x256xf32>
    %cst_602 = arith.constant dense<0.000000e+00> : vector<4x256xf32>
    %649 = tpu.matmul %644, %648, %cst_602 {dimension_numbers = #tpu.dot_dimension_numbers<[1], [0], [0], [1], [0, 0, 1, 1], [], []>} : vector<4x8xf32>, vector<8x256xf32>, vector<4x256xf32> -> vector<4x256xf32>
    %650 = arith.addf %641, %649 : vector<4x256xf32>
    %c0_603 = arith.constant 0 : index
    %c0_604 = arith.constant 0 : index
    %651 = vector.load %arg25[%c0_603, %c0_604] : memref<4x1xf32, #tpu.memory_space<vmem>>, vector<4x1xf32>
    %652 = vector.broadcast %651 : vector<4x1xf32> to vector<4x256xf32>
    %653 = arith.mulf %650, %652 : vector<4x256xf32>
    %c0_605 = arith.constant 0 : index
    %c0_606 = arith.constant 0 : index
    %654 = vector.load %arg26[%c0_605, %c0_606] : memref<4x1xf32, #tpu.memory_space<vmem>>, vector<4x1xf32>
    %655 = vector.broadcast %654 : vector<4x1xf32> to vector<4x256xf32>
    %656 = arith.addf %653, %655 : vector<4x256xf32>
    %cst_607 = arith.constant 0.000000e+00 : f32
    %657 = vector.broadcast %cst_607 : f32 to vector<4x256xf32>
    %658 = arith.maximumf %656, %657 : vector<4x256xf32>
    %c34_i32_608 = arith.constant 34 : i32
    %659 = tpu.dynamic_rotate %658 by %c34_i32_608 dim 1 : vector<4x256xf32>, i32 -> vector<4x256xf32>
    %c0_609 = arith.constant 0 : index
    %c0_610 = arith.constant 0 : index
    %c0_611 = arith.constant 0 : index
    %660 = vector.load %arg27[%c0_609, %c0_610, %c0_611] : memref<9x4x4xf32, #tpu.memory_space<vmem>>, vector<1x4x4xf32>
    %661 = vector.shape_cast %660 : vector<1x4x4xf32> to vector<4x4xf32>
    %c1_612 = arith.constant 1 : index
    %c0_613 = arith.constant 0 : index
    %c0_614 = arith.constant 0 : index
    %c0_615 = arith.constant 0 : index
    %662 = vector.load %arg2[%c1_612, %c0_613, %c0_614, %c0_615] : memref<3x9x1x256xf32, #tpu.memory_space<vmem>>, vector<1x1x1x256xf32>
    %663 = vector.shape_cast %662 : vector<1x1x1x256xf32> to vector<1x256xf32>
    %664 = vector.broadcast %663 : vector<1x256xf32> to vector<4x256xf32>
    %665 = arith.mulf %659, %664 : vector<4x256xf32>
    %cst_616 = arith.constant dense<0.000000e+00> : vector<4x256xf32>
    %666 = tpu.matmul %661, %665, %cst_616 {dimension_numbers = #tpu.dot_dimension_numbers<[1], [0], [0], [1], [0, 0, 1, 1], [], []>} : vector<4x4xf32>, vector<4x256xf32>, vector<4x256xf32> -> vector<4x256xf32>
    %c32_i32_617 = arith.constant 32 : i32
    %667 = tpu.dynamic_rotate %658 by %c32_i32_617 dim 1 : vector<4x256xf32>, i32 -> vector<4x256xf32>
    %c1_618 = arith.constant 1 : index
    %c0_619 = arith.constant 0 : index
    %c0_620 = arith.constant 0 : index
    %668 = vector.load %arg27[%c1_618, %c0_619, %c0_620] : memref<9x4x4xf32, #tpu.memory_space<vmem>>, vector<1x4x4xf32>
    %669 = vector.shape_cast %668 : vector<1x4x4xf32> to vector<4x4xf32>
    %c1_621 = arith.constant 1 : index
    %c1_622 = arith.constant 1 : index
    %c0_623 = arith.constant 0 : index
    %c0_624 = arith.constant 0 : index
    %670 = vector.load %arg2[%c1_621, %c1_622, %c0_623, %c0_624] : memref<3x9x1x256xf32, #tpu.memory_space<vmem>>, vector<1x1x1x256xf32>
    %671 = vector.shape_cast %670 : vector<1x1x1x256xf32> to vector<1x256xf32>
    %672 = vector.broadcast %671 : vector<1x256xf32> to vector<4x256xf32>
    %673 = arith.mulf %667, %672 : vector<4x256xf32>
    %cst_625 = arith.constant dense<0.000000e+00> : vector<4x256xf32>
    %674 = tpu.matmul %669, %673, %cst_625 {dimension_numbers = #tpu.dot_dimension_numbers<[1], [0], [0], [1], [0, 0, 1, 1], [], []>} : vector<4x4xf32>, vector<4x256xf32>, vector<4x256xf32> -> vector<4x256xf32>
    %675 = arith.addf %666, %674 : vector<4x256xf32>
    %c30_i32_626 = arith.constant 30 : i32
    %676 = tpu.dynamic_rotate %658 by %c30_i32_626 dim 1 : vector<4x256xf32>, i32 -> vector<4x256xf32>
    %c2_627 = arith.constant 2 : index
    %c0_628 = arith.constant 0 : index
    %c0_629 = arith.constant 0 : index
    %677 = vector.load %arg27[%c2_627, %c0_628, %c0_629] : memref<9x4x4xf32, #tpu.memory_space<vmem>>, vector<1x4x4xf32>
    %678 = vector.shape_cast %677 : vector<1x4x4xf32> to vector<4x4xf32>
    %c1_630 = arith.constant 1 : index
    %c2_631 = arith.constant 2 : index
    %c0_632 = arith.constant 0 : index
    %c0_633 = arith.constant 0 : index
    %679 = vector.load %arg2[%c1_630, %c2_631, %c0_632, %c0_633] : memref<3x9x1x256xf32, #tpu.memory_space<vmem>>, vector<1x1x1x256xf32>
    %680 = vector.shape_cast %679 : vector<1x1x1x256xf32> to vector<1x256xf32>
    %681 = vector.broadcast %680 : vector<1x256xf32> to vector<4x256xf32>
    %682 = arith.mulf %676, %681 : vector<4x256xf32>
    %cst_634 = arith.constant dense<0.000000e+00> : vector<4x256xf32>
    %683 = tpu.matmul %678, %682, %cst_634 {dimension_numbers = #tpu.dot_dimension_numbers<[1], [0], [0], [1], [0, 0, 1, 1], [], []>} : vector<4x4xf32>, vector<4x256xf32>, vector<4x256xf32> -> vector<4x256xf32>
    %684 = arith.addf %675, %683 : vector<4x256xf32>
    %c2_i32_635 = arith.constant 2 : i32
    %685 = tpu.dynamic_rotate %658 by %c2_i32_635 dim 1 : vector<4x256xf32>, i32 -> vector<4x256xf32>
    %c3_636 = arith.constant 3 : index
    %c0_637 = arith.constant 0 : index
    %c0_638 = arith.constant 0 : index
    %686 = vector.load %arg27[%c3_636, %c0_637, %c0_638] : memref<9x4x4xf32, #tpu.memory_space<vmem>>, vector<1x4x4xf32>
    %687 = vector.shape_cast %686 : vector<1x4x4xf32> to vector<4x4xf32>
    %c1_639 = arith.constant 1 : index
    %c3_640 = arith.constant 3 : index
    %c0_641 = arith.constant 0 : index
    %c0_642 = arith.constant 0 : index
    %688 = vector.load %arg2[%c1_639, %c3_640, %c0_641, %c0_642] : memref<3x9x1x256xf32, #tpu.memory_space<vmem>>, vector<1x1x1x256xf32>
    %689 = vector.shape_cast %688 : vector<1x1x1x256xf32> to vector<1x256xf32>
    %690 = vector.broadcast %689 : vector<1x256xf32> to vector<4x256xf32>
    %691 = arith.mulf %685, %690 : vector<4x256xf32>
    %cst_643 = arith.constant dense<0.000000e+00> : vector<4x256xf32>
    %692 = tpu.matmul %687, %691, %cst_643 {dimension_numbers = #tpu.dot_dimension_numbers<[1], [0], [0], [1], [0, 0, 1, 1], [], []>} : vector<4x4xf32>, vector<4x256xf32>, vector<4x256xf32> -> vector<4x256xf32>
    %693 = arith.addf %684, %692 : vector<4x256xf32>
    %c4_644 = arith.constant 4 : index
    %c0_645 = arith.constant 0 : index
    %c0_646 = arith.constant 0 : index
    %694 = vector.load %arg27[%c4_644, %c0_645, %c0_646] : memref<9x4x4xf32, #tpu.memory_space<vmem>>, vector<1x4x4xf32>
    %695 = vector.shape_cast %694 : vector<1x4x4xf32> to vector<4x4xf32>
    %c1_647 = arith.constant 1 : index
    %c4_648 = arith.constant 4 : index
    %c0_649 = arith.constant 0 : index
    %c0_650 = arith.constant 0 : index
    %696 = vector.load %arg2[%c1_647, %c4_648, %c0_649, %c0_650] : memref<3x9x1x256xf32, #tpu.memory_space<vmem>>, vector<1x1x1x256xf32>
    %697 = vector.shape_cast %696 : vector<1x1x1x256xf32> to vector<1x256xf32>
    %698 = vector.broadcast %697 : vector<1x256xf32> to vector<4x256xf32>
    %699 = arith.mulf %658, %698 : vector<4x256xf32>
    %cst_651 = arith.constant dense<0.000000e+00> : vector<4x256xf32>
    %700 = tpu.matmul %695, %699, %cst_651 {dimension_numbers = #tpu.dot_dimension_numbers<[1], [0], [0], [1], [0, 0, 1, 1], [], []>} : vector<4x4xf32>, vector<4x256xf32>, vector<4x256xf32> -> vector<4x256xf32>
    %701 = arith.addf %693, %700 : vector<4x256xf32>
    %c254_i32_652 = arith.constant 254 : i32
    %702 = tpu.dynamic_rotate %658 by %c254_i32_652 dim 1 : vector<4x256xf32>, i32 -> vector<4x256xf32>
    %c5_653 = arith.constant 5 : index
    %c0_654 = arith.constant 0 : index
    %c0_655 = arith.constant 0 : index
    %703 = vector.load %arg27[%c5_653, %c0_654, %c0_655] : memref<9x4x4xf32, #tpu.memory_space<vmem>>, vector<1x4x4xf32>
    %704 = vector.shape_cast %703 : vector<1x4x4xf32> to vector<4x4xf32>
    %c1_656 = arith.constant 1 : index
    %c5_657 = arith.constant 5 : index
    %c0_658 = arith.constant 0 : index
    %c0_659 = arith.constant 0 : index
    %705 = vector.load %arg2[%c1_656, %c5_657, %c0_658, %c0_659] : memref<3x9x1x256xf32, #tpu.memory_space<vmem>>, vector<1x1x1x256xf32>
    %706 = vector.shape_cast %705 : vector<1x1x1x256xf32> to vector<1x256xf32>
    %707 = vector.broadcast %706 : vector<1x256xf32> to vector<4x256xf32>
    %708 = arith.mulf %702, %707 : vector<4x256xf32>
    %cst_660 = arith.constant dense<0.000000e+00> : vector<4x256xf32>
    %709 = tpu.matmul %704, %708, %cst_660 {dimension_numbers = #tpu.dot_dimension_numbers<[1], [0], [0], [1], [0, 0, 1, 1], [], []>} : vector<4x4xf32>, vector<4x256xf32>, vector<4x256xf32> -> vector<4x256xf32>
    %710 = arith.addf %701, %709 : vector<4x256xf32>
    %c226_i32_661 = arith.constant 226 : i32
    %711 = tpu.dynamic_rotate %658 by %c226_i32_661 dim 1 : vector<4x256xf32>, i32 -> vector<4x256xf32>
    %c6_662 = arith.constant 6 : index
    %c0_663 = arith.constant 0 : index
    %c0_664 = arith.constant 0 : index
    %712 = vector.load %arg27[%c6_662, %c0_663, %c0_664] : memref<9x4x4xf32, #tpu.memory_space<vmem>>, vector<1x4x4xf32>
    %713 = vector.shape_cast %712 : vector<1x4x4xf32> to vector<4x4xf32>
    %c1_665 = arith.constant 1 : index
    %c6_666 = arith.constant 6 : index
    %c0_667 = arith.constant 0 : index
    %c0_668 = arith.constant 0 : index
    %714 = vector.load %arg2[%c1_665, %c6_666, %c0_667, %c0_668] : memref<3x9x1x256xf32, #tpu.memory_space<vmem>>, vector<1x1x1x256xf32>
    %715 = vector.shape_cast %714 : vector<1x1x1x256xf32> to vector<1x256xf32>
    %716 = vector.broadcast %715 : vector<1x256xf32> to vector<4x256xf32>
    %717 = arith.mulf %711, %716 : vector<4x256xf32>
    %cst_669 = arith.constant dense<0.000000e+00> : vector<4x256xf32>
    %718 = tpu.matmul %713, %717, %cst_669 {dimension_numbers = #tpu.dot_dimension_numbers<[1], [0], [0], [1], [0, 0, 1, 1], [], []>} : vector<4x4xf32>, vector<4x256xf32>, vector<4x256xf32> -> vector<4x256xf32>
    %719 = arith.addf %710, %718 : vector<4x256xf32>
    %c224_i32_670 = arith.constant 224 : i32
    %720 = tpu.dynamic_rotate %658 by %c224_i32_670 dim 1 : vector<4x256xf32>, i32 -> vector<4x256xf32>
    %c7_671 = arith.constant 7 : index
    %c0_672 = arith.constant 0 : index
    %c0_673 = arith.constant 0 : index
    %721 = vector.load %arg27[%c7_671, %c0_672, %c0_673] : memref<9x4x4xf32, #tpu.memory_space<vmem>>, vector<1x4x4xf32>
    %722 = vector.shape_cast %721 : vector<1x4x4xf32> to vector<4x4xf32>
    %c1_674 = arith.constant 1 : index
    %c7_675 = arith.constant 7 : index
    %c0_676 = arith.constant 0 : index
    %c0_677 = arith.constant 0 : index
    %723 = vector.load %arg2[%c1_674, %c7_675, %c0_676, %c0_677] : memref<3x9x1x256xf32, #tpu.memory_space<vmem>>, vector<1x1x1x256xf32>
    %724 = vector.shape_cast %723 : vector<1x1x1x256xf32> to vector<1x256xf32>
    %725 = vector.broadcast %724 : vector<1x256xf32> to vector<4x256xf32>
    %726 = arith.mulf %720, %725 : vector<4x256xf32>
    %cst_678 = arith.constant dense<0.000000e+00> : vector<4x256xf32>
    %727 = tpu.matmul %722, %726, %cst_678 {dimension_numbers = #tpu.dot_dimension_numbers<[1], [0], [0], [1], [0, 0, 1, 1], [], []>} : vector<4x4xf32>, vector<4x256xf32>, vector<4x256xf32> -> vector<4x256xf32>
    %728 = arith.addf %719, %727 : vector<4x256xf32>
    %c222_i32_679 = arith.constant 222 : i32
    %729 = tpu.dynamic_rotate %658 by %c222_i32_679 dim 1 : vector<4x256xf32>, i32 -> vector<4x256xf32>
    %c8_680 = arith.constant 8 : index
    %c0_681 = arith.constant 0 : index
    %c0_682 = arith.constant 0 : index
    %730 = vector.load %arg27[%c8_680, %c0_681, %c0_682] : memref<9x4x4xf32, #tpu.memory_space<vmem>>, vector<1x4x4xf32>
    %731 = vector.shape_cast %730 : vector<1x4x4xf32> to vector<4x4xf32>
    %c1_683 = arith.constant 1 : index
    %c8_684 = arith.constant 8 : index
    %c0_685 = arith.constant 0 : index
    %c0_686 = arith.constant 0 : index
    %732 = vector.load %arg2[%c1_683, %c8_684, %c0_685, %c0_686] : memref<3x9x1x256xf32, #tpu.memory_space<vmem>>, vector<1x1x1x256xf32>
    %733 = vector.shape_cast %732 : vector<1x1x1x256xf32> to vector<1x256xf32>
    %734 = vector.broadcast %733 : vector<1x256xf32> to vector<4x256xf32>
    %735 = arith.mulf %729, %734 : vector<4x256xf32>
    %cst_687 = arith.constant dense<0.000000e+00> : vector<4x256xf32>
    %736 = tpu.matmul %731, %735, %cst_687 {dimension_numbers = #tpu.dot_dimension_numbers<[1], [0], [0], [1], [0, 0, 1, 1], [], []>} : vector<4x4xf32>, vector<4x256xf32>, vector<4x256xf32> -> vector<4x256xf32>
    %737 = arith.addf %728, %736 : vector<4x256xf32>
    %c0_688 = arith.constant 0 : index
    %c0_689 = arith.constant 0 : index
    %738 = vector.load %arg28[%c0_688, %c0_689] : memref<4x1xf32, #tpu.memory_space<vmem>>, vector<4x1xf32>
    %739 = vector.broadcast %738 : vector<4x1xf32> to vector<4x256xf32>
    %740 = arith.mulf %737, %739 : vector<4x256xf32>
    %c0_690 = arith.constant 0 : index
    %c0_691 = arith.constant 0 : index
    %741 = vector.load %arg29[%c0_690, %c0_691] : memref<4x1xf32, #tpu.memory_space<vmem>>, vector<4x1xf32>
    %742 = vector.broadcast %741 : vector<4x1xf32> to vector<4x256xf32>
    %743 = arith.addf %740, %742 : vector<4x256xf32>
    %cst_692 = arith.constant 0.000000e+00 : f32
    %744 = vector.broadcast %cst_692 : f32 to vector<4x256xf32>
    %745 = arith.maximumf %743, %744 : vector<4x256xf32>
    %c0_693 = arith.constant 0 : index
    %c0_694 = arith.constant 0 : index
    %c0_695 = arith.constant 0 : index
    %746 = vector.load %arg30[%c0_693, %c0_694, %c0_695] : memref<4x4x4xf32, #tpu.memory_space<vmem>>, vector<1x4x4xf32>
    %747 = vector.shape_cast %746 : vector<1x4x4xf32> to vector<4x4xf32>
    %cst_696 = arith.constant dense<0.000000e+00> : vector<4x256xf32>
    %748 = tpu.matmul %747, %745, %cst_696 {dimension_numbers = #tpu.dot_dimension_numbers<[1], [0], [0], [1], [0, 0, 1, 1], [], []>} : vector<4x4xf32>, vector<4x256xf32>, vector<4x256xf32> -> vector<4x256xf32>
    %c1_697 = arith.constant 1 : index
    %c0_698 = arith.constant 0 : index
    %c0_699 = arith.constant 0 : index
    %c0_700 = arith.constant 0 : index
    %749 = vector.load %arg3[%c1_697, %c0_698, %c0_699, %c0_700] : memref<2x4x1x256xf32, #tpu.memory_space<vmem>>, vector<1x1x1x256xf32>
    %750 = vector.shape_cast %749 : vector<1x1x1x256xf32> to vector<1x256xf32>
    %751 = vector.broadcast %750 : vector<1x256xf32> to vector<4x256xf32>
    %752 = arith.mulf %748, %751 : vector<4x256xf32>
    %c1_701 = arith.constant 1 : index
    %c0_702 = arith.constant 0 : index
    %c0_703 = arith.constant 0 : index
    %753 = vector.load %arg30[%c1_701, %c0_702, %c0_703] : memref<4x4x4xf32, #tpu.memory_space<vmem>>, vector<1x4x4xf32>
    %754 = vector.shape_cast %753 : vector<1x4x4xf32> to vector<4x4xf32>
    %cst_704 = arith.constant dense<0.000000e+00> : vector<4x256xf32>
    %755 = tpu.matmul %754, %745, %cst_704 {dimension_numbers = #tpu.dot_dimension_numbers<[1], [0], [0], [1], [0, 0, 1, 1], [], []>} : vector<4x4xf32>, vector<4x256xf32>, vector<4x256xf32> -> vector<4x256xf32>
    %c1_i32_705 = arith.constant 1 : i32
    %756 = tpu.dynamic_rotate %755 by %c1_i32_705 dim 1 : vector<4x256xf32>, i32 -> vector<4x256xf32>
    %c1_706 = arith.constant 1 : index
    %c1_707 = arith.constant 1 : index
    %c0_708 = arith.constant 0 : index
    %c0_709 = arith.constant 0 : index
    %757 = vector.load %arg3[%c1_706, %c1_707, %c0_708, %c0_709] : memref<2x4x1x256xf32, #tpu.memory_space<vmem>>, vector<1x1x1x256xf32>
    %758 = vector.shape_cast %757 : vector<1x1x1x256xf32> to vector<1x256xf32>
    %759 = vector.broadcast %758 : vector<1x256xf32> to vector<4x256xf32>
    %760 = arith.mulf %756, %759 : vector<4x256xf32>
    %761 = arith.addf %752, %760 : vector<4x256xf32>
    %c2_710 = arith.constant 2 : index
    %c0_711 = arith.constant 0 : index
    %c0_712 = arith.constant 0 : index
    %762 = vector.load %arg30[%c2_710, %c0_711, %c0_712] : memref<4x4x4xf32, #tpu.memory_space<vmem>>, vector<1x4x4xf32>
    %763 = vector.shape_cast %762 : vector<1x4x4xf32> to vector<4x4xf32>
    %cst_713 = arith.constant dense<0.000000e+00> : vector<4x256xf32>
    %764 = tpu.matmul %763, %745, %cst_713 {dimension_numbers = #tpu.dot_dimension_numbers<[1], [0], [0], [1], [0, 0, 1, 1], [], []>} : vector<4x4xf32>, vector<4x256xf32>, vector<4x256xf32> -> vector<4x256xf32>
    %c16_i32_714 = arith.constant 16 : i32
    %765 = tpu.dynamic_rotate %764 by %c16_i32_714 dim 1 : vector<4x256xf32>, i32 -> vector<4x256xf32>
    %c1_715 = arith.constant 1 : index
    %c2_716 = arith.constant 2 : index
    %c0_717 = arith.constant 0 : index
    %c0_718 = arith.constant 0 : index
    %766 = vector.load %arg3[%c1_715, %c2_716, %c0_717, %c0_718] : memref<2x4x1x256xf32, #tpu.memory_space<vmem>>, vector<1x1x1x256xf32>
    %767 = vector.shape_cast %766 : vector<1x1x1x256xf32> to vector<1x256xf32>
    %768 = vector.broadcast %767 : vector<1x256xf32> to vector<4x256xf32>
    %769 = arith.mulf %765, %768 : vector<4x256xf32>
    %770 = arith.addf %761, %769 : vector<4x256xf32>
    %c3_719 = arith.constant 3 : index
    %c0_720 = arith.constant 0 : index
    %c0_721 = arith.constant 0 : index
    %771 = vector.load %arg30[%c3_719, %c0_720, %c0_721] : memref<4x4x4xf32, #tpu.memory_space<vmem>>, vector<1x4x4xf32>
    %772 = vector.shape_cast %771 : vector<1x4x4xf32> to vector<4x4xf32>
    %cst_722 = arith.constant dense<0.000000e+00> : vector<4x256xf32>
    %773 = tpu.matmul %772, %745, %cst_722 {dimension_numbers = #tpu.dot_dimension_numbers<[1], [0], [0], [1], [0, 0, 1, 1], [], []>} : vector<4x4xf32>, vector<4x256xf32>, vector<4x256xf32> -> vector<4x256xf32>
    %c17_i32_723 = arith.constant 17 : i32
    %774 = tpu.dynamic_rotate %773 by %c17_i32_723 dim 1 : vector<4x256xf32>, i32 -> vector<4x256xf32>
    %c1_724 = arith.constant 1 : index
    %c3_725 = arith.constant 3 : index
    %c0_726 = arith.constant 0 : index
    %c0_727 = arith.constant 0 : index
    %775 = vector.load %arg3[%c1_724, %c3_725, %c0_726, %c0_727] : memref<2x4x1x256xf32, #tpu.memory_space<vmem>>, vector<1x1x1x256xf32>
    %776 = vector.shape_cast %775 : vector<1x1x1x256xf32> to vector<1x256xf32>
    %777 = vector.broadcast %776 : vector<1x256xf32> to vector<4x256xf32>
    %778 = arith.mulf %774, %777 : vector<4x256xf32>
    %779 = arith.addf %770, %778 : vector<4x256xf32>
    %c0_728 = arith.constant 0 : index
    %c0_729 = arith.constant 0 : index
    %780 = vector.load %arg31[%c0_728, %c0_729] : memref<4x1xf32, #tpu.memory_space<vmem>>, vector<4x1xf32>
    %781 = vector.broadcast %780 : vector<4x1xf32> to vector<4x256xf32>
    %782 = arith.addf %779, %781 : vector<4x256xf32>
    %c0_730 = arith.constant 0 : index
    %c0_731 = arith.constant 0 : index
    %c0_732 = arith.constant 0 : index
    %783 = vector.load %arg33[%c0_730, %c0_731, %c0_732] : memref<1x4x256xf32, #tpu.memory_space<vmem>>, vector<1x4x256xf32>
    %784 = vector.shape_cast %783 : vector<1x4x256xf32> to vector<4x256xf32>
    %785 = vector.shape_cast %782 : vector<4x256xf32> to vector<1x4x256xf32>
    tpu.vector_store %arg33[%c0_730, %c0_731, %c0_732], %785 {strides = array<i32>} : memref<1x4x256xf32, #tpu.memory_space<vmem>>, vector<1x4x256xf32>,
    return
  }
  func.func @transform_0(%arg0: i32) -> (i32, i32, i32) {
    %c0_i32 = arith.constant 0 : i32
    %c0_i32_0 = arith.constant 0 : i32
    %c0_i32_1 = arith.constant 0 : i32
    return %arg0, %c0_i32, %c0_i32_0 : i32, i32, i32
  }
  func.func @transform_1(%arg0: i32) -> (i32, i32, i32, i32) {
    %c0_i32 = arith.constant 0 : i32
    %c0_i32_0 = arith.constant 0 : i32
    %c0_i32_1 = arith.constant 0 : i32
    %c0_i32_2 = arith.constant 0 : i32
    %c0_i32_3 = arith.constant 0 : i32
    return %c0_i32, %c0_i32_0, %c0_i32_1, %c0_i32_2 : i32, i32, i32, i32
  }
  func.func @transform_2(%arg0: i32) -> (i32, i32, i32, i32) {
    %c0_i32 = arith.constant 0 : i32
    %c0_i32_0 = arith.constant 0 : i32
    %c0_i32_1 = arith.constant 0 : i32
    %c0_i32_2 = arith.constant 0 : i32
    %c0_i32_3 = arith.constant 0 : i32
    return %c0_i32, %c0_i32_0, %c0_i32_1, %c0_i32_2 : i32, i32, i32, i32
  }
  func.func @transform_3(%arg0: i32) -> (i32, i32, i32) {
    %c0_i32 = arith.constant 0 : i32
    %c0_i32_0 = arith.constant 0 : i32
    %c0_i32_1 = arith.constant 0 : i32
    %c0_i32_2 = arith.constant 0 : i32
    return %c0_i32, %c0_i32_0, %c0_i32_1 : i32, i32, i32
  }
  func.func @transform_4(%arg0: i32) -> (i32, i32) {
    %c0_i32 = arith.constant 0 : i32
    %c0_i32_0 = arith.constant 0 : i32
    %c0_i32_1 = arith.constant 0 : i32
    return %c0_i32, %c0_i32_0 : i32, i32
  }
  func.func @transform_5(%arg0: i32) -> (i32, i32) {
    %c0_i32 = arith.constant 0 : i32
    %c0_i32_0 = arith.constant 0 : i32
    %c0_i32_1 = arith.constant 0 : i32
    return %c0_i32, %c0_i32_0 : i32, i32
  }
  func.func @transform_6(%arg0: i32) -> (i32, i32, i32) {
    %c0_i32 = arith.constant 0 : i32
    %c0_i32_0 = arith.constant 0 : i32
    %c0_i32_1 = arith.constant 0 : i32
    %c0_i32_2 = arith.constant 0 : i32
    return %c0_i32, %c0_i32_0, %c0_i32_1 : i32, i32, i32
  }
  func.func @transform_7(%arg0: i32) -> (i32, i32) {
    %c0_i32 = arith.constant 0 : i32
    %c0_i32_0 = arith.constant 0 : i32
    %c0_i32_1 = arith.constant 0 : i32
    return %c0_i32, %c0_i32_0 : i32, i32
  }
  func.func @transform_8(%arg0: i32) -> (i32, i32) {
    %c0_i32 = arith.constant 0 : i32
    %c0_i32_0 = arith.constant 0 : i32
    %c0_i32_1 = arith.constant 0 : i32
    return %c0_i32, %c0_i32_0 : i32, i32
  }
  func.func @transform_9(%arg0: i32) -> (i32, i32, i32) {
    %c0_i32 = arith.constant 0 : i32
    %c0_i32_0 = arith.constant 0 : i32
    %c0_i32_1 = arith.constant 0 : i32
    %c0_i32_2 = arith.constant 0 : i32
    return %c0_i32, %c0_i32_0, %c0_i32_1 : i32, i32, i32
  }
  func.func @transform_10(%arg0: i32) -> (i32, i32) {
    %c0_i32 = arith.constant 0 : i32
    %c0_i32_0 = arith.constant 0 : i32
    %c0_i32_1 = arith.constant 0 : i32
    return %c0_i32, %c0_i32_0 : i32, i32
  }
  func.func @transform_11(%arg0: i32) -> (i32, i32) {
    %c0_i32 = arith.constant 0 : i32
    %c0_i32_0 = arith.constant 0 : i32
    %c0_i32_1 = arith.constant 0 : i32
    return %c0_i32, %c0_i32_0 : i32, i32
  }
  func.func @transform_12(%arg0: i32) -> (i32, i32, i32) {
    %c0_i32 = arith.constant 0 : i32
    %c0_i32_0 = arith.constant 0 : i32
    %c0_i32_1 = arith.constant 0 : i32
    %c0_i32_2 = arith.constant 0 : i32
    return %c0_i32, %c0_i32_0, %c0_i32_1 : i32, i32, i32
  }
  func.func @transform_13(%arg0: i32) -> (i32, i32) {
    %c0_i32 = arith.constant 0 : i32
    %c0_i32_0 = arith.constant 0 : i32
    %c0_i32_1 = arith.constant 0 : i32
    return %c0_i32, %c0_i32_0 : i32, i32
  }
  func.func @transform_14(%arg0: i32) -> (i32, i32) {
    %c0_i32 = arith.constant 0 : i32
    %c0_i32_0 = arith.constant 0 : i32
    %c0_i32_1 = arith.constant 0 : i32
    return %c0_i32, %c0_i32_0 : i32, i32
  }
  func.func @transform_15(%arg0: i32) -> (i32, i32, i32) {
    %c0_i32 = arith.constant 0 : i32
    %c0_i32_0 = arith.constant 0 : i32
    %c0_i32_1 = arith.constant 0 : i32
    %c0_i32_2 = arith.constant 0 : i32
    return %c0_i32, %c0_i32_0, %c0_i32_1 : i32, i32, i32
  }
  func.func @transform_16(%arg0: i32) -> (i32, i32) {
    %c0_i32 = arith.constant 0 : i32
    %c0_i32_0 = arith.constant 0 : i32
    %c0_i32_1 = arith.constant 0 : i32
    return %c0_i32, %c0_i32_0 : i32, i32
  }
  func.func @transform_17(%arg0: i32) -> (i32, i32) {
    %c0_i32 = arith.constant 0 : i32
    %c0_i32_0 = arith.constant 0 : i32
    %c0_i32_1 = arith.constant 0 : i32
    return %c0_i32, %c0_i32_0 : i32, i32
  }
  func.func @transform_18(%arg0: i32) -> (i32, i32, i32) {
    %c0_i32 = arith.constant 0 : i32
    %c0_i32_0 = arith.constant 0 : i32
    %c0_i32_1 = arith.constant 0 : i32
    %c0_i32_2 = arith.constant 0 : i32
    return %c0_i32, %c0_i32_0, %c0_i32_1 : i32, i32, i32
  }
  func.func @transform_19(%arg0: i32) -> (i32, i32) {
    %c0_i32 = arith.constant 0 : i32
    %c0_i32_0 = arith.constant 0 : i32
    %c0_i32_1 = arith.constant 0 : i32
    return %c0_i32, %c0_i32_0 : i32, i32
  }
  func.func @transform_20(%arg0: i32) -> (i32, i32) {
    %c0_i32 = arith.constant 0 : i32
    %c0_i32_0 = arith.constant 0 : i32
    %c0_i32_1 = arith.constant 0 : i32
    return %c0_i32, %c0_i32_0 : i32, i32
  }
  func.func @transform_21(%arg0: i32) -> (i32, i32, i32) {
    %c0_i32 = arith.constant 0 : i32
    %c0_i32_0 = arith.constant 0 : i32
    %c0_i32_1 = arith.constant 0 : i32
    %c0_i32_2 = arith.constant 0 : i32
    return %c0_i32, %c0_i32_0, %c0_i32_1 : i32, i32, i32
  }
  func.func @transform_22(%arg0: i32) -> (i32, i32) {
    %c0_i32 = arith.constant 0 : i32
    %c0_i32_0 = arith.constant 0 : i32
    %c0_i32_1 = arith.constant 0 : i32
    return %c0_i32, %c0_i32_0 : i32, i32
  }
  func.func @transform_23(%arg0: i32) -> (i32, i32, i32) {
    %c0_i32 = arith.constant 0 : i32
    %c0_i32_0 = arith.constant 0 : i32
    %c0_i32_1 = arith.constant 0 : i32
    %c0_i32_2 = arith.constant 0 : i32
    return %c0_i32, %c0_i32_0, %c0_i32_1 : i32, i32, i32
  }
  func.func @transform_24(%arg0: i32) -> (i32, i32) {
    %c0_i32 = arith.constant 0 : i32
    %c0_i32_0 = arith.constant 0 : i32
    %c0_i32_1 = arith.constant 0 : i32
    return %c0_i32, %c0_i32_0 : i32, i32
  }
  func.func @transform_25(%arg0: i32) -> (i32, i32) {
    %c0_i32 = arith.constant 0 : i32
    %c0_i32_0 = arith.constant 0 : i32
    %c0_i32_1 = arith.constant 0 : i32
    return %c0_i32, %c0_i32_0 : i32, i32
  }
  func.func @transform_26(%arg0: i32) -> (i32, i32, i32) {
    %c0_i32 = arith.constant 0 : i32
    %c0_i32_0 = arith.constant 0 : i32
    %c0_i32_1 = arith.constant 0 : i32
    %c0_i32_2 = arith.constant 0 : i32
    return %c0_i32, %c0_i32_0, %c0_i32_1 : i32, i32, i32
  }
  func.func @transform_27(%arg0: i32) -> (i32, i32) {
    %c0_i32 = arith.constant 0 : i32
    %c0_i32_0 = arith.constant 0 : i32
    %c0_i32_1 = arith.constant 0 : i32
    return %c0_i32, %c0_i32_0 : i32, i32
  }
  func.func @transform_28(%arg0: i32) -> (i32, i32) {
    %c0_i32 = arith.constant 0 : i32
    %c0_i32_0 = arith.constant 0 : i32
    %c0_i32_1 = arith.constant 0 : i32
    return %c0_i32, %c0_i32_0 : i32, i32
  }
  func.func @transform_29(%arg0: i32) -> (i32, i32, i32) {
    %c0_i32 = arith.constant 0 : i32
    %c0_i32_0 = arith.constant 0 : i32
    %c0_i32_1 = arith.constant 0 : i32
    %c0_i32_2 = arith.constant 0 : i32
    return %c0_i32, %c0_i32_0, %c0_i32_1 : i32, i32, i32
  }
  func.func @transform_30(%arg0: i32) -> (i32, i32) {
    %c0_i32 = arith.constant 0 : i32
    %c0_i32_0 = arith.constant 0 : i32
    %c0_i32_1 = arith.constant 0 : i32
    return %c0_i32, %c0_i32_0 : i32, i32
  }
  func.func @transform_31(%arg0: i32) -> (i32, i32, i32) {
    %c0_i32 = arith.constant 0 : i32
    %c0_i32_0 = arith.constant 0 : i32
    %c0_i32_1 = arith.constant 0 : i32
    return %arg0, %c0_i32, %c0_i32_0 : i32, i32, i32
  }
  func.func @transform_32(%arg0: i32) -> (i32, i32, i32) {
    %c0_i32 = arith.constant 0 : i32
    %c0_i32_0 = arith.constant 0 : i32
    %c0_i32_1 = arith.constant 0 : i32
    return %arg0, %c0_i32, %c0_i32_0 : i32, i32, i32
  }
}

</mosaic_0001>

<bundles_post_ra>
// kernel: _lambda_.1
= control target key start
LH: loop header
LB: loop body
LE: loop exit
PB: predicated region body
PF: predicated region fallthrough
CT: control target
= control target key end

     0   :  { %s10637_s6 = smov 1   ;;  %s10638_s10 = smov 2   ;;  %s12590_s0 = inlined_call_operand.smem [shape: u32[33], index: -1, kind: input, shape index: {}] }
   0x1   :  { %s10725_s5 = sld [smem:[%s12590_s0]]   ;;  %s10639_s14 = smov 3  }
   0x2   :  { %s10730_s9 = sld [smem:[%s12590_s0 + %s10637_s6]]   ;;  %s10640_s18 = smov 4  }
   0x3   :  { %s10735_s13 = sld [smem:[%s12590_s0 + %s10638_s10]]   ;;  %s10641_s22 = smov 5  }
   0x4   :  { %s10740_s17 = sld [smem:[%s12590_s0 + %s10639_s14]]   ;;  %s10642_s26 = smov 6  }
   0x5   :  { %s10745_s21 = sld [smem:[%s12590_s0 + %s10640_s18]]   ;;  %s10643_s30 = smov 7  }
   0x6   :  { %s10750_s25 = sld [smem:[%s12590_s0 + %s10641_s22]]   ;;  %s10644_s4 = smov 8  }
   0x7   :  { %12622 = sst [smem:[#allocation41_spill]] %s10725_s5  ;;  %s10645_s10 = smov 9  }
   0x8   :  { %12623 = sst [smem:[#allocation42_spill]] %s10730_s9  ;;  %s10646_s15 = smov 10  }
   0x9   :  { %s10755_s29 = sld [smem:[%s12590_s0 + %s10642_s26]]   ;;  %s10647_s20 = smov 11  }
   0xa   :  { %s10760_s3 = sld [smem:[%s12590_s0 + %s10643_s30]]   ;;  %s10648_s26 = smov 12  }
   0xb   :  { %12624 = sst [smem:[#allocation43_spill]] %s10745_s21  ;;  %s10649_s1 = smov 13  }
   0xc   :  { %12625 = sst [smem:[#allocation44_spill]] %s10750_s25  ;;  %s10650_s7 = smov 14  }
   0xd   :  { %s10765_s8 = sld [smem:[%s12590_s0 + %s10644_s4]]   ;;  %s10652_s22 = smov 16  }
   0xe   :  { %s10770_s14 = sld [smem:[%s12590_s0 + %s10645_s10]]   ;;  %s10653_s28 = smov 17  }
   0xf   :  { %s10775_s19 = sld [smem:[%s12590_s0 + %s10646_s15]]   ;;  %s10651_s15 = smov 15  }
  0x10   :  { %12626 = sst [smem:[#allocation45_spill]] %s10760_s3 }
  0x11   :  { %s10780_s24 = sld [smem:[%s12590_s0 + %s10647_s20]]  }
  0x12   :  { %s10785_s30 = sld [smem:[%s12590_s0 + %s10648_s26]]  }
  0x13   :  { %12627 = sst [smem:[#allocation46_spill]] %s10765_s8 }
  0x14   :  { %12628 = sst [smem:[#allocation47_spill]] %s10770_s14 }
  0x15   :  { %12629 = sst [smem:[#allocation48_spill]] %s10775_s19 }
  0x16   :  { %s10790_s6 = sld [smem:[%s12590_s0 + %s10649_s1]]  }
  0x17   :  { %s10795_s12 = sld [smem:[%s12590_s0 + %s10650_s7]]   ;;  %s10654_s7 = smov 18  }
  0x18   :  { %s10800_s20 = sld [smem:[%s12590_s0 + %s10651_s15]]   ;;  %s10655_s15 = smov 19  }
  0x19   :  { %s10805_s27 = sld [smem:[%s12590_s0 + %s10652_s22]]   ;;  %s10656_s22 = smov 20  }
  0x1a   :  { %s10810_s4 = sld [smem:[%s12590_s0 + %s10653_s28]]   ;;  %s10657_s28 = smov 21  }
  0x1b   :  { %s10820_s14 = sld [smem:[%s12590_s0 + %s10655_s15]]   ;;  %s10659_s15 = smov 23  }
  0x1c   :  { %12630 = sst [smem:[#allocation49_spill]] %s10790_s6 }
  0x1d   :  { %s10815_s6 = sld [smem:[%s12590_s0 + %s10654_s7]]   ;;  %s10658_s7 = smov 22  }
  0x1e   :  { %s10830_s19 = sld [smem:[%s12590_s0 + %s10657_s28]]   ;;  %s10661_s28 = smov 25  }
  0x1f   :  { %12631 = sst [smem:[#allocation50_spill]] %s10805_s27 }
  0x20   :  { %s10825_s27 = sld [smem:[%s12590_s0 + %s10656_s22]]   ;;  %s10660_s22 = smov 24  }
  0x21   :  { %12633 = sst [smem:[#allocation52_spill]] %s10820_s14 }
  0x22   :  { %s10835_s3 = sld [smem:[%s12590_s0 + %s10658_s7]]   ;;  %s10662_s7 = smov 26  }
  0x23   :  { %12632 = sst [smem:[#allocation51_spill]] %s10815_s6 }
  0x24   :  { %s10840_s14 = sld [smem:[%s12590_s0 + %s10659_s15]]   ;;  %s10663_s15 = smov 27  }
  0x25   :  { %s10845_s9 = sld [smem:[%s12590_s0 + %s10660_s22]]   ;;  %s10664_s22 = smov 28  }
  0x26   :  { %s10850_s25 = sld [smem:[%s12590_s0 + %s10661_s28]]   ;;  %s10665_s28 = smov 29  }
  0x27   :  { %s10855_s21 = sld [smem:[%s12590_s0 + %s10662_s7]]   ;;  %s10666_s7 = smov 30  }
  0x28   :  { %12634 = sst [smem:[#allocation53_spill]] %s10835_s3 }
  0x29   :  { %s10860_s5 = sld [smem:[%s12590_s0 + %s10663_s15]]   ;;  %s10667_s15 = smov 31  }
  0x2a   :  { %s10875_s3 = sld [smem:[%s12590_s0 + %s10666_s7]]  }
  0x2b   :  { %12635 = sst [smem:[#allocation54_spill]] %s10845_s9 }
  0x2c   :  { %12636 = sst [smem:[#allocation55_spill]] %s10850_s25 }
  0x2d   :  { %s10865_s9 = sld [smem:[%s12590_s0 + %s10664_s22]]   ;;  %s10668_s22 = smov 32  }
  0x2e   :  { %s10870_s25 = sld [smem:[%s12590_s0 + %s10665_s28]]  }
  0x2f   :  { %12637 = sst [smem:[#allocation56_spill]] %s10860_s5 }
  0x30   :  { %s10880_s5 = sld [smem:[%s12590_s0 + %s10667_s15]]  }
  0x33   :  { %12638 = sst [smem:[#allocation57_spill]] %s10865_s9 }
  0x34   :  { %s10885_s9 = sld [smem:[%s12590_s0 + %s10668_s22]]  }
  0x35   :  { %71 = vsyncpa [#allocation3], 0 }
  0x36   :  { %72 = vsyncpa [#allocation5], 0 }
  0x37   :  { %73 = vsyncpa [#allocation8], 0 }
  0x38   :  { %74 = vsyncpa [#allocation11], 0 }
  0x39   :  { %75 = vsyncpa [#allocation14], 0 }
  0x3a   :  { %76 = vsyncpa [#allocation17], 0 }
  0x3b   :  { %77 = vsyncpa [#allocation20], 0 }
  0x3c   :  { %78 = vsyncpa [#allocation23], 0 }
  0x3d   :  { %79 = vsyncpa [#allocation26], 0 }
  0x3e   :  { %80 = vsyncpa [#allocation29], 0  ;;  %s10887_s28 = smov 0  }
  0x3f LB: > { %s10669_s0 = smov [#allocation4]   ;;  %s10893_s2 = sadd.s32 4294967295, %s10635_s28   ;;  %s10635_s28 = sphi %s10887_s28, %s86_s28  }
  0x40   : > { %s827_s1 = sshll.u32 %s10669_s0, 4  ;;  %p9587_p0 = scmp.ge.s32.totalorder %s10635_s28, 1  ;;  %s828_s1 = int_to_ptr.vmem [resolvable:$true] %s827_s1 }
  0x41   : > { %p799_p1 = scmp.lt.s32.totalorder %s10635_s28, 3  ;;  %p12595_p2 = scmp.eq.s32.totalorder %s10893_s2, 0 }
  0x42   : > { %s10670_s10 = smov [#allocation7]   ;;  %s10671_s16 = smov [#allocation10]  }
  0x43   : > { %p10898_p3 = pnand %p9587_p0, %p799_p1  ;;  %s863_s11 = sshll.u32 %s10670_s10, 4  ;;  %s10904_s11 = int_to_ptr.vmem [resolvable:$true] %s863_s11 }
  0x44   : > { %s892_s18 = sshll.u32 %s10671_s16, 4  ;;  %s10672_s22 = smov [#allocation13]   ;;  %s10912_s18 = int_to_ptr.vmem [resolvable:$true] %s892_s18 }
  0x45   : > { %s12639_s7 = scalar_select %p10898_p3, 1, 0 }
  0x46   : > { %p9908_p4 = pneg %p10898_p3  ;;  %s10914_s23 = sshll.u32 %s10672_s22, 4  ;;  %s922_s23 = int_to_ptr.vmem [resolvable:$true] %s10914_s23 }
  0x47   : > { %s10106_s0 = scalar_lea.vmem %s828_s1, 1152  ;;  %p10114_p10 = scmp.lt.s32.totalorder %s828_s1, %s828_s1 }
  0x48   : > { %p10908_p5 = pnand %p12595_p2, %p9908_p4  ;;  %p10107_p7 = scmp.ne.s32.totalorder %s828_s1, %s10106_s0 }
  0x49   : > { %p10115_p11 = scmp.lt.s32.totalorder %s10106_s0, %s10106_s0 }
  0x4a   : > { %p10918_p6 = pneg %p10908_p5 }
  0x4b   : > { %p10116_p12 = por %p10115_p11, %p10114_p10 }
  0x4c   : > { %p10109_p8 = pnand %p10107_p7, %p10918_p6 }
  0x4e   : > { %p10110_p9 = pneg %p10109_p8 }
  0x50   : > { %p10117_p13 = pnand %p10116_p12, %p10110_p9 }
  0x52   : > { %10120 = shalt.err (!%p10117_p13)
}
  0x53   : > { %s12596_s10 = smov 128   ;;  %s12599_s16 = smov 8  }
  0x54   : > { %9914 = dma.hbm_to_vmem [thread:$0]  (!%p10908_p5), %s10740_s17, 1152, %s828_s1, [#allocation5], %s12596_s10, %s12596_s10, %s12599_s16  }
  0x55   : > { %s10132_s22 = scalar_lea.vmem %s10904_s11, 128  ;;  %p10140_p7 = scmp.lt.s32.totalorder %s10904_s11, %s10904_s11 }
  0x56   : > { %p10133_p0 = scmp.ne.s32.totalorder %s10904_s11, %s10132_s22  ;;  %p10141_p8 = scmp.lt.s32.totalorder %s10132_s22, %s10132_s22 }
  0x58   : > { %p10135_p1 = pnand %p10133_p0, %p10918_p6  ;;  %p10142_p9 = por %p10141_p8, %p10140_p7 }
  0x5a   : > { %p10136_p4 = pneg %p10135_p1 }
  0x5c   : > { %p10143_p10 = pnand %p10142_p9, %p10136_p4 }
  0x5e   : > { %10146 = shalt.err (!%p10143_p10)
}
  0x5f   : > { %s12642_s8 = sld [smem:[#allocation46_spill]]  ;;  %s10158_s1 = scalar_lea.vmem %s10912_s18, 2304 }
  0x60   : > { %p10159_p11 = scmp.ne.s32.totalorder %s10912_s18, %s10158_s1  ;;  %p10166_p0 = scmp.lt.s32.totalorder %s10912_s18, %s10912_s18 }
  0x61   : > { %p10167_p1 = scmp.lt.s32.totalorder %s10158_s1, %s10158_s1 }
  0x62   : > { %p10161_p12 = pnand %p10159_p11, %p10918_p6 }
  0x63   : > { %p10168_p7 = por %p10167_p1, %p10166_p0 }
  0x64   : > { %p10162_p13 = pneg %p10161_p12 }
  0x65   : > { %9920 = dma.hbm_to_vmem [thread:$0]  (!%p10908_p5), %s12642_s8, 128, %s10904_s11, [#allocation8]  }
  0x66   : > { %p10169_p4 = pnand %p10168_p7, %p10162_p13 }
  0x68   : > { %10172 = shalt.err (!%p10169_p4)
}
  0x69   : > { %9926 = dma.hbm_to_vmem [thread:$0]  (!%p10908_p5), %s10785_s30, 2304, %s10912_s18, [#allocation11], %s12596_s10, %s12596_s10, %s12599_s16  }
  0x6a   : > { %s10184_s11 = scalar_lea.vmem %s922_s23, 1152  ;;  %p10192_p11 = scmp.lt.s32.totalorder %s922_s23, %s922_s23 }
  0x6b   : > { %p10185_p8 = scmp.ne.s32.totalorder %s922_s23, %s10184_s11  ;;  %p10193_p12 = scmp.lt.s32.totalorder %s10184_s11, %s10184_s11 }
  0x6d   : > { %p10187_p9 = pnand %p10185_p8, %p10918_p6  ;;  %p10194_p13 = por %p10193_p12, %p10192_p11 }
  0x6f   : > { %p10188_p10 = pneg %p10187_p9 }
  0x71   : > { %p10195_p0 = pnand %p10194_p13, %p10188_p10 }
  0x73   : > { %10198 = shalt.err (!%p10195_p0)
}
  0x74   : > { %9932 = dma.hbm_to_vmem [thread:$0]  (!%p10908_p5), %s10800_s20, 1152, %s922_s23, [#allocation14], %s12596_s10, %s12596_s10, %s12599_s16  }
  0x75   : > { %s10675_s18 = smov [#allocation16]   ;;  %s10676_s22 = smov [#allocation19]  }
  0x76   : > { %s948_s0 = sshll.u32 %s10675_s18, 4  ;;  %s975_s1 = sshll.u32 %s10676_s22, 4  ;;  %s949_s0 = int_to_ptr.vmem [resolvable:$true] %s948_s0  ;;  %s976_s1 = int_to_ptr.vmem [resolvable:$true] %s975_s1 }
  0x77   : > { %s10210_s8 = scalar_lea.vmem %s949_s0, 1152  ;;  %p10218_p8 = scmp.lt.s32.totalorder %s949_s0, %s949_s0 }
  0x78   : > { %p10211_p1 = scmp.ne.s32.totalorder %s949_s0, %s10210_s8  ;;  %p10219_p9 = scmp.lt.s32.totalorder %s10210_s8, %s10210_s8 }
  0x7a   : > { %p10213_p7 = pnand %p10211_p1, %p10918_p6  ;;  %p10220_p10 = por %p10219_p9, %p10218_p8 }
  0x7c   : > { %p10214_p4 = pneg %p10213_p7 }
  0x7e   : > { %p10221_p11 = pnand %p10220_p10, %p10214_p4 }
  0x80   : > { %10224 = shalt.err (!%p10221_p11)
}
  0x81   : > { %s12643_s6 = sld [smem:[#allocation51_spill]]  ;;  %s10236_s23 = scalar_lea.vmem %s976_s1, 512 }
  0x82   : > { %p10237_p12 = scmp.ne.s32.totalorder %s976_s1, %s10236_s23  ;;  %p10244_p1 = scmp.lt.s32.totalorder %s976_s1, %s976_s1 }
  0x83   : > { %p10245_p7 = scmp.lt.s32.totalorder %s10236_s23, %s10236_s23 }
  0x84   : > { %p10239_p13 = pnand %p10237_p12, %p10918_p6 }
  0x85   : > { %p10246_p2 = por %p10245_p7, %p10244_p1 }
  0x86   : > { %p10240_p0 = pneg %p10239_p13 }
  0x87   : > { %9938 = dma.hbm_to_vmem [thread:$0]  (!%p10908_p5), %s12643_s6, 1152, %s949_s0, [#allocation17], %s12596_s10, %s12596_s10, %s12599_s16  }
  0x88   : > { %p10247_p8 = pnand %p10246_p2, %p10240_p0 }
  0x8a   : > { %10250 = shalt.err (!%p10247_p8)
}
  0x8b   : > { %9944 = dma.hbm_to_vmem [thread:$0]  (!%p10908_p5), %s10830_s19, 512, %s976_s1, [#allocation20], %s12596_s10, %s12596_s10, %s12599_s16  }
  0x8c   : > { %s10677_s8 = smov [#allocation22]  }
  0x8d   : > { %s999_s11 = sshll.u32 %s10677_s8, 4  ;;  %s1000_s11 = int_to_ptr.vmem [resolvable:$true] %s999_s11 }
  0x8e   : > { %s10262_s18 = scalar_lea.vmem %s1000_s11, 576  ;;  %p10270_p11 = scmp.lt.s32.totalorder %s1000_s11, %s1000_s11 }
  0x8f   : > { %p10263_p4 = scmp.ne.s32.totalorder %s1000_s11, %s10262_s18  ;;  %p10271_p12 = scmp.lt.s32.totalorder %s10262_s18, %s10262_s18 }
  0x91   : > { %p10265_p9 = pnand %p10263_p4, %p10918_p6  ;;  %p10272_p2 = por %p10271_p12, %p10270_p11 }
  0x93   : > { %p10266_p10 = pneg %p10265_p9 }
  0x95   : > { %p10273_p13 = pnand %p10272_p2, %p10266_p10 }
  0x97   : > { %10276 = shalt.err (!%p10273_p13)
}
  0x98   : > { %s10678_s0 = smov 64   ;;  %s10679_s22 = smov 4  }
  0x99   : > { %9950 = dma.hbm_to_vmem [thread:$0]  (!%p10908_p5), %s10840_s14, 576, %s1000_s11, [#allocation23], %s10678_s0, %s10678_s0, %s10679_s22  }
  0x9a   : > { %s10680_s1 = smov [#allocation25]   ;;  %s10681_s8 = smov [#allocation28]  }
  0x9b   : > { %s1026_s23 = sshll.u32 %s10680_s1, 4  ;;  %s1053_s10 = sshll.u32 %s10681_s8, 4  ;;  %s1027_s23 = int_to_ptr.vmem [resolvable:$true] %s1026_s23  ;;  %s1054_s10 = int_to_ptr.vmem [resolvable:$true] %s1053_s10 }
  0x9c   : > { %s10288_s18 = scalar_lea.vmem %s1027_s23, 576  ;;  %p10296_p8 = scmp.lt.s32.totalorder %s1027_s23, %s1027_s23 }
  0x9d   : > { %p10289_p0 = scmp.ne.s32.totalorder %s1027_s23, %s10288_s18  ;;  %p10297_p4 = scmp.lt.s32.totalorder %s10288_s18, %s10288_s18 }
  0x9f   : > { %p10291_p1 = pnand %p10289_p0, %p10918_p6  ;;  %p10298_p9 = por %p10297_p4, %p10296_p8 }
  0xa1   : > { %p10292_p7 = pneg %p10291_p1 }
  0xa3   : > { %p10299_p10 = pnand %p10298_p9, %p10292_p7 }
  0xa5   : > { %10302 = shalt.err (!%p10299_p10)
}
  0xa6   : > { %9956 = dma.hbm_to_vmem [thread:$0]  (!%p10908_p5), %s10855_s21, 576, %s1027_s23, [#allocation26], %s10678_s0, %s10678_s0, %s10679_s22  }
  0xa7   : > { %s10314_s11 = scalar_lea.vmem %s1054_s10, 256  ;;  %p10322_p13 = scmp.lt.s32.totalorder %s1054_s10, %s1054_s10 }
  0xa8   : > { %p10315_p11 = scmp.ne.s32.totalorder %s1054_s10, %s10314_s11  ;;  %p10323_p0 = scmp.lt.s32.totalorder %s10314_s11, %s10314_s11 }
  0xaa   : > { %p10317_p12 = pnand %p10315_p11, %p10918_p6  ;;  %p10324_p1 = por %p10323_p0, %p10322_p13 }
  0xac   : > { %p10318_p2 = pneg %p10317_p12 }
  0xae   : > { %p10325_p3 = pnand %p10324_p1, %p10318_p2 }
  0xb0   : > { %10328 = shalt.err (!%p10325_p3)
}
  0xb1   : > { %9962 = dma.hbm_to_vmem [thread:$0]  (!%p10908_p5), %s10870_s25, 256, %s1054_s10, [#allocation29], %s10678_s0, %s10678_s0, %s10679_s22  }
  0xb2   : > { %s10682_s1 = smov [#allocation2]  }
  0xb3   : > { %s814_s23 = sshll.u32 %s10682_s1, 4  ;;  %s815_s23 = int_to_ptr.vmem [resolvable:$true] %s814_s23 }
  0xb4   : > { %s10340_s8 = scalar_lea.vmem %s815_s23, 256  ;;  %p10348_p9 = scmp.lt.s32.totalorder %s815_s23, %s815_s23 }
  0xb5   : > { %p10341_p7 = scmp.ne.s32.totalorder %s815_s23, %s10340_s8  ;;  %p10349_p10 = scmp.lt.s32.totalorder %s10340_s8, %s10340_s8 }
  0xb7   : > { %p10343_p8 = pnand %p10341_p7, %p10918_p6  ;;  %p10350_p11 = por %p10349_p10, %p10348_p9 }
  0xb9   : > { %p10344_p4 = pneg %p10343_p8 }
  0xbb   : > { %p10351_p3 = pnand %p10350_p11, %p10344_p4 }
  0xbd   : > { %10354 = shalt.err (!%p10351_p3)
}
  0xbe   : > { %s10683_s18 = smov 32   ;;  %s10684_s11 = smov 2  }
  0xbf   : > { %9911 = dma.hbm_to_vmem [thread:$0]  (!%p10908_p5), %s10735_s13, 256, %s815_s23, [#allocation3], %s10683_s18, %s10683_s18, %s10684_s11  }
  0xc0   : > { %s10685_s10 = smov [#allocation6]   ;;  %s10686_s22 = smov [#allocation9]  }
  0xc1   : > { %s846_s0 = sshll.u32 %s10685_s10, 4  ;;  %s879_s1 = sshll.u32 %s10686_s22, 4  ;;  %s847_s0 = int_to_ptr.vmem [resolvable:$true] %s846_s0  ;;  %s880_s1 = int_to_ptr.vmem [resolvable:$true] %s879_s1 }
  0xc2   : > { %s10366_s16 = scalar_lea.vmem %s847_s0, 1152  ;;  %p10374_p0 = scmp.lt.s32.totalorder %s847_s0, %s847_s0 }
  0xc3   : > { %p10367_p12 = scmp.ne.s32.totalorder %s847_s0, %s10366_s16  ;;  %p10375_p1 = scmp.lt.s32.totalorder %s10366_s16, %s10366_s16 }
  0xc5   : > { %p10369_p2 = pnand %p10367_p12, %p10918_p6  ;;  %p10376_p7 = por %p10375_p1, %p10374_p0 }
  0xc7   : > { %p10370_p13 = pneg %p10369_p2 }
  0xc9   : > { %p10377_p8 = pnand %p10376_p7, %p10370_p13 }
  0xcb   : > { %10380 = shalt.err (!%p10377_p8)
}
  0xcc   : > { %s12644_s8 = smov 8   ;;  %s12645_s6 = smov 128  }
  0xcd   : > { %9917 = dma.hbm_to_vmem [thread:$0]  (!%p10908_p5), %s10755_s29, 1152, %s847_s0, [#allocation5], %s12645_s6, %s12645_s6, %s12644_s8  }
  0xce   : > { %s10392_s23 = scalar_lea.vmem %s880_s1, 256  ;;  %p10400_p11 = scmp.lt.s32.totalorder %s880_s1, %s880_s1 }
  0xcf   : > { %p10393_p4 = scmp.ne.s32.totalorder %s880_s1, %s10392_s23  ;;  %p10401_p3 = scmp.lt.s32.totalorder %s10392_s23, %s10392_s23 }
  0xd1   : > { %p10395_p9 = pnand %p10393_p4, %p10918_p6  ;;  %p10402_p12 = por %p10401_p3, %p10400_p11 }
  0xd3   : > { %p10396_p10 = pneg %p10395_p9 }
  0xd5   : > { %p10403_p2 = pnand %p10402_p12, %p10396_p10 }
  0xd7   : > { %10406 = shalt.err (!%p10403_p2)
}
  0xd8   : > { %9923 = dma.hbm_to_vmem [thread:$0]  (!%p10908_p5), %s10780_s24, 256, %s880_s1, [#allocation8], %s12645_s6, %s12645_s6, %s12644_s8  }
  0xd9   : > { %s10687_s16 = smov [#allocation12]   ;;  %s10688_s11 = smov [#allocation15]  }
  0xda   : > { %s908_s18 = sshll.u32 %s10687_s16, 4  ;;  %s938_s10 = sshll.u32 %s10688_s11, 4  ;;  %s909_s18 = int_to_ptr.vmem [resolvable:$true] %s908_s18  ;;  %s939_s10 = int_to_ptr.vmem [resolvable:$true] %s938_s10 }
  0xdb   : > { %s10418_s0 = scalar_lea.vmem %s909_s18, 256  ;;  %p10426_p7 = scmp.lt.s32.totalorder %s909_s18, %s909_s18 }
  0xdc   : > { %p10419_p13 = scmp.ne.s32.totalorder %s909_s18, %s10418_s0  ;;  %p10427_p8 = scmp.lt.s32.totalorder %s10418_s0, %s10418_s0 }
  0xde   : > { %p10421_p0 = pnand %p10419_p13, %p10918_p6  ;;  %p10428_p4 = por %p10427_p8, %p10426_p7 }
  0xe0   : > { %p10422_p1 = pneg %p10421_p0 }
  0xe2   : > { %p10429_p9 = pnand %p10428_p4, %p10422_p1 }
  0xe4   : > { %10432 = shalt.err (!%p10429_p9)
}
  0xe5   : > { %9929 = dma.hbm_to_vmem [thread:$0]  (!%p10908_p5), %s10795_s12, 256, %s909_s18, [#allocation11], %s12645_s6, %s12645_s6, %s12644_s8  }
  0xe6   : > { %s10444_s22 = scalar_lea.vmem %s939_s10, 128  ;;  %p10452_p12 = scmp.lt.s32.totalorder %s939_s10, %s939_s10 }
  0xe7   : > { %p10445_p10 = scmp.ne.s32.totalorder %s939_s10, %s10444_s22  ;;  %p10453_p2 = scmp.lt.s32.totalorder %s10444_s22, %s10444_s22 }
  0xe9   : > { %p10447_p11 = pnand %p10445_p10, %p10918_p6  ;;  %p10454_p13 = por %p10453_p2, %p10452_p12 }
  0xeb   : > { %p10448_p3 = pneg %p10447_p11 }
  0xed   : > { %p10455_p0 = pnand %p10454_p13, %p10448_p3 }
  0xef   : > { %10458 = shalt.err (!%p10455_p0)
}
  0xf0   : > { %9935 = dma.hbm_to_vmem [thread:$0]  (!%p10908_p5), %s10810_s4, 128, %s939_s10, [#allocation14]  }
  0xf1   : > { %s10689_s1 = smov [#allocation18]   ;;  %s10690_s6 = smov [#allocation21]  }
  0xf2   : > { %s965_s23 = sshll.u32 %s10689_s1, 4  ;;  %s989_s8 = sshll.u32 %s10690_s6, 4  ;;  %s966_s23 = int_to_ptr.vmem [resolvable:$true] %s965_s23  ;;  %s990_s8 = int_to_ptr.vmem [resolvable:$true] %s989_s8 }
  0xf3   : > { %s10470_s16 = scalar_lea.vmem %s966_s23, 128  ;;  %p10478_p4 = scmp.lt.s32.totalorder %s966_s23, %s966_s23 }
  0xf4   : > { %p10471_p1 = scmp.ne.s32.totalorder %s966_s23, %s10470_s16  ;;  %p10479_p9 = scmp.lt.s32.totalorder %s10470_s16, %s10470_s16 }
  0xf6   : > { %p10473_p7 = pnand %p10471_p1, %p10918_p6  ;;  %p10480_p10 = por %p10479_p9, %p10478_p4 }
  0xf8   : > { %p10474_p8 = pneg %p10473_p7 }
  0xfa   : > { %p10481_p11 = pnand %p10480_p10, %p10474_p8 }
  0xfc   : > { %10484 = shalt.err (!%p10481_p11)
}
  0xfd   : > { %9941 = dma.hbm_to_vmem [thread:$0]  (!%p10908_p5), %s10825_s27, 128, %s966_s23, [#allocation17]  }
  0xfe   : > { %s10496_s18 = scalar_lea.vmem %s990_s8, 128  ;;  %p10504_p13 = scmp.lt.s32.totalorder %s990_s8, %s990_s8 }
  0xff   : > { %p10497_p3 = scmp.ne.s32.totalorder %s990_s8, %s10496_s18  ;;  %p10505_p0 = scmp.lt.s32.totalorder %s10496_s18, %s10496_s18 }
 0x101   : > { %p10499_p12 = pnand %p10497_p3, %p10918_p6  ;;  %p10506_p1 = por %p10505_p0, %p10504_p13 }
 0x103   : > { %p10500_p2 = pneg %p10499_p12 }
 0x105   : > { %p10507_p7 = pnand %p10506_p1, %p10500_p2 }
 0x107   : > { %10510 = shalt.err (!%p10507_p7)
}
 0x108   : > { %s12646_s11 = sld [smem:[#allocation53_spill]]  ;;  %s10691_s10 = smov [#allocation24]  }
 0x109   : > { %s1016_s0 = sshll.u32 %s10691_s10, 4  ;;  %s10692_s22 = smov [#allocation27]   ;;  %s1017_s0 = int_to_ptr.vmem [resolvable:$true] %s1016_s0 }
 0x10a   : > { %s1043_s1 = sshll.u32 %s10692_s22, 4  ;;  %s10522_s23 = scalar_lea.vmem %s1017_s0, 64  ;;  %s1044_s1 = int_to_ptr.vmem [resolvable:$true] %s1043_s1 }
 0x10b   : > { %p10523_p8 = scmp.ne.s32.totalorder %s1017_s0, %s10522_s23  ;;  %p10530_p10 = scmp.lt.s32.totalorder %s1017_s0, %s1017_s0 }
 0x10c   : > { %p10531_p11 = scmp.lt.s32.totalorder %s10522_s23, %s10522_s23 }
 0x10d   : > { %p10525_p4 = pnand %p10523_p8, %p10918_p6 }
 0x10e   : > { %9947 = dma.hbm_to_vmem [thread:$0]  (!%p10908_p5), %s12646_s11, 128, %s990_s8, [#allocation20]  }
 0x10f   : > { %p10526_p9 = pneg %p10525_p4  ;;  %p10532_p3 = por %p10531_p11, %p10530_p10 }
 0x111   : > { %p10533_p12 = pnand %p10532_p3, %p10526_p9 }
 0x113   : > { %10536 = shalt.err (!%p10533_p12)
}
 0x114   : > { %s12647_s6 = sld [smem:[#allocation55_spill]]  ;;  %s10548_s8 = scalar_lea.vmem %s1044_s1, 64 }
 0x115   : > { %p10549_p2 = scmp.ne.s32.totalorder %s1044_s1, %s10548_s8  ;;  %p10556_p1 = scmp.lt.s32.totalorder %s1044_s1, %s1044_s1 }
 0x116   : > { %p10557_p7 = scmp.lt.s32.totalorder %s10548_s8, %s10548_s8 }
 0x117   : > { %p10551_p13 = pnand %p10549_p2, %p10918_p6 }
 0x118   : > { %p10558_p8 = por %p10557_p7, %p10556_p1 }
 0x119   : > { %p10552_p0 = pneg %p10551_p13 }
 0x11a   : > { %9953 = dma.hbm_to_vmem [thread:$0]  (!%p10908_p5), %s12647_s6, 64, %s1017_s0, [#allocation23]  }
 0x11b   : > { %p10559_p4 = pnand %p10558_p8, %p10552_p0 }
 0x11d   : > { %10562 = shalt.err (!%p10559_p4)
}
 0x11e   : > { %s12648_s16 = sld [smem:[#allocation57_spill]]  ;;  %s10693_s18 = smov [#allocation30]  }
 0x11f   : > { %s1067_s11 = sshll.u32 %s10693_s18, 4  ;;  %s1068_s11 = int_to_ptr.vmem [resolvable:$true] %s1067_s11 }
 0x120   : > { %s10574_s10 = scalar_lea.vmem %s1068_s11, 64  ;;  %p10582_p3 = scmp.lt.s32.totalorder %s1068_s11, %s1068_s11 }
 0x121   : > { %p10575_p9 = scmp.ne.s32.totalorder %s1068_s11, %s10574_s10  ;;  %p10583_p12 = scmp.lt.s32.totalorder %s10574_s10, %s10574_s10 }
 0x123   : > { %p10577_p10 = pnand %p10575_p9, %p10918_p6  ;;  %p10584_p2 = por %p10583_p12, %p10582_p3 }
 0x124   : > { %9959 = dma.hbm_to_vmem [thread:$0]  (!%p10908_p5), %s12648_s16, 64, %s1044_s1, [#allocation26]  }
 0x125   : > { %p10578_p11 = pneg %p10577_p10 }
 0x127   : > { %p10585_p13 = pnand %p10584_p2, %p10578_p11 }
 0x129   : > { %10588 = shalt.err (!%p10585_p13)
}
 0x12a   : > { %9965 = dma.hbm_to_vmem [thread:$0]  (!%p10908_p5), %s10875_s3, 64, %s1068_s11, [#allocation29]  }
 0x12b   : > { %p12649_p0 = scmp.ne.s32.totalorder %s12639_s7, 0 }
 0x12c   : > { %p12650_p1 = scmp.eq.s32.totalorder (!%p12649_p0), %s10893_s2, 0 }
 0x12d   : > { %1088 = sbr.rel (%p12649_p0) target bundleno = 4347 (0x10fb), region = 144 }
 0x132   : > { %10594 = dma.done.wait (%p12650_p1), [#allocation3], 256   ;;  %p12651_p7 = pmov %p12650_p1 }
 0x133   : > { %p12652_p6 = pmov %p12650_p1 }
 0x134   : > { %10596 = vsyncadd (%p12651_p7), [#allocation3], 4294967040 }
 0x135   : > { %10598 = dma.done.wait (%p12652_p6), [#allocation5], 2304   ;;  %p12653_p8 = pmov %p12650_p1 }
 0x136   : > { %p12654_p4 = pmov %p12650_p1 }
 0x137   : > { %10600 = vsyncadd (%p12653_p8), [#allocation5], 4294964992 }
 0x138   : > { %10602 = dma.done.wait (%p12654_p4), [#allocation8], 384   ;;  %p12655_p5 = pmov %p12650_p1 }
 0x139   : > { %p12656_p9 = pmov %p12650_p1 }
 0x13a   : > { %10604 = vsyncadd (%p12655_p5), [#allocation8], 4294966912 }
 0x13b   : > { %10606 = dma.done.wait (%p12656_p9), [#allocation11], 2560   ;;  %p12657_p10 = pmov %p12650_p1 }
 0x13c   : > { %p12658_p11 = pmov %p12650_p1 }
 0x13d   : > { %10608 = vsyncadd (%p12657_p10), [#allocation11], 4294964736 }
 0x13e   : > { %10610 = dma.done.wait (%p12658_p11), [#allocation14], 1280   ;;  %p12659_p3 = pmov %p12650_p1 }
 0x13f   : > { %p12660_p12 = pmov %p12650_p1 }
 0x140   : > { %10612 = vsyncadd (%p12659_p3), [#allocation14], 4294966016 }
 0x141   : > { %10614 = dma.done.wait (%p12660_p12), [#allocation17], 1280   ;;  %p12661_p2 = pmov %p12650_p1 }
 0x142   : > { %p12662_p13 = pmov %p12650_p1 }
 0x143   : > { %10616 = vsyncadd (%p12661_p2), [#allocation17], 4294966016 }
 0x144   : > { %10618 = dma.done.wait (%p12662_p13), [#allocation20], 640   ;;  %p12663_p0 = pmov %p12650_p1 }
 0x146   : > { %10620 = vsyncadd (%p12663_p0), [#allocation20], 4294966656  ;;  %p12664_p1 = pmov %p12663_p0 }
 0x147   : > { %p12665_p7 = pmov %p12663_p0 }
 0x148   : > { %10622 = dma.done.wait (%p12664_p1), [#allocation23], 640  }
 0x149   : > { %10624 = vsyncadd (%p12665_p7), [#allocation23], 4294966656  ;;  %p12666_p6 = pmov %p12663_p0 }
 0x14a   : > { %p12667_p8 = pmov %p12663_p0 }
 0x14b   : > { %10626 = dma.done.wait (%p12666_p6), [#allocation26], 640  }
 0x14c   : > { %10628 = vsyncadd (%p12667_p8), [#allocation26], 4294966656  ;;  %p12668_p4 = pmov %p12663_p0 }
 0x14d   : > { %p12669_p5 = pmov %p12663_p0 }
 0x14e   : > { %10630 = dma.done.wait (%p12668_p4), [#allocation29], 320  }
 0x14f   : > { %10632 = vsyncadd (%p12669_p5), [#allocation29], 4294966976  ;;  %s12670_s7 = sld [smem:[#allocation41_spill]]  ;;  %p1247_p9 = scmp.lt.s32.totalorder %s10893_s2, 1  ;;  %v10694_v1 = vmov 0.0   ;;  %v10701_v3 = vmov 0   ;;  %v1270_v6 = vlaneseq }
 0x150   : > { %1389 = vmatprep.mubr.f32.mxu0 %v10694_v1  ;;  %1469 = vmatprep.mubr.f32.mxu1 %v10694_v1  ;;  %s12602_s0 = smov 17   ;;  %s12604_s22 = smov 16   ;;  %vm1318_vm1 = vcmask 1043456   ;;  %v1275_v31 = vld [vmem:[#allocation4] sm:$0xff]  ;;  %vm12621_vm5 = vcmask 31744   ;;  %v1298_v46 = vld [vmem:[#allocation4 + $0x8] sm:$0xff] }
 0x151   : > { %s12711_s2 = smov (!%p1247_p9, %s10893_s2), 1  ;;  %s10697_s1 = smov 15   ;;  %10092 = vset.pattern.permute.xlu0 %v10701_v3  ;;  %10093 = vset.pattern.permute.xlu1 %v10701_v3  ;;  %v1279_v7 = vshrl.u32 %v1270_v6, 7  ;;  %v11144_v9 = vand.u32 127, %v1270_v6  ;;  %v1484_v59 = vld [vmem:[#allocation4 + $0x10] sm:$0xff]  ;;  %v1590_v60 = vld [vmem:[#allocation4 + $0x18] sm:$0xff] }
 0x152   : > { %s12601_s15 = sshll.u32 %s12711_s2, 3  ;;  %s12606_s23 = smov 1   ;;  %vm2247_vm10 = vcmask 64512  }
 0x153   : > { %s12671_s6 = sld [smem:[#allocation43_spill]]  ;;  %s10699_s8 = smov 127   ;;  %v11146_v10 = vsub.s32 0, %v1279_v7  ;;  %v11148_v11 = vsub.s32 1, %v1279_v7  ;;  %vm12618_vm0 = vcmp.lt.s32.totalorder %v11144_v9, 17  ;;  %vm1480_vm2 = vcmp.lt.s32.totalorder %v11144_v9, 15 }
 0x154   : > { %s12672_s16 = sld [smem:[#allocation44_spill]]  ;;  %s10700_s18 = smov 113   ;;  %vm12619_vm3 = vcmp.lt.s32.totalorder %v11144_v9, 16  ;;  %vm12620_vm4 = vcmp.lt.s32.totalorder %v11144_v9, 1  ;;  %vm1790_vm6 = vcmp.lt.s32.totalorder %v11144_v9, 127  ;;  %vm1896_vm7 = vcmp.lt.s32.totalorder %v11144_v9, 113 }
 0x155   : > { %s1251_s26 = scalar_lea.vmem %s12670_s7, %s12601_s15  ;;  %s12673_s11 = sld [smem:[#allocation42_spill]]  ;;  %v1689_v7 = vld [vmem:[#allocation4 + $0x20] sm:$0xff]  ;;  %vm2002_vm8 = vcmp.lt.s32.totalorder %v11144_v9, 112  ;;  %vm2108_vm9 = vcmp.lt.s32.totalorder %v11144_v9, 111  ;;  %vm3056_vm11 = vcmp.lt.s32.totalorder %v11144_v9, 32  ;;  %vm3032_vm12 = vcmp.lt.s32.totalorder %v11144_v9, 34 }
 0x156   : > { %v11111_v0 = vld [vmem:[%s1251_s26] sm:$0xff]  ;;  %s10702_s10 = smov 112   ;;  %s10703_s7 = smov 111   ;;  %vm3247_vm13 = vcmp.lt.s32.totalorder %v11144_v9, 30  ;;  %vm3359_vm14 = vcmp.lt.s32.totalorder %v11144_v9, 2  ;;  %vm3576_vm15 = vcmp.lt.s32.totalorder %v11144_v9, 126 }
 0x157   : > { %1266 = vrot.lane.b32.xlu1 %v11111_v0, %s12602_s0  ;;  %1290 = vrot.lane.b32.xlu0 %v11111_v0, %s12604_s22  ;;  %v1264_v2 = vcombine.high %v11111_v0, %v11111_v0  ;;  %s12674_s26 = sld [smem:[#allocation45_spill]]  ;;  %s12608_s15 = smov 94  }
 0x159   : > { %v2210_v4 = vld [vmem:[%s12671_s6] sm:$0xff]  ;;  %s10705_s6 = smov 34  }
 0x15a   : > { %v2218_v5 = vld [vmem:[%s12672_s16] sm:$0xff]  ;;  %s12675_s16 = sld [smem:[#allocation48_spill]] }
 0x15b   : > { %1476 = vrot.lane.b32.xlu0 %v11111_v0, %s10697_s1  ;;  %1268 = vrot.lane.b32.xlu1 %v1264_v2, %s12602_s0  ;;  %v9649_v8 = vld [vmem:[%s12673_s11 + $0x8] sm:$0x3]  ;;  %v1276_v12 = vld [vmem:[%s12673_s11] sm:$0x3] }
 0x15c   : > { %v11152_v15 = vrot.slane %v9649_v8, %v11146_v10  ;;  %v11155_v16 = vrot.slane %v9649_v8, %v11148_v11  ;;  %v11159_v17 = vrot.slane %v1276_v12, %v11146_v10  ;;  %v11162_v18 = vrot.slane %v1276_v12, %v11148_v11  ;;  %v9634_v19 = vld [vmem:[%s12673_s11 + $0x2] sm:$0x3]  ;;  %v9641_v25 = vld [vmem:[%s12673_s11 + $0x4] sm:$0x3]  ;;  %v9645_v30 = vld [vmem:[%s12673_s11 + $0x6] sm:$0x3] }
 0x15d   : > { %v11177_v28 = vrot.slane %v9634_v19, %v11146_v10  ;;  %v11180_v29 = vrot.slane %v9634_v19, %v11148_v11  ;;  %v11186_v32 = vrot.slane %v9641_v25, %v11146_v10  ;;  %v11189_v33 = vrot.slane %v9641_v25, %v11148_v11  ;;  %v9653_v45 = vld [vmem:[%s12673_s11 + $0xa] sm:$0x3]  ;;  %v9657_v58 = vld [vmem:[%s12673_s11 + $0xc] sm:$0x3]  ;;  %v9661_v6 = vld [vmem:[%s12673_s11 + $0xe] sm:$0x3] }
 0x15e   : > { %v1701_v22 = vcombine.low %v11152_v15, %v11155_v16  ;;  %v11200_v40 = vrot.slane %v9645_v30, %v11146_v10  ;;  %v11206_v43 = vrot.slane %v9645_v30, %v11148_v11  ;;  %v11221_v54 = vrot.slane %v9653_v45, %v11146_v10  ;;  %v1794_v8 = vld [vmem:[#allocation4 + $0x28] sm:$0xff]  ;;  %v9665_v25 = vld [vmem:[%s12673_s11 + $0x10] sm:$0x3] }
 0x15f   : > { %1478 = vrot.lane.b32.xlu1 %v1264_v2, %s10697_s1  ;;  %1292 = vrot.lane.b32.xlu0 %v1264_v2, %s12604_s22  ;;  %v11229_v57 = vrot.slane %v9653_v45, %v11148_v11 }
 0x160   : > { %v1703_v36 = vmul.f32 %v1701_v22, %v11111_v0 }
 0x162   : > { %v1705_v50 = vcombine.high %v1703_v36, %v1703_v36 }
 0x163   : > { %1584 = vrot.lane.b32.xlu1 %v1264_v2, %s12606_s23  ;;  %1582 = vrot.lane.b32.xlu0 %v11111_v0, %s12606_s23 }
 0x167   : > { %1788 = vrot.lane.b32.xlu1 %v1264_v2, %s10699_s8  ;;  %1786 = vrot.lane.b32.xlu0 %v11111_v0, %s10699_s8 }
 0x16b   : > { %1894 = vrot.lane.b32.xlu1 %v1264_v2, %s10700_s18  ;;  %1892 = vrot.lane.b32.xlu0 %v11111_v0, %s10700_s18 }
 0x16f   : > { %2000 = vrot.lane.b32.xlu1 %v1264_v2, %s10702_s10  ;;  %1998 = vrot.lane.b32.xlu0 %v11111_v0, %s10702_s10 }
 0x173   : > { %2106 = vrot.lane.b32.xlu1 %v1264_v2, %s10703_s7  ;;  %2104 = vrot.lane.b32.xlu0 %v11111_v0, %s10703_s7  ;;  %v11242_v2 = vrot.slane %v9657_v58, %v11146_v10 }
 0x177   : > { %2213 = vperm.xlu0 %10092, %v2210_v4   ;;  %2221 = vperm.xlu1 %10093, %v2218_v5   ;;  %v11250_v5 = vrot.slane %v9657_v58, %v11148_v11 }
 0x1c9   : > { %v1267_v13 = vpop.permute.xlu1 %1266  ;;  %v1291_v14 = vpop.permute.xlu0 %1290 }
 0x1cd   : > { %v1477_v20 = vpop.permute.xlu0 %1476  ;;  %v1269_v21 = vpop.permute.xlu1 %1268 }
 0x1ce   : > { %v1274_v23 = vsel %vm12618_vm0, %v1269_v21, %v1267_v13  ;;  %v1273_v24 = vsel %vm12618_vm0, %v1267_v13, %v1269_v21 }
 0x1cf   : > { %v1289_v26 = vmul.f32 %v11162_v18, %v1273_v24  ;;  %v1288_v27 = vmul.f32 %v11159_v17, %v1274_v23  ;;  %v11271_v23 = vrot.slane %v9661_v6, %v11148_v11  ;;  %v1900_v24 = vld [vmem:[#allocation4 + $0x30] sm:$0xff] }
 0x1d1   : > { %9638 = vmatprep.subr.msk.mxu1 %vm1318_vm1, %v1289_v26  ;;  %v1479_v34 = vpop.permute.xlu1 %1478  ;;  %v1293_v35 = vpop.permute.xlu0 %1292 }
 0x1d2   : > { %v1481_v37 = vsel %vm1480_vm2, %v1477_v20, %v1479_v34  ;;  %v1296_v38 = vsel %vm12619_vm3, %v1293_v35, %v1291_v14  ;;  %9639 = vmatpush1.msk.msra.mxu1 %vm1318_vm1, %v1288_v27  ;;  %v1295_v39 = vsel %vm12619_vm3, %v1291_v14, %v1293_v35  ;;  %v1482_v41 = vsel %vm1480_vm2, %v1479_v34, %v1477_v20 }
 0x1d3   : > { %v1313_v42 = vmul.f32 %v11180_v29, %v1295_v39  ;;  %v1312_v44 = vmul.f32 %v11177_v28, %v1296_v38  ;;  %9640 = vmatmul.mubr.msk.f32.vlgmr.msra.gmra.mxu1 %vm12621_vm5, %v1275_v31  ;;  %v1499_v47 = vmul.f32 %v11189_v33, %v1481_v37  ;;  %v1498_v51 = vmul.f32 %v11186_v32, %v1482_v41  ;;  %v2006_v38 = vld [vmem:[#allocation4 + $0x38] sm:$0xff] }
 0x1d4   : > { %1679 = vmatprep.mubr.f32.mxu1 %v10694_v1  ;;  %v11263_v20 = vrot.slane %v9661_v6, %v11146_v10  ;;  %v11290_v37 = vrot.slane %v9665_v25, %v11148_v11 }
 0x1d5   : > { %v1585_v48 = vpop.permute.xlu1 %1584  ;;  %9635 = vmatprep.subr.msk.mxu0 %vm1318_vm1, %v1313_v42  ;;  %v1583_v49 = vpop.permute.xlu0 %1582 }
 0x1d6   : > { %v1587_v52 = vsel %vm12620_vm4, %v1583_v49, %v1585_v48  ;;  %v1588_v53 = vsel %vm12620_vm4, %v1585_v48, %v1583_v49  ;;  %9636 = vmatpush1.msk.msra.mxu0 %vm1318_vm1, %v1312_v44 }
 0x1d7   : > { %v1604_v55 = vmul.f32 %v11200_v40, %v1588_v53  ;;  %v1605_v56 = vmul.f32 %v11206_v43, %v1587_v52  ;;  %9637 = vmatmul.mubr.msk.f32.vlgmr.msra.gmra.mxu0 %vm12621_vm5, %v1298_v46  ;;  %9642 = vmatprep.subr.msk.mxu0 %vm1318_vm1, %v1499_v47  ;;  %v2112_v47 = vld [vmem:[#allocation4 + $0x40] sm:$0xff] }
 0x1d8   : > { %9643 = vmatpush1.msk.msra.mxu0 %vm1318_vm1, %v1498_v51  ;;  %1573 = vmatprep.mubr.f32.mxu0 %v10694_v1 }
 0x1d9   : > { %v1789_v61 = vpop.permute.xlu1 %1788  ;;  %9646 = vmatprep.subr.msk.mxu1 %vm1318_vm1, %v1605_v56  ;;  %v1787_v62 = vpop.permute.xlu0 %1786  ;;  %9650 = vmatprep.subr.msk.mxu0 %vm1318_vm1, %v1705_v50 }
 0x1da   : > { %v1791_v63 = vsel %vm1790_vm6, %v1787_v62, %v1789_v61  ;;  %v1792_v0 = vsel %vm1790_vm6, %v1789_v61, %v1787_v62  ;;  %9647 = vmatpush1.msk.msra.mxu1 %vm1318_vm1, %v1604_v55 }
 0x1db   : > { %v1808_v3 = vmul.f32 %v11221_v54, %v1791_v63  ;;  %v1809_v4 = vmul.f32 %v11229_v57, %v1792_v0  ;;  %9644 = vmatmul.mubr.msk.f32.vlgmr.msra.gmra.mxu0 %vm12621_vm5, %v1484_v59  ;;  %9648 = vmatmul.mubr.msk.f32.vlgmr.msra.gmra.mxu1 %vm12621_vm5, %v1590_v60 }
 0x1dc   : > { %9651 = vmatpush1.msk.msra.mxu0 %vm1318_vm1, %v1703_v36  ;;  %1777 = vmatprep.mubr.f32.mxu0 %v10694_v1  ;;  %v11287_v36 = vrot.slane %v9665_v25, %v11146_v10 }
 0x1dd   : > { %v1895_v12 = vpop.permute.xlu1 %1894  ;;  %9654 = vmatprep.subr.msk.mxu1 %vm1318_vm1, %v1809_v4  ;;  %v1893_v13 = vpop.permute.xlu0 %1892  ;;  %1883 = vmatprep.mubr.f32.mxu1 %v10694_v1 }
 0x1de   : > { %v1897_v14 = vsel %vm1896_vm7, %v1893_v13, %v1895_v12  ;;  %v1898_v19 = vsel %vm1896_vm7, %v1895_v12, %v1893_v13  ;;  %9655 = vmatpush1.msk.msra.mxu1 %vm1318_vm1, %v1808_v3 }
 0x1df   : > { %v1914_v21 = vmul.f32 %v11242_v2, %v1897_v14  ;;  %v1915_v22 = vmul.f32 %v11250_v5, %v1898_v19  ;;  %9652 = vmatmul.mubr.msk.f32.vlgmr.msra.gmra.mxu0 %vm12621_vm5, %v1689_v7  ;;  %9656 = vmatmul.mubr.msk.f32.vlgmr.msra.gmra.mxu1 %vm12621_vm5, %v1794_v8 }
 0x1e0   : > { %1989 = vmatprep.mubr.f32.mxu0 %v10694_v1  ;;  %2095 = vmatprep.mubr.f32.mxu1 %v10694_v1 }
 0x1e1   : > { %v2001_v26 = vpop.permute.xlu1 %2000  ;;  %9658 = vmatprep.subr.msk.mxu0 %vm1318_vm1, %v1915_v22  ;;  %v1999_v27 = vpop.permute.xlu0 %1998 }
 0x1e2   : > { %v2003_v30 = vsel %vm2002_vm8, %v1999_v27, %v2001_v26  ;;  %v2004_v31 = vsel %vm2002_vm8, %v2001_v26, %v1999_v27  ;;  %9659 = vmatpush1.msk.msra.mxu0 %vm1318_vm1, %v1914_v21 }
 0x1e3   : > { %v2020_v34 = vmul.f32 %v11263_v20, %v2003_v30  ;;  %v2021_v35 = vmul.f32 %v11271_v23, %v2004_v31  ;;  %9660 = vmatmul.mubr.msk.f32.vlgmr.msra.gmra.mxu0 %vm12621_vm5, %v1900_v24 }
 0x1e4   : > { %2201 = vmatprep.mubr.f32.mxu0 %v10694_v1 }
 0x1e5   : > { %v2107_v39 = vpop.permute.xlu1 %2106  ;;  %9662 = vmatprep.subr.msk.mxu1 %vm1318_vm1, %v2021_v35  ;;  %v2105_v41 = vpop.permute.xlu0 %2104 }
 0x1e6   : > { %v2109_v42 = vsel %vm2108_vm9, %v2105_v41, %v2107_v39  ;;  %v2110_v44 = vsel %vm2108_vm9, %v2107_v39, %v2105_v41  ;;  %9663 = vmatpush1.msk.msra.mxu1 %vm1318_vm1, %v2020_v34 }
 0x1e7   : > { %v2126_v45 = vmul.f32 %v11287_v36, %v2109_v42  ;;  %v2127_v46 = vmul.f32 %v11290_v37, %v2110_v44  ;;  %9664 = vmatmul.mubr.msk.f32.vlgmr.msra.gmra.mxu1 %vm12621_vm5, %v2006_v38 }
 0x1e8   : > { %2315 = vmatprep.mubr.f32.mxu1 %v10694_v1 }
 0x1e9   : > { %9666 = vmatprep.subr.msk.mxu0 %vm1318_vm1, %v2127_v46 }
 0x1ea   : > { %9667 = vmatpush1.msk.msra.mxu0 %vm1318_vm1, %v2126_v45 }
 0x1eb   : > { %9668 = vmatmul.mubr.msk.f32.vlgmr.msra.gmra.mxu0 %vm12621_vm5, %v2112_v47  ;;  %vm5592_vm5 = vcmp.lt.s32.totalorder %v11144_v9, 124 }
 0x1ec   : > { %2389 = vmatprep.mubr.f32.mxu0 %v10694_v1 }
 0x1f2   : > { %v2214_v30 = vpop.permute.xlu0 %2213  ;;  %v2222_v38 = vpop.permute.xlu1 %2221 }
 0x293   : > { %v1471_v48 = vpop.f32.mrf.mxu1 }
 0x295   : > { %v1473_v50 = vpop.f32.mrf.mxu1 }
 0x297   : > { %v1391_v49 = vpop.f32.mrf.mxu0 }
 0x298   : > { %v1472_v51 = vadd.f32 %v1471_v48, %v1391_v49  ;;  %v2994_v48 = vld [vmem:[%s12674_s26] sm:$0xff]  ;;  %v3002_v49 = vld [vmem:[#allocation7] sm:$0xff]  ;;  %s12610_s26 = smov 96  }
 0x299   : > { %v1393_v52 = vpop.f32.mrf.mxu0 }
 0x29a   : > { %v1474_v53 = vadd.f32 %v1473_v50, %v1393_v52 }
 0x29b   : > { %v1575_v55 = vpop.f32.mrf.mxu0  ;;  %v1681_v56 = vpop.f32.mrf.mxu1 }
 0x29c   : > { %v1580_v58 = vadd.f32 %v1575_v55, %v1472_v51 }
 0x29d   : > { %v1577_v59 = vpop.f32.mrf.mxu0  ;;  %v1683_v60 = vpop.f32.mrf.mxu1 }
 0x29e   : > { %v1581_v61 = vadd.f32 %v1577_v59, %v1474_v53  ;;  %v1686_v62 = vadd.f32 %v1681_v56, %v1580_v58  ;;  %v2244_v59 = vld [vmem:[#allocation6 + $0x8] sm:$0xff] }
 0x29f   : > { %v1779_v63 = vpop.f32.mrf.mxu0  ;;  %v1885_v0 = vpop.f32.mrf.mxu1 }
 0x2a0   : > { %v1687_v3 = vadd.f32 %v1683_v60, %v1581_v61  ;;  %v1784_v4 = vadd.f32 %v1779_v63, %v1686_v62 }
 0x2a1   : > { %v1781_v6 = vpop.f32.mrf.mxu0  ;;  %v1887_v12 = vpop.f32.mrf.mxu1 }
 0x2a2   : > { %v1785_v7 = vadd.f32 %v1781_v6, %v1687_v3  ;;  %v1890_v8 = vadd.f32 %v1885_v0, %v1784_v4 }
 0x2a3   : > { %v1991_v13 = vpop.f32.mrf.mxu0 }
 0x2a4   : > { %v1891_v14 = vadd.f32 %v1887_v12, %v1785_v7  ;;  %v1996_v19 = vadd.f32 %v1991_v13, %v1890_v8 }
 0x2a5   : > { %v1993_v21 = vpop.f32.mrf.mxu0 }
 0x2a6   : > { %v1997_v25 = vadd.f32 %v1993_v21, %v1891_v14 }
 0x2a7   : > { %v2097_v22 = vpop.f32.mrf.mxu1 }
 0x2a8   : > { %v2102_v26 = vadd.f32 %v2097_v22, %v1996_v19 }
 0x2a9   : > { %v2099_v24 = vpop.f32.mrf.mxu1 }
 0x2aa   : > { %v2103_v31 = vadd.f32 %v2099_v24, %v1997_v25  ;;  %v2489_v24 = vld [vmem:[#allocation6 + $0x18] sm:$0xff] }
 0x2ab   : > { %v2203_v27 = vpop.f32.mrf.mxu0 }
 0x2ac   : > { %v2208_v34 = vadd.f32 %v2203_v27, %v2102_v26 }
 0x2ad   : > { %v2205_v35 = vpop.f32.mrf.mxu0 }
 0x2ae   : > { %v2209_v39 = vadd.f32 %v2205_v35, %v2103_v31  ;;  %v2216_v41 = vmul.f32 %v2214_v30, %v2208_v34 }
 0x2b0   : > { %v2217_v42 = vmul.f32 %v2214_v30, %v2209_v39  ;;  %v2224_v44 = vadd.f32 %v2222_v38, %v2216_v41  ;;  %v2657_v30 = vld [vmem:[#allocation6 + $0x28] sm:$0xff]  ;;  %v2743_v39 = vld [vmem:[#allocation6 + $0x30] sm:$0xff] }
 0x2b2   : > { %v2225_v45 = vadd.f32 %v2222_v38, %v2217_v42  ;;  %v2226_v46 = vmax.f32 %v2224_v44, 0.0 }
 0x2b4   : > { %v2227_v47 = vmax.f32 %v2225_v45, 0.0  ;;  %2237 = vrot.lane.b32.xlu1 %v2226_v46, %s12604_s22 }
 0x2b6   : > { %2239 = vrot.lane.b32.xlu0 %v2227_v47, %s12604_s22  ;;  %v2573_v13 = vmul.f32 %v2227_v47, %v11155_v16  ;;  %v2569_v16 = vld [vmem:[#allocation6 + $0x20] sm:$0xff]  ;;  %s12677_s22 = sld [smem:[#allocation49_spill]] }
 0x2b8   : > { %2228 = vrot.lane.b32.xlu1 %v2226_v46, %s12602_s0 }
 0x2ba   : > { %2230 = vrot.lane.b32.xlu0 %v2227_v47, %s12602_s0  ;;  %s12676_s0 = sld [smem:[#allocation47_spill]] }
 0x2bc   : > { %2396 = vrot.lane.b32.xlu1 %v2226_v46, %s10697_s1 }
 0x2be   : > { %2398 = vrot.lane.b32.xlu0 %v2227_v47, %s10697_s1  ;;  %s10704_s1 = smov 32  }
 0x2c0   : > { %2482 = vrot.lane.b32.xlu1 %v2226_v46, %s12606_s23 }
 0x2c2   : > { %2484 = vrot.lane.b32.xlu0 %v2227_v47, %s12606_s23  ;;  %s9830_s23 = sshll.u32 %s12711_s2, 5 }
 0x2c4   : > { %2650 = vrot.lane.b32.xlu1 %v2226_v46, %s10699_s8 }
 0x2c6   : > { %2652 = vrot.lane.b32.xlu0 %v2227_v47, %s10699_s8 }
 0x2c8   : > { %2736 = vrot.lane.b32.xlu1 %v2226_v46, %s10700_s18 }
 0x2ca   : > { %2738 = vrot.lane.b32.xlu0 %v2227_v47, %s10700_s18  ;;  %s10707_s18 = smov 2  }
 0x2cc   : > { %2822 = vrot.lane.b32.xlu1 %v2226_v46, %s10702_s10 }
 0x2ce   : > { %2824 = vrot.lane.b32.xlu0 %v2227_v47, %s10702_s10 }
 0x2d0   : > { %2908 = vrot.lane.b32.xlu1 %v2226_v46, %s10703_s7 }
 0x2d2   : > { %2910 = vrot.lane.b32.xlu0 %v2227_v47, %s10703_s7  ;;  %s12612_s7 = smov 98  }
 0x2d4   : > { %2997 = vperm.xlu1 %10093, %v2994_v48  }
 0x2d6   : > { %3005 = vperm.xlu0 %10092, %v3002_v49  }
 0x326   : > { %v2238_v50 = vpop.permute.xlu1 %2237 }
 0x328   : > { %v2240_v51 = vpop.permute.xlu0 %2239 }
 0x329   : > { %v2241_v52 = vsel %vm12619_vm3, %v2238_v50, %v2240_v51  ;;  %v2242_v53 = vsel %vm12619_vm3, %v2240_v51, %v2238_v50  ;;  %vm5281_vm3 = vcmp.lt.s32.totalorder %v11144_v9, 60 }
 0x32a   : > { %v2245_v55 = vmul.f32 %v2242_v53, %v11177_v28  ;;  %v2229_v56 = vpop.permute.xlu1 %2228  ;;  %v2246_v58 = vmul.f32 %v2241_v52, %v11180_v29  ;;  %v2234_v28 = vld [vmem:[#allocation6] sm:$0xff] }
 0x32c   : > { %v2231_v60 = vpop.permute.xlu0 %2230  ;;  %2281 = vmatprep.subr.mxu1 %v2246_v58 }
 0x32d   : > { %v2232_v61 = vsel %vm12618_vm0, %v2229_v56, %v2231_v60  ;;  %v2233_v62 = vsel %vm12618_vm0, %v2231_v60, %v2229_v56  ;;  %2282 = vmatpush1.msra.mxu1 %v2245_v55  ;;  %vm5070_vm0 = vcmp.lt.s32.totalorder %v11144_v9, 68 }
 0x32e   : > { %v2235_v63 = vmul.f32 %v2233_v62, %v11159_v17  ;;  %v2397_v0 = vpop.permute.xlu1 %2396  ;;  %v2236_v3 = vmul.f32 %v2232_v61, %v11162_v18  ;;  %9669 = vmatmul.mubr.msk.f32.vlgmr.msra.gmra.mxu1 %vm2247_vm10, %v2244_v59  ;;  %v2403_v18 = vld [vmem:[#allocation6 + $0x10] sm:$0xff] }
 0x32f   : > { %2473 = vmatprep.mubr.f32.mxu1 %v10694_v1 }
 0x330   : > { %v2399_v29 = vpop.permute.xlu0 %2398  ;;  %2355 = vmatprep.subr.mxu0 %v2236_v3 }
 0x331   : > { %v2400_v4 = vsel %vm1480_vm2, %v2397_v0, %v2399_v29  ;;  %v2401_v6 = vsel %vm1480_vm2, %v2399_v29, %v2397_v0  ;;  %2356 = vmatpush1.msra.mxu0 %v2235_v63  ;;  %vm3688_vm2 = vcmp.lt.s32.totalorder %v11144_v9, 98 }
 0x332   : > { %v2404_v7 = vmul.f32 %v2401_v6, %v11186_v32  ;;  %v2483_v17 = vpop.permute.xlu1 %2482  ;;  %v2405_v8 = vmul.f32 %v2400_v4, %v11189_v33  ;;  %9670 = vmatmul.mubr.msk.f32.vlgmr.msra.gmra.mxu0 %vm2247_vm10, %v2234_v28  ;;  %v2572_v32 = vmul.f32 %v2226_v46, %v11152_v15  ;;  %v2829_v46 = vld [vmem:[#allocation6 + $0x38] sm:$0xff] }
 0x333   : > { %2559 = vmatprep.mubr.f32.mxu0 %v10694_v1 }
 0x334   : > { %v2485_v12 = vpop.permute.xlu0 %2484  ;;  %2439 = vmatprep.subr.mxu1 %v2405_v8 }
 0x335   : > { %v2486_v14 = vsel %vm12620_vm4, %v2483_v17, %v2485_v12  ;;  %v2487_v19 = vsel %vm12620_vm4, %v2485_v12, %v2483_v17  ;;  %2440 = vmatpush1.msra.mxu1 %v2404_v7  ;;  %vm5389_vm4 = vcmp.lt.s32.totalorder %v11144_v9, 4 }
 0x336   : > { %v2490_v33 = vmul.f32 %v2487_v19, %v11200_v40  ;;  %2607 = vmatprep.subr.mxu1 %v2573_v13  ;;  %v2651_v21 = vpop.permute.xlu1 %2650  ;;  %9671 = vmatmul.mubr.msk.f32.vlgmr.msra.gmra.mxu1 %vm2247_vm10, %v2403_v18  ;;  %v2491_v22 = vmul.f32 %v2486_v14, %v11206_v43 }
 0x337   : > { %2608 = vmatpush1.msra.mxu1 %v2572_v32  ;;  %2641 = vmatprep.mubr.f32.mxu1 %v10694_v1 }
 0x338   : > { %v2653_v25 = vpop.permute.xlu0 %2652  ;;  %2525 = vmatprep.subr.mxu0 %v2491_v22 }
 0x339   : > { %v2654_v26 = vsel %vm1790_vm6, %v2651_v21, %v2653_v25  ;;  %v2655_v15 = vsel %vm1790_vm6, %v2653_v25, %v2651_v21  ;;  %2526 = vmatpush1.msra.mxu0 %v2490_v33 }
 0x33a   : > { %v2658_v40 = vmul.f32 %v2654_v26, %v11221_v54  ;;  %v2737_v27 = vpop.permute.xlu1 %2736  ;;  %9672 = vmatmul.mubr.msk.f32.vlgmr.msra.gmra.mxu0 %vm2247_vm10, %v2489_v24  ;;  %v2659_v43 = vmul.f32 %v2655_v15, %v11229_v57  ;;  %9673 = vmatmul.mubr.msk.f32.vlgmr.msra.gmra.mxu1 %vm2247_vm10, %v2569_v16 }
 0x33b   : > { %2727 = vmatprep.mubr.f32.mxu0 %v10694_v1  ;;  %2813 = vmatprep.mubr.f32.mxu1 %v10694_v1 }
 0x33c   : > { %v2739_v31 = vpop.permute.xlu0 %2738  ;;  %2693 = vmatprep.subr.mxu0 %v2659_v43 }
 0x33d   : > { %v2740_v34 = vsel %vm1896_vm7, %v2737_v27, %v2739_v31  ;;  %v2741_v54 = vsel %vm1896_vm7, %v2739_v31, %v2737_v27  ;;  %2694 = vmatpush1.msra.mxu0 %v2658_v40  ;;  %vm3912_vm7 = vcmp.lt.s32.totalorder %v11144_v9, 94 }
 0x33e   : > { %v2744_v35 = vmul.f32 %v2740_v34, %v11242_v2  ;;  %v2823_v38 = vpop.permute.xlu1 %2822  ;;  %9674 = vmatmul.mubr.msk.f32.vlgmr.msra.gmra.mxu0 %vm2247_vm10, %v2657_v30  ;;  %v2745_v57 = vmul.f32 %v2741_v54, %v11250_v5 }
 0x33f   : > { %2899 = vmatprep.mubr.f32.mxu0 %v10694_v1 }
 0x340   : > { %v2825_v41 = vpop.permute.xlu0 %2824  ;;  %2779 = vmatprep.subr.mxu1 %v2745_v57 }
 0x341   : > { %v2826_v42 = vsel %vm2002_vm8, %v2823_v38, %v2825_v41  ;;  %v2827_v44 = vsel %vm2002_vm8, %v2825_v41, %v2823_v38  ;;  %2780 = vmatpush1.msra.mxu1 %v2744_v35 }
 0x342   : > { %v2830_v45 = vmul.f32 %v2826_v42, %v11263_v20  ;;  %9675 = vmatmul.mubr.msk.f32.vlgmr.msra.gmra.mxu1 %vm2247_vm10, %v2743_v39  ;;  %v2831_v2 = vmul.f32 %v2827_v44, %v11271_v23  ;;  %v2909_v5 = vpop.permute.xlu1 %2908  ;;  %v2915_v23 = vld [vmem:[#allocation6 + $0x40] sm:$0xff] }
 0x343   : > { %2985 = vmatprep.mubr.f32.mxu1 %v10694_v1 }
 0x344   : > { %v2911_v47 = vpop.permute.xlu0 %2910  ;;  %2865 = vmatprep.subr.mxu0 %v2831_v2 }
 0x345   : > { %v2912_v48 = vsel %vm2108_vm9, %v2909_v5, %v2911_v47  ;;  %v2913_v49 = vsel %vm2108_vm9, %v2911_v47, %v2909_v5  ;;  %2866 = vmatpush1.msra.mxu0 %v2830_v45  ;;  %v4020_v47 = vld [vmem:[%s12675_s16] sm:$0xff]  ;;  %vm5101_vm9 = vcmp.lt.s32.totalorder %v11144_v9, 64 }
 0x346   : > { %v2916_v50 = vmul.f32 %v2912_v48, %v11287_v36  ;;  %9676 = vmatmul.mubr.msk.f32.vlgmr.msra.gmra.mxu0 %vm2247_vm10, %v2829_v46  ;;  %v2917_v20 = vmul.f32 %v2913_v49, %v11290_v37  ;;  %v4021_v48 = vld [vmem:[%s12675_s16 + $0x8] sm:$0xff]  ;;  %v4036_v49 = vld [vmem:[#allocation9] sm:$0xff] }
 0x347   : > { %3147 = vmatprep.mubr.f32.mxu0 %v10694_v1 }
 0x348   : > { %2951 = vmatprep.subr.mxu1 %v2917_v20  ;;  %v9681_v20 = vld [vmem:[%s12673_s11 + $0x14] sm:$0x3] }
 0x349   : > { %2952 = vmatpush1.msra.mxu1 %v2916_v50  ;;  %v4037_v50 = vld [vmem:[#allocation9 + $0x8] sm:$0xff] }
 0x34a   : > { %9677 = vmatmul.mubr.msk.f32.vlgmr.msra.gmra.mxu1 %vm2247_vm10, %v2915_v23  ;;  %v11445_v23 = vrot.slane %v9681_v20, %v11146_v10 }
 0x34b   : > { %3230 = vmatprep.mubr.f32.mxu1 %v10694_v1 }
 0x34f   : > { %v2998_v16 = vpop.permute.xlu1 %2997 }
 0x351   : > { %v3006_v40 = vpop.permute.xlu0 %3005 }
 0x3ee   : > { %v2317_v51 = vpop.f32.mrf.mxu1 }
 0x3f0   : > { %v2319_v52 = vpop.f32.mrf.mxu1 }
 0x3f2   : > { %v2391_v53 = vpop.f32.mrf.mxu0 }
 0x3f3   : > { %v2392_v55 = vadd.f32 %v2391_v53, %v2317_v51  ;;  %v11448_v51 = vrot.slane %v9681_v20, %v11148_v11 }
 0x3f4   : > { %v2393_v56 = vpop.f32.mrf.mxu0 }
 0x3f5   : > { %v2394_v58 = vadd.f32 %v2393_v56, %v2319_v52  ;;  %v9678_v52 = vld [vmem:[%s12673_s11 + $0x12] sm:$0x3] }
 0x3f6   : > { %v2475_v36 = vpop.f32.mrf.mxu1 }
 0x3f7   : > { %v2480_v59 = vadd.f32 %v2475_v36, %v2392_v55 }
 0x3f8   : > { %v2477_v60 = vpop.f32.mrf.mxu1 }
 0x3f9   : > { %v2481_v61 = vadd.f32 %v2477_v60, %v2394_v58  ;;  %v11459_v60 = vrot.slane %v9678_v52, %v11146_v10 }
 0x3fa   : > { %v2561_v37 = vpop.f32.mrf.mxu0  ;;  %v2643_v62 = vpop.f32.mrf.mxu1 }
 0x3fb   : > { %v2566_v63 = vadd.f32 %v2561_v37, %v2480_v59  ;;  %v9679_v37 = vld [vmem:[%s12676_s0 + $0x10] sm:$0xff] }
 0x3fc   : > { %v2563_v0 = vpop.f32.mrf.mxu0  ;;  %v2645_v29 = vpop.f32.mrf.mxu1 }
 0x3fd   : > { %v2567_v3 = vadd.f32 %v2563_v0, %v2481_v61  ;;  %v2648_v28 = vadd.f32 %v2643_v62, %v2566_v63  ;;  %v11462_v61 = vrot.slane %v9678_v52, %v11148_v11  ;;  %v9688_v62 = vld [vmem:[%s12673_s11 + $0x16] sm:$0x3]  ;;  %v9692_v52 = vld [vmem:[%s12676_s0 + $0x38] sm:$0xff] }
 0x3fe   : > { %v2729_v4 = vpop.f32.mrf.mxu0 }
 0x3ff   : > { %v2649_v6 = vadd.f32 %v2645_v29, %v2567_v3  ;;  %v2734_v7 = vadd.f32 %v2729_v4, %v2648_v28  ;;  %v9698_v29 = vld [vmem:[%s12673_s11 + $0x1a] sm:$0x3] }
 0x400   : > { %v2731_v17 = vpop.f32.mrf.mxu0 }
 0x401   : > { %v2735_v18 = vadd.f32 %v2731_v17, %v2649_v6  ;;  %v11479_v17 = vrot.slane %v9688_v62, %v11148_v11 }
 0x402   : > { %v2815_v8 = vpop.f32.mrf.mxu1 }
 0x403   : > { %v2820_v12 = vadd.f32 %v2815_v8, %v2734_v7  ;;  %v11476_v7 = vrot.slane %v9688_v62, %v11146_v10  ;;  %v9693_v8 = vld [vmem:[%s12673_s11 + $0x18] sm:$0x3] }
 0x404   : > { %v2817_v13 = vpop.f32.mrf.mxu1 }
 0x405   : > { %v2821_v32 = vadd.f32 %v2817_v13, %v2735_v18  ;;  %v9680_v18 = vld [vmem:[%s12676_s0 + $0x18] sm:$0xff] }
 0x406   : > { %v2901_v14 = vpop.f32.mrf.mxu0 }
 0x407   : > { %v2906_v33 = vadd.f32 %v2901_v14, %v2820_v12  ;;  %v3035_v12 = vld [vmem:[%s12676_s0] sm:$0xff] }
 0x408   : > { %v2903_v19 = vpop.f32.mrf.mxu0 }
 0x409   : > { %v2907_v22 = vadd.f32 %v2903_v19, %v2821_v32  ;;  %v11486_v19 = vrot.slane %v9698_v29, %v11148_v11 }
 0x40a   : > { %v2987_v21 = vpop.f32.mrf.mxu1 }
 0x40b   : > { %v2992_v24 = vadd.f32 %v2987_v21, %v2906_v33  ;;  %v11493_v21 = vrot.slane %v9693_v8, %v11146_v10 }
 0x40c   : > { %v2989_v25 = vpop.f32.mrf.mxu1 }
 0x40d   : > { %v3000_v26 = vmul.f32 %v2998_v16, %v2992_v24  ;;  %v2993_v15 = vadd.f32 %v2989_v25, %v2907_v22  ;;  %v11496_v22 = vrot.slane %v9698_v29, %v11146_v10  ;;  %v11504_v25 = vrot.slane %v9693_v8, %v11148_v11 }
 0x40f   : > { %v3001_v27 = vmul.f32 %v2998_v16, %v2993_v15  ;;  %v3008_v43 = vadd.f32 %v3006_v40, %v3000_v26  ;;  %v9703_v26 = vld [vmem:[%s12673_s11 + $0x1c] sm:$0x3]  ;;  %v3036_v15 = vld [vmem:[%s12676_s0 + $0x8] sm:$0xff] }
 0x411   : > { %v3010_v30 = vmax.f32 %v3008_v43, 0.0  ;;  %v3009_v31 = vadd.f32 %v3006_v40, %v3001_v27  ;;  %v9686_v40 = vld [vmem:[%s12676_s0 + $0x20] sm:$0xff] }
 0x413   : > { %3012 = vrot.lane.b32.xlu1 %v3010_v30, %s10699_s8  ;;  %v3011_v34 = vmax.f32 %v3009_v31, 0.0 }
 0x415   : > { %3014 = vrot.lane.b32.xlu0 %v3011_v34, %s10699_s8  ;;  %s12616_s8 = smov 30  }
 0x485   : > { %v3013_v54 = vpop.permute.xlu1 %3012 }
 0x487   : > { %v3015_v35 = vpop.permute.xlu0 %3014 }
 0x488   : > { %v3016_v38 = vsel %vm1790_vm6, %v3013_v54, %v3015_v35  ;;  %v3017_v57 = vsel %vm1790_vm6, %v3015_v35, %v3013_v54  ;;  %v11520_v35 = vrot.slane %v9703_v26, %v11146_v10  ;;  %vm3800_vm6 = vcmp.lt.s32.totalorder %v11144_v9, 96 }
 0x489   : > { %v3019_v39 = vmax.f32 %v3011_v34, %v3017_v57  ;;  %v3018_v41 = vmax.f32 %v3010_v30, %v3016_v38 }
 0x48b   : > { %3022 = vrot.lane.b32.xlu0 %v3019_v39, %s10702_s10  ;;  %3020 = vrot.lane.b32.xlu1 %v3018_v41, %s10702_s10  ;;  %s12614_s10 = smov 126  }
 0x4fd   : > { %v3023_v42 = vpop.permute.xlu0 %3022  ;;  %v3021_v44 = vpop.permute.xlu1 %3020 }
 0x4fe   : > { %v3024_v45 = vsel %vm2002_vm8, %v3021_v44, %v3023_v42  ;;  %v3025_v2 = vsel %vm2002_vm8, %v3023_v42, %v3021_v44  ;;  %v9687_v42 = vld [vmem:[%s12676_s0 + $0x28] sm:$0xff]  ;;  %v9691_v44 = vld [vmem:[%s12676_s0 + $0x30] sm:$0xff]  ;;  %vm4093_vm8 = vcmask 130048  }
 0x4ff   : > { %v11404_v46 = vmax.f32 %v3018_v41, %v3024_v45  ;;  %v11406_v5 = vmax.f32 %v3019_v39, %v3025_v2  ;;  %v11528_v39 = vrot.slane %v9703_v26, %v11148_v11  ;;  %v9708_v41 = vld [vmem:[%s12673_s11 + $0x1e] sm:$0x3] }
 0x500   : > { %v11549_v20 = vrot.slane %v9708_v41, %v11148_v11 }
 0x501   : > { %3054 = vrot.lane.b32.xlu0 %v11406_v5, %s10704_s1  ;;  %3052 = vrot.lane.b32.xlu1 %v11404_v46, %s10704_s1  ;;  %v3484_v30 = vmul.f32 %v11486_v19, %v11406_v5  ;;  %v3483_v54 = vmul.f32 %v11496_v22, %v11404_v46 }
 0x505   : > { %3030 = vrot.lane.b32.xlu0 %v11406_v5, %s10705_s6  ;;  %3028 = vrot.lane.b32.xlu1 %v11404_v46, %s10705_s6 }
 0x509   : > { %3245 = vrot.lane.b32.xlu0 %v11406_v5, %s12616_s8  ;;  %3243 = vrot.lane.b32.xlu1 %v11404_v46, %s12616_s8 }
 0x50d   : > { %3357 = vrot.lane.b32.xlu0 %v11406_v5, %s10707_s18  ;;  %3355 = vrot.lane.b32.xlu1 %v11404_v46, %s10707_s18 }
 0x511   : > { %3574 = vrot.lane.b32.xlu0 %v11406_v5, %s12614_s10  ;;  %3572 = vrot.lane.b32.xlu1 %v11404_v46, %s12614_s10 }
 0x515   : > { %3686 = vrot.lane.b32.xlu0 %v11406_v5, %s12612_s7  ;;  %3684 = vrot.lane.b32.xlu1 %v11404_v46, %s12612_s7 }
 0x519   : > { %3798 = vrot.lane.b32.xlu0 %v11406_v5, %s12610_s26  ;;  %3796 = vrot.lane.b32.xlu1 %v11404_v46, %s12610_s26 }
 0x51d   : > { %3910 = vrot.lane.b32.xlu0 %v11406_v5, %s12608_s15  ;;  %3908 = vrot.lane.b32.xlu1 %v11404_v46, %s12608_s15 }
 0x521   : > { %4024 = vperm.xlu0 %10092, %v4020_v47   ;;  %4029 = vperm.xlu1 %10093, %v4021_v48   ;;  %v11540_v47 = vrot.slane %v9708_v41, %v11146_v10 }
 0x525   : > { %4040 = vperm.xlu0 %10092, %v4036_v49   ;;  %4045 = vperm.xlu1 %10093, %v4037_v50   ;;  %v9713_v50 = vld [vmem:[%s12673_s11 + $0x20] sm:$0x3] }
 0x573   : > { %v3055_v53 = vpop.permute.xlu0 %3054  ;;  %v3053_v55 = vpop.permute.xlu1 %3052 }
 0x574   : > { %v3057_v56 = vsel %vm3056_vm11, %v3053_v55, %v3055_v53  ;;  %v3058_v58 = vsel %vm3056_vm11, %v3055_v53, %v3053_v55  ;;  %v9696_v53 = vld [vmem:[%s12676_s0 + $0x40] sm:$0xff] }
 0x575   : > { %v3075_v36 = vmul.f32 %v11445_v23, %v3058_v58  ;;  %v3076_v59 = vmul.f32 %v11448_v51, %v3057_v56 }
 0x577   : > { %v3031_v63 = vpop.permute.xlu0 %3030  ;;  %3113 = vmatprep.subr.mxu0 %v3076_v59  ;;  %v3029_v0 = vpop.permute.xlu1 %3028  ;;  %v11560_v59 = vrot.slane %v9713_v50, %v11146_v10 }
 0x578   : > { %v3033_v3 = vsel %vm3032_vm12, %v3029_v0, %v3031_v63  ;;  %v3034_v28 = vsel %vm3032_vm12, %v3031_v63, %v3029_v0  ;;  %3114 = vmatpush1.msra.mxu0 %v3075_v36  ;;  %v11568_v63 = vrot.slane %v9713_v50, %v11148_v11  ;;  %v9718_v0 = vld [vmem:[%s12673_s11 + $0x22] sm:$0x3] }
 0x579   : > { %v3050_v4 = vmul.f32 %v11459_v60, %v3034_v28  ;;  %9682 = vmatmul.mubr.msk.f32.vlgmr.msra.gmra.mxu0 %vm2247_vm10, %v9679_v37  ;;  %v3051_v6 = vmul.f32 %v11462_v61, %v3033_v3  ;;  %v9697_v3 = vld [vmem:[%s12676_s0 + $0x48] sm:$0xff]  ;;  %v9701_v28 = vld [vmem:[%s12676_s0 + $0x50] sm:$0xff] }
 0x57a   : > { %3153 = vmatprep.mubr.f32.mxu0 %v10694_v1 }
 0x57b   : > { %v3246_v13 = vpop.permute.xlu0 %3245  ;;  %3196 = vmatprep.subr.mxu1 %v3051_v6  ;;  %v3244_v14 = vpop.permute.xlu1 %3243 }
 0x57c   : > { %v3248_v32 = vsel %vm3247_vm13, %v3244_v14, %v3246_v13  ;;  %v3249_v33 = vsel %vm3247_vm13, %v3246_v13, %v3244_v14  ;;  %3197 = vmatpush1.msra.mxu1 %v3050_v4  ;;  %v11588_v14 = vrot.slane %v9718_v0, %v11148_v11 }
 0x57d   : > { %v3266_v24 = vmul.f32 %v11476_v7, %v3249_v33  ;;  %9683 = vmatmul.mubr.msk.f32.gmra.mxu0 %vm2247_vm10, %v9680_v18  ;;  %9684 = vmatmul.mubr.msk.f32.vlgmr.msra.gmra.mxu1 %vm2247_vm10, %v3035_v12  ;;  %v3267_v16 = vmul.f32 %v11479_v17, %v3248_v32  ;;  %v11580_v18 = vrot.slane %v9718_v0, %v11146_v10  ;;  %v9702_v32 = vld [vmem:[%s12676_s0 + $0x58] sm:$0xff]  ;;  %v9706_v33 = vld [vmem:[%s12676_s0 + $0x60] sm:$0xff] }
 0x57e   : > { %3236 = vmatprep.mubr.f32.mxu1 %v10694_v1  ;;  %3338 = vmatprep.mubr.f32.mxu0 %v10694_v1 }
 0x57f   : > { %v3358_v27 = vpop.permute.xlu0 %3357  ;;  %3304 = vmatprep.subr.mxu0 %v3267_v16  ;;  %v3356_v43 = vpop.permute.xlu1 %3355 }
 0x580   : > { %v3360_v31 = vsel %vm3359_vm14, %v3356_v43, %v3358_v27  ;;  %v3361_v34 = vsel %vm3359_vm14, %v3358_v27, %v3356_v43  ;;  %3305 = vmatpush1.msra.mxu0 %v3266_v24  ;;  %v9707_v43 = vld [vmem:[%s12676_s0 + $0x68] sm:$0xff] }
 0x581   : > { %v3378_v38 = vmul.f32 %v11493_v21, %v3361_v34  ;;  %9685 = vmatmul.mubr.msk.f32.gmra.mxu1 %vm2247_vm10, %v3036_v15  ;;  %9689 = vmatmul.mubr.msk.f32.vlgmr.msra.gmra.mxu0 %vm2247_vm10, %v9686_v40  ;;  %v3379_v57 = vmul.f32 %v11504_v25, %v3360_v31  ;;  %v9712_v31 = vld [vmem:[%s12676_s0 + $0x78] sm:$0xff]  ;;  %v9716_v34 = vld [vmem:[%s12676_s0 + $0x80] sm:$0xff] }
 0x582   : > { %3521 = vmatprep.subr.mxu0 %v3484_v30  ;;  %3344 = vmatprep.mubr.f32.mxu0 %v10694_v1  ;;  %v9711_v30 = vld [vmem:[%s12676_s0 + $0x70] sm:$0xff] }
 0x583   : > { %3522 = vmatpush1.msra.mxu0 %v3483_v54  ;;  %v3575_v45 = vpop.permute.xlu0 %3574  ;;  %3416 = vmatprep.subr.mxu1 %v3379_v57  ;;  %v3573_v2 = vpop.permute.xlu1 %3572  ;;  %v9717_v54 = vld [vmem:[%s12676_s0 + $0x88] sm:$0xff] }
 0x584   : > { %v3577_v46 = vsel %vm3576_vm15, %v3573_v2, %v3575_v45  ;;  %v3578_v5 = vsel %vm3576_vm15, %v3575_v45, %v3573_v2  ;;  %3417 = vmatpush1.msra.mxu1 %v3378_v38  ;;  %3450 = vmatprep.mubr.f32.mxu1 %v10694_v1 }
 0x585   : > { %v3595_v48 = vmul.f32 %v11520_v35, %v3577_v46  ;;  %9690 = vmatmul.mubr.msk.f32.gmra.mxu0 %vm2247_vm10, %v9687_v42  ;;  %9694 = vmatmul.mubr.msk.f32.vlgmr.msra.gmra.mxu1 %vm2247_vm10, %v9691_v44  ;;  %v3596_v49 = vmul.f32 %v11528_v39, %v3578_v5 }
 0x586   : > { %3456 = vmatprep.mubr.f32.mxu1 %v10694_v1  ;;  %3555 = vmatprep.mubr.f32.mxu0 %v10694_v1 }
 0x587   : > { %v3687_v55 = vpop.permute.xlu0 %3686  ;;  %3633 = vmatprep.subr.mxu1 %v3596_v49  ;;  %v3685_v56 = vpop.permute.xlu1 %3684 }
 0x588   : > { %v3689_v58 = vsel %vm3688_vm2, %v3685_v56, %v3687_v55  ;;  %v3690_v36 = vsel %vm3688_vm2, %v3687_v55, %v3685_v56  ;;  %3634 = vmatpush1.msra.mxu1 %v3595_v48 }
 0x589   : > { %v3707_v37 = vmul.f32 %v11540_v47, %v3689_v58  ;;  %9695 = vmatmul.mubr.msk.f32.gmra.mxu1 %vm2247_vm10, %v9692_v52  ;;  %9699 = vmatmul.mubr.msk.f32.vlgmr.msra.gmra.mxu0 %vm2247_vm10, %v9696_v53  ;;  %v3708_v62 = vmul.f32 %v11549_v20, %v3690_v36 }
 0x58a   : > { %3561 = vmatprep.mubr.f32.mxu0 %v10694_v1  ;;  %3667 = vmatprep.mubr.f32.mxu1 %v10694_v1 }
 0x58b   : > { %v3799_v29 = vpop.permute.xlu0 %3798  ;;  %v3797_v4 = vpop.permute.xlu1 %3796  ;;  %3745 = vmatprep.subr.mxu0 %v3708_v62 }
 0x58c   : > { %v3801_v6 = vsel %vm3800_vm6, %v3797_v4, %v3799_v29  ;;  %v3802_v8 = vsel %vm3800_vm6, %v3799_v29, %v3797_v4  ;;  %3746 = vmatpush1.msra.mxu0 %v3707_v37 }
 0x58d   : > { %v3819_v12 = vmul.f32 %v11560_v59, %v3801_v6  ;;  %9700 = vmatmul.mubr.msk.f32.gmra.mxu0 %vm2247_vm10, %v9697_v3  ;;  %9704 = vmatmul.mubr.msk.f32.vlgmr.msra.gmra.mxu1 %vm2247_vm10, %v9701_v28  ;;  %v3820_v13 = vmul.f32 %v11568_v63, %v3802_v8 }
 0x58e   : > { %3673 = vmatprep.mubr.f32.mxu1 %v10694_v1  ;;  %3779 = vmatprep.mubr.f32.mxu0 %v10694_v1 }
 0x58f   : > { %v3911_v24 = vpop.permute.xlu0 %3910  ;;  %3857 = vmatprep.subr.mxu1 %v3820_v13  ;;  %v3909_v16 = vpop.permute.xlu1 %3908 }
 0x590   : > { %v3913_v26 = vsel %vm3912_vm7, %v3909_v16, %v3911_v24  ;;  %v3914_v15 = vsel %vm3912_vm7, %v3911_v24, %v3909_v16  ;;  %3858 = vmatpush1.msra.mxu1 %v3819_v12 }
 0x591   : > { %v3931_v40 = vmul.f32 %v11580_v18, %v3913_v26  ;;  %9705 = vmatmul.mubr.msk.f32.gmra.mxu1 %vm2247_vm10, %v9702_v32  ;;  %9709 = vmatmul.mubr.msk.f32.vlgmr.msra.gmra.mxu0 %vm2247_vm10, %v9706_v33  ;;  %v3932_v27 = vmul.f32 %v11588_v14, %v3914_v15 }
 0x592   : > { %3785 = vmatprep.mubr.f32.mxu0 %v10694_v1  ;;  %3891 = vmatprep.mubr.f32.mxu1 %v10694_v1 }
 0x593   : > { %3969 = vmatprep.subr.mxu0 %v3932_v27 }
 0x594   : > { %3970 = vmatpush1.msra.mxu0 %v3931_v40 }
 0x595   : > { %9710 = vmatmul.mubr.msk.f32.gmra.mxu0 %vm2247_vm10, %v9707_v43  ;;  %9714 = vmatmul.mubr.msk.f32.vlgmr.msra.gmra.mxu1 %vm2247_vm10, %v9711_v30 }
 0x596   : > { %3897 = vmatprep.mubr.f32.mxu1 %v10694_v1  ;;  %4003 = vmatprep.mubr.f32.mxu0 %v10694_v1 }
 0x599   : > { %9715 = vmatmul.mubr.msk.f32.gmra.mxu1 %vm2247_vm10, %v9712_v31  ;;  %9719 = vmatmul.mubr.msk.f32.vlgmr.msra.gmra.mxu0 %vm2247_vm10, %v9716_v34 }
 0x59a   : > { %4009 = vmatprep.mubr.f32.mxu0 %v10694_v1  ;;  %4164 = vmatprep.mubr.f32.mxu1 %v10694_v1 }
 0x59c   : > { %v4025_v43 = vpop.permute.xlu0 %4024 }
 0x59d   : > { %9720 = vmatmul.mubr.msk.f32.gmra.mxu0 %vm2247_vm10, %v9717_v54 }
 0x59e   : > { %4247 = vmatprep.mubr.f32.mxu0 %v10694_v1 }
 0x639   : > { %v3149_v38 = vpop.f32.mrf.mxu0 }
 0x63b   : > { %v3151_v57 = vpop.f32.mrf.mxu0 }
 0x63d   : > { %v3155_v41 = vpop.f32.mrf.mxu0  ;;  %v3232_v42 = vpop.f32.mrf.mxu1 }
 0x63e   : > { %v3233_v37 = vadd.f32 %v3232_v42, %v3149_v38 }
 0x63f   : > { %v3157_v44 = vpop.f32.mrf.mxu0  ;;  %v3234_v45 = vpop.f32.mrf.mxu1 }
 0x640   : > { %v3235_v3 = vadd.f32 %v3234_v45, %v3151_v57 }
 0x641   : > { %v3238_v2 = vpop.f32.mrf.mxu1  ;;  %v3340_v46 = vpop.f32.mrf.mxu0 }
 0x642   : > { %v3351_v28 = vadd.f32 %v3340_v46, %v3233_v37  ;;  %v3239_v37 = vadd.f32 %v3238_v2, %v3155_v41 }
 0x643   : > { %v3240_v5 = vpop.f32.mrf.mxu1  ;;  %v3342_v48 = vpop.f32.mrf.mxu0 }
 0x644   : > { %v3352_v6 = vadd.f32 %v3342_v48, %v3235_v3 }
 0x645   : > { %v3346_v49 = vpop.f32.mrf.mxu0  ;;  %v3452_v50 = vpop.f32.mrf.mxu1 }
 0x646   : > { %v3463_v8 = vadd.f32 %v3452_v50, %v3351_v28  ;;  %v3353_v28 = vadd.f32 %v3346_v49, %v3239_v37 }
 0x647   : > { %v3348_v52 = vpop.f32.mrf.mxu0  ;;  %v3454_v53 = vpop.f32.mrf.mxu1 }
 0x648   : > { %v3464_v32 = vadd.f32 %v3454_v53, %v3352_v6 }
 0x649   : > { %v3458_v55 = vpop.f32.mrf.mxu1  ;;  %v3557_v56 = vpop.f32.mrf.mxu0 }
 0x64a   : > { %v3568_v33 = vadd.f32 %v3557_v56, %v3463_v8  ;;  %v4041_v56 = vpop.permute.xlu0 %4040 }
 0x64b   : > { %v3460_v58 = vpop.f32.mrf.mxu1  ;;  %v3559_v36 = vpop.f32.mrf.mxu0 }
 0x64c   : > { %v3569_v26 = vadd.f32 %v3559_v36, %v3464_v32 }
 0x64d   : > { %v3563_v62 = vpop.f32.mrf.mxu0  ;;  %v3669_v0 = vpop.f32.mrf.mxu1 }
 0x64e   : > { %v3680_v15 = vadd.f32 %v3669_v0, %v3568_v33  ;;  %v3241_v0 = vadd.f32 %v3240_v5, %v3157_v44 }
 0x64f   : > { %v3565_v29 = vpop.f32.mrf.mxu0  ;;  %v3671_v4 = vpop.f32.mrf.mxu1 }
 0x650   : > { %v3681_v30 = vadd.f32 %v3671_v4, %v3569_v26  ;;  %v3354_v8 = vadd.f32 %v3348_v52, %v3241_v0 }
 0x651   : > { %v3675_v12 = vpop.f32.mrf.mxu1  ;;  %v3781_v13 = vpop.f32.mrf.mxu0 }
 0x652   : > { %v3792_v31 = vadd.f32 %v3781_v13, %v3680_v15  ;;  %v3465_v13 = vadd.f32 %v3458_v55, %v3353_v28  ;;  %v3466_v33 = vadd.f32 %v3460_v58, %v3354_v8 }
 0x653   : > { %v3677_v24 = vpop.f32.mrf.mxu1  ;;  %v3783_v16 = vpop.f32.mrf.mxu0 }
 0x654   : > { %v3793_v38 = vadd.f32 %v3783_v16, %v3681_v30  ;;  %v3570_v16 = vadd.f32 %v3563_v62, %v3465_v13  ;;  %v3571_v2 = vadd.f32 %v3565_v29, %v3466_v33  ;;  %v4030_v29 = vpop.permute.xlu1 %4029 }
 0x655   : > { %v3787_v40 = vpop.f32.mrf.mxu0  ;;  %v3893_v27 = vpop.f32.mrf.mxu1 }
 0x656   : > { %v3904_v57 = vadd.f32 %v3893_v27, %v3792_v31  ;;  %v3682_v26 = vadd.f32 %v3675_v12, %v3570_v16  ;;  %v3683_v5 = vadd.f32 %v3677_v24, %v3571_v2 }
 0x657   : > { %v3789_v34 = vpop.f32.mrf.mxu0  ;;  %v3895_v54 = vpop.f32.mrf.mxu1 }
 0x658   : > { %v3905_v45 = vadd.f32 %v3895_v54, %v3793_v38  ;;  %v3794_v49 = vadd.f32 %v3787_v40, %v3682_v26  ;;  %v3795_v55 = vadd.f32 %v3789_v34, %v3683_v5  ;;  %v4991_v38 = vld [vmem:[%s12677_s22 + $0x8] sm:$0xff] }
 0x659   : > { %v4005_v42 = vpop.f32.mrf.mxu0  ;;  %v3899_v41 = vpop.f32.mrf.mxu1 }
 0x65a   : > { %v4016_v46 = vadd.f32 %v4005_v42, %v3904_v57  ;;  %v3906_v15 = vadd.f32 %v3899_v41, %v3794_v49  ;;  %v4990_v57 = vld [vmem:[%s12677_s22] sm:$0xff] }
 0x65b   : > { %v4007_v48 = vpop.f32.mrf.mxu0  ;;  %v3901_v52 = vpop.f32.mrf.mxu1  ;;  %v5007_v42 = vld [vmem:[#allocation12 + $0x8] sm:$0xff] }
 0x65c   : > { %v4032_v50 = vmul.f32 %v4025_v43, %v4016_v46  ;;  %v4017_v53 = vadd.f32 %v4007_v48, %v3905_v45  ;;  %v3907_v62 = vadd.f32 %v3901_v52, %v3795_v55  ;;  %v5006_v45 = vld [vmem:[#allocation12] sm:$0xff] }
 0x65d   : > { %v4011_v44 = vpop.f32.mrf.mxu0 }
 0x65e   : > { %v4048_v3 = vadd.f32 %v4041_v56, %v4032_v50  ;;  %v4033_v36 = vmul.f32 %v4025_v43, %v4017_v53  ;;  %v4018_v27 = vadd.f32 %v4011_v44, %v3906_v15  ;;  %v4046_v43 = vpop.permute.xlu1 %4045 }
 0x65f   : > { %v4013_v58 = vpop.f32.mrf.mxu0 }
 0x660   : > { %v11619_v6 = vmax.f32 %v4048_v3, 0.0  ;;  %v4049_v4 = vadd.f32 %v4041_v56, %v4033_v36  ;;  %v4019_v12 = vadd.f32 %v4013_v58, %v3907_v62  ;;  %v4034_v24 = vmul.f32 %v4030_v29, %v4018_v27 }
 0x662   : > { %v11621_v32 = vmax.f32 %v4049_v4, 0.0  ;;  %4074 = vrot.lane.b32.xlu1 %v11619_v6, %s10704_s1  ;;  %v4035_v40 = vmul.f32 %v4030_v29, %v4019_v12  ;;  %v4050_v30 = vadd.f32 %v4046_v43, %v4034_v24  ;;  %v4087_v29 = vld [vmem:[#allocation10 + $0x10] sm:$0xff] }
 0x664   : > { %4078 = vrot.lane.b32.xlu0 %v11621_v32, %s10704_s1  ;;  %v4051_v31 = vadd.f32 %v4046_v43, %v4035_v40  ;;  %v11645_v34 = vmax.f32 %v4050_v30, 0.0 }
 0x666   : > { %4056 = vrot.lane.b32.xlu1 %v11619_v6, %s10705_s6  ;;  %v11649_v54 = vmax.f32 %v4051_v31, 0.0 }
 0x668   : > { %4060 = vrot.lane.b32.xlu0 %v11621_v32, %s10705_s6 }
 0x66a   : > { %4260 = vrot.lane.b32.xlu1 %v11619_v6, %s12616_s8 }
 0x66c   : > { %4264 = vrot.lane.b32.xlu0 %v11621_v32, %s12616_s8 }
 0x66e   : > { %4366 = vrot.lane.b32.xlu1 %v11619_v6, %s10707_s18 }
 0x670   : > { %4370 = vrot.lane.b32.xlu0 %v11621_v32, %s10707_s18 }
 0x672   : > { %4566 = vrot.lane.b32.xlu1 %v11619_v6, %s12614_s10 }
 0x674   : > { %4570 = vrot.lane.b32.xlu0 %v11621_v32, %s12614_s10 }
 0x676   : > { %4672 = vrot.lane.b32.xlu1 %v11619_v6, %s12612_s7 }
 0x678   : > { %4676 = vrot.lane.b32.xlu0 %v11621_v32, %s12612_s7 }
 0x67a   : > { %4076 = vrot.lane.b32.xlu1 %v11645_v34, %s10704_s1 }
 0x67c   : > { %4080 = vrot.lane.b32.xlu0 %v11649_v54, %s10704_s1 }
 0x67e   : > { %4058 = vrot.lane.b32.xlu1 %v11645_v34, %s10705_s6 }
 0x680   : > { %4062 = vrot.lane.b32.xlu0 %v11649_v54, %s10705_s6 }
 0x682   : > { %4262 = vrot.lane.b32.xlu1 %v11645_v34, %s12616_s8 }
 0x684   : > { %4266 = vrot.lane.b32.xlu0 %v11649_v54, %s12616_s8  ;;  %s10716_s8 = smov 124  }
 0x686   : > { %4778 = vrot.lane.b32.xlu1 %v11619_v6, %s12610_s26 }
 0x688   : > { %4782 = vrot.lane.b32.xlu0 %v11621_v32, %s12610_s26 }
 0x68a   : > { %4368 = vrot.lane.b32.xlu1 %v11645_v34, %s10707_s18 }
 0x68c   : > { %4372 = vrot.lane.b32.xlu0 %v11649_v54, %s10707_s18 }
 0x68e   : > { %4568 = vrot.lane.b32.xlu1 %v11645_v34, %s12614_s10 }
 0x690   : > { %4572 = vrot.lane.b32.xlu0 %v11649_v54, %s12614_s10 }
 0x692   : > { %4674 = vrot.lane.b32.xlu1 %v11645_v34, %s12612_s7 }
 0x694   : > { %4678 = vrot.lane.b32.xlu0 %v11649_v54, %s12612_s7  ;;  %s10714_s7 = smov 60  }
 0x696   : > { %4780 = vrot.lane.b32.xlu1 %v11645_v34, %s12610_s26 }
 0x698   : > { %4784 = vrot.lane.b32.xlu0 %v11649_v54, %s12610_s26 }
 0x69a   : > { %4886 = vrot.lane.b32.xlu1 %v11645_v34, %s12608_s15 }
 0x69c   : > { %4890 = vrot.lane.b32.xlu0 %v11649_v54, %s12608_s15 }
 0x69e   : > { %4884 = vrot.lane.b32.xlu1 %v11619_v6, %s12608_s15 }
 0x6a0   : > { %4888 = vrot.lane.b32.xlu0 %v11621_v32, %s12608_s15  ;;  %s1256_s15 = scalar_lea.vmem %s10880_s5, %s9830_s23  ;;  %s10712_s23 = smov 64  }
 0x6a2   : > { %4999 = vperm.xlu1 %10093, %v4991_v38  }
 0x6a4   : > { %4994 = vperm.xlu0 %10092, %v4990_v57   ;;  %v4088_v57 = vld [vmem:[#allocation10 + $0x18] sm:$0xff] }
 0x6a6   : > { %5015 = vperm.xlu1 %10093, %v5007_v42   ;;  %v4068_v42 = vld [vmem:[#allocation10] sm:$0xff] }
 0x6a8   : > { %5010 = vperm.xlu0 %10092, %v5006_v45  }
 0x6d4   : > { %v4075_v46 = vpop.permute.xlu1 %4074 }
 0x6d6   : > { %v4079_v48 = vpop.permute.xlu0 %4078 }
 0x6d7   : > { %v4082_v16 = vsel %vm3056_vm11, %v4075_v46, %v4079_v48  ;;  %v4084_v26 = vsel %vm3056_vm11, %v4079_v48, %v4075_v46 }
 0x6d8   : > { %v4057_v50 = vpop.permute.xlu1 %4056  ;;  %v4090_v55 = vmul.f32 %v4082_v16, %v11448_v51  ;;  %v4089_v15 = vmul.f32 %v4084_v26, %v11445_v23 }
 0x6da   : > { %v4061_v53 = vpop.permute.xlu0 %4060 }
 0x6db   : > { %v4064_v58 = vsel %vm3032_vm12, %v4057_v50, %v4061_v53  ;;  %v4066_v12 = vsel %vm3032_vm12, %v4061_v53, %v4057_v50 }
 0x6dc   : > { %v4261_v56 = vpop.permute.xlu1 %4260  ;;  %v4071_v43 = vmul.f32 %v4064_v58, %v11462_v61  ;;  %v4070_v30 = vmul.f32 %v4066_v12, %v11459_v60 }
 0x6de   : > { %v4265_v37 = vpop.permute.xlu0 %4264 }
 0x6df   : > { %v4268_v45 = vsel %vm3247_vm13, %v4261_v56, %v4265_v37 }
 0x6e0   : > { %v11693_v3 = vpop.permute.xlu1 %4366  ;;  %v4276_v53 = vmul.f32 %v4268_v45, %v11479_v17 }
 0x6e2   : > { %v11695_v36 = vpop.permute.xlu0 %4370 }
 0x6e4   : > { %v11697_v0 = vpop.permute.xlu1 %4566 }
 0x6e6   : > { %v11699_v28 = vpop.permute.xlu0 %4570 }
 0x6e8   : > { %v11701_v4 = vpop.permute.xlu1 %4672 }
 0x6ea   : > { %v11703_v8 = vpop.permute.xlu0 %4676 }
 0x6ec   : > { %v4077_v13 = vpop.permute.xlu1 %4076 }
 0x6ee   : > { %v4081_v33 = vpop.permute.xlu0 %4080 }
 0x6ef   : > { %v4083_v41 = vsel %vm3056_vm11, %v4077_v13, %v4081_v33  ;;  %v4085_v2 = vsel %vm3056_vm11, %v4081_v33, %v4077_v13  ;;  %v4069_v13 = vld [vmem:[#allocation10 + $0x8] sm:$0xff] }
 0x6f0   : > { %v4091_v44 = vmul.f32 %v4085_v2, %v11445_v23  ;;  %v4059_v5 = vpop.permute.xlu1 %4058  ;;  %v4092_v49 = vmul.f32 %v4083_v41, %v11448_v51  ;;  %v4374_v41 = vsel %vm3359_vm14, %v11693_v3, %v11695_v36  ;;  %v4476_v2 = vmul.f32 %v11621_v32, %v11486_v19  ;;  %v4274_v32 = vld [vmem:[#allocation10 + $0x28] sm:$0xff] }
 0x6f2   : > { %4128 = vmatprep.subr.mxu1 %v4092_v49  ;;  %v4063_v52 = vpop.permute.xlu0 %4062  ;;  %v4574_v49 = vsel %vm3576_vm15, %v11697_v0, %v11699_v28 }
 0x6f3   : > { %v4065_v62 = vsel %vm3032_vm12, %v4059_v5, %v4063_v52  ;;  %v4067_v27 = vsel %vm3032_vm12, %v4063_v52, %v4059_v5  ;;  %4129 = vmatpush1.msra.mxu1 %v4091_v44 }
 0x6f4   : > { %v4072_v24 = vmul.f32 %v4067_v27, %v11459_v60  ;;  %v4263_v51 = vpop.permute.xlu1 %4262  ;;  %4130 = vmatprep.subr.mxu1 %v4090_v55  ;;  %v4073_v23 = vmul.f32 %v4065_v62, %v11462_v61  ;;  %v4270_v61 = vsel %vm3247_vm13, %v4265_v37, %v4261_v56  ;;  %v4273_v56 = vld [vmem:[#allocation10 + $0x20] sm:$0xff]  ;;  %v4478_v37 = vmul.f32 %v11649_v54, %v11486_v19 }
 0x6f5   : > { %4131 = vmatpush1.msra.mxu1 %v4089_v15  ;;  %v4275_v33 = vmul.f32 %v4270_v61, %v11476_v7  ;;  %v4376_v54 = vsel %vm3359_vm14, %v11695_v36, %v11693_v3  ;;  %v4475_v19 = vmul.f32 %v11619_v6, %v11496_v22  ;;  %v4382_v55 = vmul.f32 %v4374_v41, %v11504_v25  ;;  %v4379_v15 = vld [vmem:[#allocation10 + $0x30] sm:$0xff]  ;;  %v4473_v27 = vld [vmem:[#allocation10 + $0x40] sm:$0xff] }
 0x6f6   : > { %9721 = vmatmul.mubr.msk.f32.vlgmr.msra.gmra.mxu1 %vm4093_vm8, %v4087_v29  ;;  %4211 = vmatprep.subr.mxu0 %v4073_v23  ;;  %v4267_v40 = vpop.permute.xlu0 %4266  ;;  %v4381_v36 = vmul.f32 %v4376_v54, %v11493_v21  ;;  %v4380_v23 = vld [vmem:[#allocation10 + $0x38] sm:$0xff]  ;;  %v4685_v61 = vld [vmem:[#allocation10 + $0x60] sm:$0xff] }
 0x6f7   : > { %v4269_v31 = vsel %vm3247_vm13, %v4263_v51, %v4267_v40  ;;  %v4271_v38 = vsel %vm3247_vm13, %v4267_v40, %v4263_v51  ;;  %4212 = vmatpush1.msra.mxu0 %v4072_v24  ;;  %4170 = vmatprep.mubr.f32.mxu1 %v10694_v1  ;;  %v4682_v24 = vsel %vm3688_vm2, %v11703_v8, %v11701_v4 }
 0x6f8   : > { %v4277_v46 = vmul.f32 %v4271_v38, %v11476_v7  ;;  %v11738_v48 = vpop.permute.xlu1 %4778  ;;  %4213 = vmatprep.subr.mxu0 %v4071_v43  ;;  %v4278_v60 = vmul.f32 %v4269_v31, %v11479_v17  ;;  %v4477_v7 = vmul.f32 %v11645_v34, %v11496_v22  ;;  %v4576_v22 = vsel %vm3576_vm15, %v11699_v28, %v11697_v0 }
 0x6f9   : > { %4214 = vmatpush1.msra.mxu0 %v4070_v30  ;;  %v4581_v0 = vmul.f32 %v4574_v49, %v11520_v35  ;;  %v4680_v28 = vsel %vm3688_vm2, %v11701_v4, %v11703_v8  ;;  %v4582_v12 = vmul.f32 %v4576_v22, %v11528_v39  ;;  %v4474_v4 = vld [vmem:[#allocation10 + $0x48] sm:$0xff]  ;;  %v4688_v31 = vmul.f32 %v4682_v24, %v11549_v20 }
 0x6fa   : > { %9722 = vmatmul.mubr.msk.f32.gmra.mxu1 %vm4093_vm8, %v4088_v57  ;;  %9723 = vmatmul.mubr.msk.f32.vlgmr.msra.gmra.mxu0 %vm4093_vm8, %v4068_v42  ;;  %v11745_v50 = vpop.permute.xlu0 %4782  ;;  %v4687_v8 = vmul.f32 %v4680_v28, %v11540_v47 }
 0x6fb   : > { %4313 = vmatprep.subr.mxu1 %v4278_v60  ;;  %4253 = vmatprep.mubr.f32.mxu0 %v10694_v1  ;;  %v4788_v38 = vsel %vm3800_vm6, %v11745_v50, %v11738_v48 }
 0x6fc   : > { %4314 = vmatpush1.msra.mxu1 %v4277_v46  ;;  %v4369_v16 = vpop.permute.xlu1 %4368  ;;  %4349 = vmatprep.mubr.f32.mxu1 %v10694_v1 }
 0x6fd   : > { %4315 = vmatprep.subr.mxu1 %v4276_v53 }
 0x6fe   : > { %4316 = vmatpush1.msra.mxu1 %v4275_v33  ;;  %9724 = vmatmul.mubr.msk.f32.gmra.mxu0 %vm4093_vm8, %v4069_v13  ;;  %v4373_v17 = vpop.permute.xlu0 %4372  ;;  %v4794_v13 = vmul.f32 %v4788_v38, %v11568_v63 }
 0x6ff   : > { %9725 = vmatmul.mubr.msk.f32.vlgmr.msra.gmra.mxu1 %vm4093_vm8, %v4273_v56  ;;  %v4375_v26 = vsel %vm3359_vm14, %v4369_v16, %v4373_v17  ;;  %v4377_v44 = vsel %vm3359_vm14, %v4373_v17, %v4369_v16  ;;  %4513 = vmatprep.subr.mxu1 %v4478_v37  ;;  %v4580_v16 = vld [vmem:[#allocation10 + $0x58] sm:$0xff] }
 0x700   : > { %v4383_v5 = vmul.f32 %v4377_v44, %v11493_v21  ;;  %4514 = vmatpush1.msra.mxu1 %v4477_v7  ;;  %v4569_v34 = vpop.permute.xlu1 %4568  ;;  %4355 = vmatprep.mubr.f32.mxu1 %v10694_v1  ;;  %v4384_v3 = vmul.f32 %v4375_v26, %v11504_v25  ;;  %v4897_v44 = vld [vmem:[#allocation10 + $0x80] sm:$0xff] }
 0x701   : > { %4515 = vmatprep.subr.mxu1 %v4476_v2  ;;  %4455 = vmatprep.mubr.f32.mxu0 %v10694_v1  ;;  %v4791_v2 = vld [vmem:[#allocation10 + $0x70] sm:$0xff] }
 0x702   : > { %4516 = vmatpush1.msra.mxu1 %v4475_v19  ;;  %4419 = vmatprep.subr.mxu0 %v4384_v3  ;;  %v4573_v52 = vpop.permute.xlu0 %4572 }
 0x703   : > { %9726 = vmatmul.mubr.msk.f32.gmra.mxu1 %vm4093_vm8, %v4274_v32  ;;  %v4575_v21 = vsel %vm3576_vm15, %v4569_v34, %v4573_v52  ;;  %v4577_v6 = vsel %vm3576_vm15, %v4573_v52, %v4569_v34  ;;  %4420 = vmatpush1.msra.mxu0 %v4383_v5  ;;  %v4792_v5 = vld [vmem:[#allocation10 + $0x78] sm:$0xff]  ;;  %v4898_v34 = vld [vmem:[#allocation10 + $0x88] sm:$0xff] }
 0x704   : > { %v4583_v58 = vmul.f32 %v4575_v21, %v11520_v35  ;;  %v4675_v62 = vpop.permute.xlu1 %4674  ;;  %4421 = vmatprep.subr.mxu0 %v4382_v55  ;;  %v4584_v25 = vmul.f32 %v4577_v6, %v11528_v39  ;;  %4549 = vmatprep.mubr.f32.mxu1 %v10694_v1 }
 0x705   : > { %4422 = vmatpush1.msra.mxu0 %v4381_v36 }
 0x706   : > { %9727 = vmatmul.mubr.msk.f32.vlgmr.msra.gmra.mxu0 %vm4093_vm8, %v4379_v15  ;;  %4619 = vmatprep.subr.mxu0 %v4584_v25  ;;  %v4679_v29 = vpop.permute.xlu0 %4678 }
 0x707   : > { %v4681_v51 = vsel %vm3688_vm2, %v4675_v62, %v4679_v29  ;;  %v4683_v35 = vsel %vm3688_vm2, %v4679_v29, %v4675_v62  ;;  %4620 = vmatpush1.msra.mxu0 %v4583_v58  ;;  %9729 = vmatmul.mubr.msk.f32.vlgmr.msra.gmra.mxu1 %vm4093_vm8, %v4473_v27 }
 0x708   : > { %v4689_v40 = vmul.f32 %v4681_v51, %v11540_v47  ;;  %v4781_v43 = vpop.permute.xlu1 %4780  ;;  %4621 = vmatprep.subr.mxu0 %v4582_v12  ;;  %4461 = vmatprep.mubr.f32.mxu0 %v10694_v1  ;;  %v4690_v39 = vmul.f32 %v4683_v35, %v11549_v20  ;;  %v4579_v47 = vld [vmem:[#allocation10 + $0x50] sm:$0xff]  ;;  %v4786_v20 = vsel %vm3800_vm6, %v11738_v48, %v11745_v50 }
 0x709   : > { %4622 = vmatpush1.msra.mxu0 %v4581_v0  ;;  %4555 = vmatprep.mubr.f32.mxu1 %v10694_v1  ;;  %v4793_v48 = vmul.f32 %v4786_v20, %v11560_v59 }
 0x70a   : > { %9728 = vmatmul.mubr.msk.f32.gmra.mxu0 %vm4093_vm8, %v4380_v23  ;;  %v4785_v30 = vpop.permute.xlu0 %4784  ;;  %4725 = vmatprep.subr.mxu1 %v4690_v39 }
 0x70b   : > { %v4787_v57 = vsel %vm3800_vm6, %v4781_v43, %v4785_v30  ;;  %v4789_v42 = vsel %vm3800_vm6, %v4785_v30, %v4781_v43  ;;  %4726 = vmatpush1.msra.mxu1 %v4689_v40  ;;  %4655 = vmatprep.mubr.f32.mxu0 %v10694_v1 }
 0x70c   : > { %v4795_v45 = vmul.f32 %v4787_v57, %v11560_v59  ;;  %v4887_v46 = vpop.permute.xlu1 %4886  ;;  %9730 = vmatmul.mubr.msk.f32.gmra.mxu1 %vm4093_vm8, %v4474_v4  ;;  %4727 = vmatprep.subr.mxu1 %v4688_v31  ;;  %v4796_v60 = vmul.f32 %v4789_v42, %v11568_v63  ;;  %v4686_v59 = vld [vmem:[#allocation10 + $0x68] sm:$0xff] }
 0x70d   : > { %4728 = vmatpush1.msra.mxu1 %v4687_v8  ;;  %4761 = vmatprep.mubr.f32.mxu1 %v10694_v1 }
 0x70e   : > { %9731 = vmatmul.mubr.msk.f32.vlgmr.msra.gmra.mxu0 %vm4093_vm8, %v4579_v47  ;;  %4831 = vmatprep.subr.mxu0 %v4796_v60  ;;  %v4891_v53 = vpop.permute.xlu0 %4890 }
 0x70f   : > { %v4893_v50 = vsel %vm3912_vm7, %v4887_v46, %v4891_v53  ;;  %v4895_v33 = vsel %vm3912_vm7, %v4891_v53, %v4887_v46  ;;  %4832 = vmatpush1.msra.mxu0 %v4795_v45  ;;  %4661 = vmatprep.mubr.f32.mxu0 %v10694_v1 }
 0x710   : > { %v4901_v56 = vmul.f32 %v4893_v50, %v11580_v18  ;;  %9733 = vmatmul.mubr.msk.f32.vlgmr.msra.gmra.mxu1 %vm4093_vm8, %v4685_v61  ;;  %4833 = vmatprep.subr.mxu0 %v4794_v13  ;;  %v4902_v37 = vmul.f32 %v4895_v33, %v11588_v14  ;;  %v4885_v63 = vpop.permute.xlu1 %4884 }
 0x711   : > { %4834 = vmatpush1.msra.mxu0 %v4793_v48  ;;  %4767 = vmatprep.mubr.f32.mxu1 %v10694_v1 }
 0x712   : > { %9732 = vmatmul.mubr.msk.f32.gmra.mxu0 %vm4093_vm8, %v4580_v16  ;;  %v4889_v41 = vpop.permute.xlu0 %4888  ;;  %4937 = vmatprep.subr.mxu1 %v4902_v37 }
 0x713   : > { %v4892_v17 = vsel %vm3912_vm7, %v4885_v63, %v4889_v41  ;;  %v4894_v7 = vsel %vm3912_vm7, %v4889_v41, %v4885_v63  ;;  %4938 = vmatpush1.msra.mxu1 %v4901_v56  ;;  %4867 = vmatprep.mubr.f32.mxu0 %v10694_v1 }
 0x714   : > { %v4899_v54 = vmul.f32 %v4892_v17, %v11580_v18  ;;  %v4900_v26 = vmul.f32 %v4894_v7, %v11588_v14  ;;  %9734 = vmatmul.mubr.msk.f32.gmra.mxu1 %vm4093_vm8, %v4686_v59 }
 0x715   : > { %4973 = vmatprep.mubr.f32.mxu1 %v10694_v1 }
 0x716   : > { %9735 = vmatmul.mubr.msk.f32.vlgmr.msra.gmra.mxu0 %vm4093_vm8, %v4791_v2  ;;  %4939 = vmatprep.subr.mxu1 %v4900_v26 }
 0x717   : > { %4940 = vmatpush1.msra.mxu1 %v4899_v54  ;;  %4873 = vmatprep.mubr.f32.mxu0 %v10694_v1 }
 0x718   : > { %9737 = vmatmul.mubr.msk.f32.vlgmr.msra.gmra.mxu1 %vm4093_vm8, %v4897_v44 }
 0x719   : > { %4979 = vmatprep.mubr.f32.mxu1 %v10694_v1 }
 0x71a   : > { %9736 = vmatmul.mubr.msk.f32.gmra.mxu0 %vm4093_vm8, %v4792_v5 }
 0x71b   : > { %5192 = vmatprep.mubr.f32.mxu0 %v10694_v1 }
 0x71c   : > { %9738 = vmatmul.mubr.msk.f32.gmra.mxu1 %vm4093_vm8, %v4898_v34 }
 0x71d   : > { %5266 = vmatprep.mubr.f32.mxu1 %v10694_v1  ;;  %v5000_v2 = vpop.permute.xlu1 %4999 }
 0x71f   : > { %v4995_v34 = vpop.permute.xlu0 %4994 }
 0x7b6   : > { %v4166_v18 = vpop.f32.mrf.mxu1 }
 0x7b8   : > { %v4168_v14 = vpop.f32.mrf.mxu1 }
 0x7ba   : > { %v4172_v19 = vpop.f32.mrf.mxu1  ;;  %v4249_v32 = vpop.f32.mrf.mxu0 }
 0x7bb   : > { %v4250_v58 = vadd.f32 %v4249_v32, %v4166_v18 }
 0x7bc   : > { %v4174_v3 = vpop.f32.mrf.mxu1  ;;  %v4251_v36 = vpop.f32.mrf.mxu0 }
 0x7bd   : > { %v4252_v27 = vadd.f32 %v4251_v36, %v4168_v14 }
 0x7be   : > { %v4255_v52 = vpop.f32.mrf.mxu0 }
 0x7bf   : > { %v4351_v49 = vpop.f32.mrf.mxu1  ;;  %v4256_v12 = vadd.f32 %v4255_v52, %v4172_v19 }
 0x7c0   : > { %v4257_v21 = vpop.f32.mrf.mxu0  ;;  %v4362_v0 = vadd.f32 %v4351_v49, %v4250_v58 }
 0x7c1   : > { %v4353_v55 = vpop.f32.mrf.mxu1  ;;  %v4258_v40 = vadd.f32 %v4257_v21, %v4174_v3 }
 0x7c2   : > { %v4363_v24 = vadd.f32 %v4353_v55, %v4252_v27  ;;  %v5011_v27 = vpop.permute.xlu0 %5010 }
 0x7c3   : > { %v4357_v22 = vpop.f32.mrf.mxu1 }
 0x7c4   : > { %v4364_v43 = vadd.f32 %v4357_v22, %v4256_v12 }
 0x7c5   : > { %v4359_v6 = vpop.f32.mrf.mxu1 }
 0x7c6   : > { %v4457_v15 = vpop.f32.mrf.mxu0  ;;  %v4365_v30 = vadd.f32 %v4359_v6, %v4258_v40 }
 0x7c7   : > { %v4551_v62 = vpop.f32.mrf.mxu1  ;;  %v4468_v51 = vadd.f32 %v4457_v15, %v4362_v0  ;;  %v5016_v15 = vpop.permute.xlu1 %5015 }
 0x7c8   : > { %v4459_v25 = vpop.f32.mrf.mxu0 }
 0x7c9   : > { %v4553_v28 = vpop.f32.mrf.mxu1  ;;  %v4469_v39 = vadd.f32 %v4459_v25, %v4363_v24  ;;  %v4562_v31 = vadd.f32 %v4551_v62, %v4468_v51 }
 0x7ca   : > { %v4463_v29 = vpop.f32.mrf.mxu0 }
 0x7cb   : > { %v4470_v38 = vadd.f32 %v4463_v29, %v4364_v43  ;;  %v4563_v47 = vadd.f32 %v4553_v28, %v4469_v39 }
 0x7cc   : > { %v4465_v35 = vpop.f32.mrf.mxu0  ;;  %v4557_v23 = vpop.f32.mrf.mxu1 }
 0x7cd   : > { %v4471_v20 = vadd.f32 %v4465_v35, %v4365_v30  ;;  %v4564_v61 = vadd.f32 %v4557_v23, %v4470_v38 }
 0x7ce   : > { %v4559_v4 = vpop.f32.mrf.mxu1  ;;  %v4657_v8 = vpop.f32.mrf.mxu0 }
 0x7cf   : > { %v4668_v45 = vadd.f32 %v4657_v8, %v4562_v31  ;;  %v4565_v50 = vadd.f32 %v4559_v4, %v4471_v20 }
 0x7d0   : > { %v4659_v57 = vpop.f32.mrf.mxu0  ;;  %v4763_v42 = vpop.f32.mrf.mxu1 }
 0x7d1   : > { %v4669_v53 = vadd.f32 %v4659_v57, %v4563_v47  ;;  %v4774_v33 = vadd.f32 %v4763_v42, %v4668_v45 }
 0x7d2   : > { %v4663_v46 = vpop.f32.mrf.mxu0  ;;  %v4765_v60 = vpop.f32.mrf.mxu1 }
 0x7d3   : > { %v4670_v16 = vadd.f32 %v4663_v46, %v4564_v61  ;;  %v4775_v59 = vadd.f32 %v4765_v60, %v4669_v53 }
 0x7d4   : > { %v4665_v13 = vpop.f32.mrf.mxu0  ;;  %v4769_v48 = vpop.f32.mrf.mxu1 }
 0x7d5   : > { %v4671_v63 = vadd.f32 %v4665_v13, %v4565_v50  ;;  %v4776_v54 = vadd.f32 %v4769_v48, %v4670_v16 }
 0x7d6   : > { %v4771_v56 = vpop.f32.mrf.mxu1  ;;  %v4869_v37 = vpop.f32.mrf.mxu0 }
 0x7d7   : > { %v4880_v41 = vadd.f32 %v4869_v37, %v4774_v33  ;;  %v4777_v18 = vadd.f32 %v4771_v56, %v4671_v63  ;;  %v5985_v37 = vld [vmem:[#allocation15] sm:$0xff] }
 0x7d8   : > { %v4871_v17 = vpop.f32.mrf.mxu0  ;;  %v4975_v7 = vpop.f32.mrf.mxu1 }
 0x7d9   : > { %v4881_v26 = vadd.f32 %v4871_v17, %v4775_v59  ;;  %v4986_v14 = vadd.f32 %v4975_v7, %v4880_v41 }
 0x7da   : > { %v4875_v44 = vpop.f32.mrf.mxu0  ;;  %v4977_v5 = vpop.f32.mrf.mxu1 }
 0x7db   : > { %v4882_v19 = vadd.f32 %v4875_v44, %v4776_v54  ;;  %v4987_v36 = vadd.f32 %v4977_v5, %v4881_v26  ;;  %v5002_v22 = vmul.f32 %v4995_v34, %v4986_v14  ;;  %v9740_v5 = vld [vmem:[%s12673_s11 + $0x26] sm:$0x3]  ;;  %v9739_v14 = vld [vmem:[%s12673_s11 + $0x24] sm:$0x3] }
 0x7dc   : > { %v4877_v32 = vpop.f32.mrf.mxu0  ;;  %v4981_v3 = vpop.f32.mrf.mxu1 }
 0x7dd   : > { %v4883_v49 = vadd.f32 %v4877_v32, %v4777_v18  ;;  %v4988_v52 = vadd.f32 %v4981_v3, %v4882_v19  ;;  %v5003_v58 = vmul.f32 %v4995_v34, %v4987_v36  ;;  %v5018_v0 = vadd.f32 %v5011_v27, %v5002_v22 }
 0x7de   : > { %v4983_v55 = vpop.f32.mrf.mxu1  ;;  %v11951_v34 = vrot.slane %v9740_v5, %v11146_v10  ;;  %v11954_v18 = vrot.slane %v9740_v5, %v11148_v11 }
 0x7df   : > { %v5004_v21 = vmul.f32 %v5000_v2, %v4988_v52  ;;  %v4989_v6 = vadd.f32 %v4983_v55, %v4883_v49  ;;  %v5019_v12 = vadd.f32 %v5011_v27, %v5003_v58  ;;  %v5022_v51 = vmax.f32 %v5018_v0, 0.0  ;;  %v9747_v0 = vld [vmem:[%s12673_s11 + $0x2c] sm:$0x3] }
 0x7e0   : > { %v11986_v58 = vrot.slane %v9739_v14, %v11148_v11 }
 0x7e1   : > { %v5005_v62 = vmul.f32 %v5000_v2, %v4989_v6  ;;  %v5020_v25 = vadd.f32 %v5016_v15, %v5004_v21  ;;  %v5023_v35 = vmax.f32 %v5019_v12, 0.0  ;;  %v11979_v21 = vrot.slane %v9739_v14, %v11146_v10 }
 0x7e3   : > { %v5024_v28 = vmax.f32 %v5020_v25, 0.0  ;;  %v5021_v29 = vadd.f32 %v5016_v15, %v5005_v62  ;;  %v9743_v62 = vld [vmem:[%s12673_s11 + $0x28] sm:$0x3] }
 0x7e5   : > { %5028 = vrot.lane.b32.xlu1 %v5024_v28, %s12614_s10  ;;  %v5025_v24 = vmax.f32 %v5021_v29, 0.0 }
 0x7e7   : > { %5032 = vrot.lane.b32.xlu0 %v5025_v24, %s12614_s10 }
 0x7e9   : > { %5026 = vrot.lane.b32.xlu1 %v5022_v51, %s12614_s10 }
 0x7eb   : > { %5030 = vrot.lane.b32.xlu0 %v5023_v35, %s12614_s10  ;;  %s12678_s10 = sld [smem:[#allocation50_spill]] }
 0x7f1   : > { %v5977_v59 = vld [vmem:[%s12678_s10] sm:$0xff]  ;;  %s12679_s10 = sld [smem:[#allocation52_spill]] }
 0x857   : > { %v5029_v23 = vpop.permute.xlu1 %5028 }
 0x859   : > { %v5033_v40 = vpop.permute.xlu0 %5032 }
 0x85a   : > { %v5035_v43 = vsel %vm3576_vm15, %v5029_v23, %v5033_v40  ;;  %v5037_v39 = vsel %vm3576_vm15, %v5033_v40, %v5029_v23  ;;  %v12012_v40 = vrot.slane %v9743_v62, %v11146_v10 }
 0x85b   : > { %v5040_v4 = vmax.f32 %v5024_v28, %v5035_v43  ;;  %v5041_v8 = vmax.f32 %v5025_v24, %v5037_v39  ;;  %v5027_v30 = vpop.permute.xlu1 %5026  ;;  %v12015_v43 = vrot.slane %v9743_v62, %v11148_v11  ;;  %v12018_v39 = vrot.slane %v9747_v0, %v11148_v11 }
 0x85d   : > { %5048 = vrot.lane.b32.xlu0 %v5041_v8, %s12610_s26  ;;  %5044 = vrot.lane.b32.xlu1 %v5040_v4, %s12610_s26  ;;  %v5031_v31 = vpop.permute.xlu0 %5030 }
 0x85e   : > { %v5034_v38 = vsel %vm3576_vm15, %v5027_v30, %v5031_v31  ;;  %v5036_v57 = vsel %vm3576_vm15, %v5031_v31, %v5027_v30  ;;  %v9745_v31 = vld [vmem:[%s12673_s11 + $0x2a] sm:$0x3] }
 0x85f   : > { %v5038_v42 = vmax.f32 %v5022_v51, %v5034_v38  ;;  %v5039_v47 = vmax.f32 %v5023_v35, %v5036_v57  ;;  %v5107_v51 = vld [vmem:[#allocation13 + $0x8] sm:$0xff] }
 0x861   : > { %5046 = vrot.lane.b32.xlu0 %v5039_v47, %s12610_s26  ;;  %5042 = vrot.lane.b32.xlu1 %v5038_v42, %s12610_s26  ;;  %s10713_s26 = smov 68  }
 0x8cf   : > { %v5045_v20 = vpop.permute.xlu1 %5044  ;;  %v5049_v45 = vpop.permute.xlu0 %5048 }
 0x8d0   : > { %v5051_v46 = vsel %vm3800_vm6, %v5045_v20, %v5049_v45  ;;  %v5053_v60 = vsel %vm3800_vm6, %v5049_v45, %v5045_v20  ;;  %v5075_v45 = vld [vmem:[#allocation13] sm:$0xff] }
 0x8d1   : > { %v11887_v61 = vmax.f32 %v5040_v4, %v5051_v46  ;;  %v11889_v53 = vmax.f32 %v5041_v8, %v5053_v60 }
 0x8d3   : > { %5060 = vst [vmem:[%s1256_s15 + $0x10] sm:$0xff] %v11887_v61  ;;  %5061 = vst [vmem:[%s1256_s15 + $0x18] sm:$0xff] %v11889_v53  ;;  %v5043_v13 = vpop.permute.xlu1 %5042  ;;  %v5047_v48 = vpop.permute.xlu0 %5046 }
 0x8d4   : > { %v5050_v50 = vsel %vm3800_vm6, %v5043_v13, %v5047_v48  ;;  %v5052_v33 = vsel %vm3800_vm6, %v5047_v48, %v5043_v13  ;;  %v12049_v13 = vrot.slane %v9745_v31, %v11146_v10  ;;  %v12052_v48 = vrot.slane %v9747_v0, %v11146_v10 }
 0x8d5   : > { %v11897_v16 = vmax.f32 %v5038_v42, %v5050_v50  ;;  %v11899_v56 = vmax.f32 %v5039_v47, %v5052_v33  ;;  %v5507_v50 = vmul.f32 %v12018_v39, %v11889_v53  ;;  %v9749_v33 = vld [vmem:[%s12673_s11 + $0x2e] sm:$0x3] }
 0x8d6   : > { %v5506_v62 = vmul.f32 %v12052_v48, %v11887_v61 }
 0x8d7   : > { %5058 = vst [vmem:[%s1256_s15] sm:$0xff] %v11897_v16  ;;  %5059 = vst [vmem:[%s1256_s15 + $0x8] sm:$0xff] %v11899_v56  ;;  %5097 = vrot.lane.b32.xlu0 %v11899_v56, %s10712_s23  ;;  %5093 = vrot.lane.b32.xlu1 %v11897_v16, %s10712_s23  ;;  %s10715_s15 = smov 4  }
 0x8db   : > { %5066 = vrot.lane.b32.xlu0 %v11899_v56, %s10713_s26  ;;  %5062 = vrot.lane.b32.xlu1 %v11897_v16, %s10713_s26 }
 0x8df   : > { %5277 = vrot.lane.b32.xlu0 %v11899_v56, %s10714_s7  ;;  %5273 = vrot.lane.b32.xlu1 %v11897_v16, %s10714_s7 }
 0x8e3   : > { %5385 = vrot.lane.b32.xlu0 %v11899_v56, %s10715_s15  ;;  %5381 = vrot.lane.b32.xlu1 %v11897_v16, %s10715_s15 }
 0x8e7   : > { %5099 = vrot.lane.b32.xlu0 %v11889_v53, %s10712_s23  ;;  %5095 = vrot.lane.b32.xlu1 %v11887_v61, %s10712_s23 }
 0x8eb   : > { %5068 = vrot.lane.b32.xlu0 %v11889_v53, %s10713_s26  ;;  %5064 = vrot.lane.b32.xlu1 %v11887_v61, %s10713_s26 }
 0x8ef   : > { %5279 = vrot.lane.b32.xlu0 %v11889_v53, %s10714_s7  ;;  %5275 = vrot.lane.b32.xlu1 %v11887_v61, %s10714_s7 }
 0x8f3   : > { %5387 = vrot.lane.b32.xlu0 %v11889_v53, %s10715_s15  ;;  %5383 = vrot.lane.b32.xlu1 %v11887_v61, %s10715_s15 }
 0x8f7   : > { %5590 = vrot.lane.b32.xlu0 %v11889_v53, %s10716_s8  ;;  %5586 = vrot.lane.b32.xlu1 %v11887_v61, %s10716_s8  ;;  %v5504_v61 = vmul.f32 %v12052_v48, %v11897_v16 }
 0x8fb   : > { %5588 = vrot.lane.b32.xlu0 %v11899_v56, %s10716_s8  ;;  %5584 = vrot.lane.b32.xlu1 %v11897_v16, %s10716_s8 }
 0x8ff   : > { %5988 = vperm.xlu0 %10092, %v5985_v37   ;;  %5980 = vperm.xlu1 %10093, %v5977_v59   ;;  %v9751_v37 = vld [vmem:[%s12673_s11 + $0x30] sm:$0x3] }
 0x949   : > { %v5098_v63 = vpop.permute.xlu0 %5097  ;;  %v5094_v41 = vpop.permute.xlu1 %5093 }
 0x94a   : > { %v11959_v3 = vsel %vm5101_vm9, %v5094_v41, %v5098_v63  ;;  %v11963_v36 = vsel %vm5101_vm9, %v5098_v63, %v5094_v41  ;;  %v12063_v41 = vrot.slane %v9745_v31, %v11148_v11  ;;  %v5395_v31 = vld [vmem:[#allocation13 + $0x18] sm:$0xff] }
 0x94b   : > { %v5121_v6 = vmul.f32 %v11951_v34, %v11963_v36  ;;  %v5122_v15 = vmul.f32 %v11954_v18, %v11959_v3 }
 0x94d   : > { %v5067_v17 = vpop.permute.xlu0 %5066  ;;  %v5063_v7 = vpop.permute.xlu1 %5062 }
 0x94e   : > { %v11993_v28 = vsel %vm5070_vm0, %v5063_v7, %v5067_v17  ;;  %v11997_v29 = vsel %vm5070_vm0, %v5067_v17, %v5063_v7 }
 0x94f   : > { %v5089_v4 = vmul.f32 %v11979_v21, %v11997_v29  ;;  %v5090_v8 = vmul.f32 %v11986_v58, %v11993_v28 }
 0x951   : > { %v5278_v2 = vpop.permute.xlu0 %5277  ;;  %v5274_v54 = vpop.permute.xlu1 %5273 }
 0x952   : > { %v12026_v30 = vsel %vm5281_vm3, %v5274_v54, %v5278_v2  ;;  %v12032_v42 = vsel %vm5281_vm3, %v5278_v2, %v5274_v54 }
 0x953   : > { %v5301_v59 = vmul.f32 %v12012_v40, %v12032_v42  ;;  %v5302_v63 = vmul.f32 %v12015_v43, %v12026_v30 }
 0x955   : > { %v11944_v26 = vpop.permute.xlu0 %5385  ;;  %v11946_v44 = vpop.permute.xlu1 %5381 }
 0x956   : > { %v5390_v53 = vsel %vm5389_vm4, %v11946_v44, %v11944_v26  ;;  %v5392_v5 = vsel %vm5389_vm4, %v11944_v26, %v11946_v44 }
 0x957   : > { %v5409_v0 = vmul.f32 %v12049_v13, %v5392_v5 }
 0x959   : > { %v5100_v19 = vpop.permute.xlu0 %5099  ;;  %v5096_v32 = vpop.permute.xlu1 %5095 }
 0x95a   : > { %v11967_v49 = vsel %vm5101_vm9, %v5096_v32, %v5100_v19  ;;  %v11971_v52 = vsel %vm5101_vm9, %v5100_v19, %v5096_v32  ;;  %v12083_v32 = vrot.slane %v9749_v33, %v11148_v11 }
 0x95b   : > { %v5123_v55 = vmul.f32 %v11951_v34, %v11971_v52  ;;  %v5124_v22 = vmul.f32 %v11954_v18, %v11967_v49 }
 0x95d   : > { %v5069_v25 = vpop.permute.xlu0 %5068  ;;  %5156 = vmatprep.subr.mxu0 %v5124_v22  ;;  %v5065_v27 = vpop.permute.xlu1 %5064  ;;  %v12086_v22 = vrot.slane %v9751_v37, %v11148_v11 }
 0x95e   : > { %v12001_v12 = vsel %vm5070_vm0, %v5065_v27, %v5069_v25  ;;  %v12005_v24 = vsel %vm5070_vm0, %v5069_v25, %v5065_v27  ;;  %5157 = vmatpush1.msra.mxu0 %v5123_v55  ;;  %v5287_v55 = vld [vmem:[#allocation13 + $0x10] sm:$0xff]  ;;  %v5505_v25 = vmul.f32 %v12018_v39, %v11899_v56  ;;  %v9755_v27 = vld [vmem:[%s12673_s11 + $0x34] sm:$0x3]  ;;  %v12107_v56 = vrot.slane %v9751_v37, %v11146_v10 }
 0x95f   : > { %v5091_v35 = vmul.f32 %v11979_v21, %v12005_v24  ;;  %v5092_v23 = vmul.f32 %v11986_v58, %v12001_v12  ;;  %5158 = vmatprep.subr.mxu0 %v5122_v15  ;;  %v5410_v15 = vmul.f32 %v12063_v41, %v5390_v53  ;;  %v5598_v53 = vld [vmem:[#allocation13 + $0x28] sm:$0xff] }
 0x960   : > { %5159 = vmatpush1.msra.mxu0 %v5121_v6  ;;  %v12089_v6 = vrot.slane %v9749_v33, %v11146_v10  ;;  %v5708_v33 = vmul.f32 %v12086_v22, %v11997_v29  ;;  %v5693_v29 = vld [vmem:[#allocation13 + $0x30] sm:$0xff] }
 0x961   : > { %v5280_v38 = vpop.permute.xlu0 %5279  ;;  %5230 = vmatprep.subr.mxu1 %v5092_v23  ;;  %v5276_v57 = vpop.permute.xlu1 %5275  ;;  %9741 = vmatmul.mubr.msk.f32.vlgmr.msra.gmra.mxu0 %vm4093_vm8, %v5107_v51 }
 0x962   : > { %v12036_v47 = vsel %vm5281_vm3, %v5276_v57, %v5280_v38  ;;  %v12040_v20 = vsel %vm5281_vm3, %v5280_v38, %v5276_v57  ;;  %5231 = vmatpush1.msra.mxu1 %v5091_v35  ;;  %5372 = vmatprep.mubr.f32.mxu0 %v10694_v1  ;;  %v5490_v38 = vld [vmem:[#allocation13 + $0x20] sm:$0xff]  ;;  %v12113_v57 = vrot.slane %v9755_v27, %v11148_v11 }
 0x963   : > { %v5303_v46 = vmul.f32 %v12012_v40, %v12040_v20  ;;  %v5304_v60 = vmul.f32 %v12015_v43, %v12036_v47  ;;  %5232 = vmatprep.subr.mxu1 %v5090_v8 }
 0x964   : > { %5233 = vmatpush1.msra.mxu1 %v5089_v4  ;;  %v5710_v4 = vmul.f32 %v12086_v22, %v12005_v24 }
 0x965   : > { %v5388_v17 = vpop.permute.xlu0 %5387  ;;  %5336 = vmatprep.subr.mxu0 %v5304_v60  ;;  %v5384_v7 = vpop.permute.xlu1 %5383  ;;  %9742 = vmatmul.mubr.msk.f32.vlgmr.msra.gmra.mxu1 %vm4093_vm8, %v5075_v45 }
 0x966   : > { %v5391_v2 = vsel %vm5389_vm4, %v5384_v7, %v5388_v17  ;;  %v5393_v54 = vsel %vm5389_vm4, %v5388_v17, %v5384_v7  ;;  %5337 = vmatpush1.msra.mxu0 %v5303_v46  ;;  %5480 = vmatprep.mubr.f32.mxu1 %v10694_v1  ;;  %v5709_v46 = vmul.f32 %v12107_v56, %v12001_v12 }
 0x967   : > { %v5411_v14 = vmul.f32 %v12049_v13, %v5393_v54  ;;  %v5412_v19 = vmul.f32 %v12063_v41, %v5391_v2  ;;  %5338 = vmatprep.subr.mxu0 %v5302_v63  ;;  %v5707_v12 = vmul.f32 %v12107_v56, %v11993_v28  ;;  %v12132_v63 = vrot.slane %v9755_v27, %v11146_v10 }
 0x968   : > { %5339 = vmatpush1.msra.mxu0 %v5301_v59  ;;  %v5900_v17 = vmul.f32 %v12113_v57, %v12040_v20  ;;  %v5898_v20 = vmul.f32 %v12113_v57, %v12032_v42  ;;  %v5788_v42 = vld [vmem:[#allocation13 + $0x38] sm:$0xff] }
 0x969   : > { %v5591_v26 = vpop.permute.xlu0 %5590  ;;  %5444 = vmatprep.subr.mxu1 %v5412_v19  ;;  %5539 = vmatprep.subr.mxu0 %v5507_v50  ;;  %v5587_v44 = vpop.permute.xlu1 %5586  ;;  %v9753_v50 = vld [vmem:[%s12673_s11 + $0x32] sm:$0x3]  ;;  %v5899_v2 = vmul.f32 %v12132_v63, %v12036_v47  ;;  %v5897_v5 = vmul.f32 %v12132_v63, %v12026_v30  ;;  %v5883_v19 = vld [vmem:[#allocation13 + $0x40] sm:$0xff] }
 0x96a   : > { %v5594_v51 = vsel %vm5592_vm5, %v5587_v44, %v5591_v26  ;;  %v5596_v35 = vsel %vm5592_vm5, %v5591_v26, %v5587_v44  ;;  %9744 = vmatmul.mubr.msk.f32.vlgmr.msra.gmra.mxu0 %vm4093_vm8, %v5287_v55  ;;  %5445 = vmatpush1.msra.mxu1 %v5411_v14  ;;  %v12137_v7 = vrot.slane %v9753_v50, %v11148_v11 }
 0x96b   : > { %v5615_v23 = vmul.f32 %v12083_v32, %v5596_v35  ;;  %5540 = vmatpush1.msra.mxu0 %v5506_v62  ;;  %5446 = vmatprep.subr.mxu1 %v5410_v15  ;;  %v5614_v8 = vmul.f32 %v12089_v6, %v5594_v51  ;;  %v12141_v28 = vrot.slane %v9753_v50, %v11146_v10 }
 0x96c   : > { %5541 = vmatprep.subr.mxu0 %v5505_v25  ;;  %5447 = vmatpush1.msra.mxu1 %v5409_v0  ;;  %v5805_v54 = vmul.f32 %v12137_v7, %v11971_v52  ;;  %v5803_v47 = vmul.f32 %v12137_v7, %v11963_v36 }
 0x96d   : > { %5542 = vmatpush1.msra.mxu0 %v5504_v61  ;;  %v5589_v45 = vpop.permute.xlu0 %5588  ;;  %5575 = vmatprep.mubr.f32.mxu0 %v10694_v1  ;;  %v5585_v16 = vpop.permute.xlu1 %5584  ;;  %v5804_v14 = vmul.f32 %v12141_v28, %v11967_v49  ;;  %v5802_v52 = vmul.f32 %v12141_v28, %v11959_v3 }
 0x96e   : > { %5647 = vmatprep.subr.mxu1 %v5615_v23  ;;  %v5593_v24 = vsel %vm5592_vm5, %v5585_v16, %v5589_v45  ;;  %v5595_v60 = vsel %vm5592_vm5, %v5589_v45, %v5585_v16  ;;  %5742 = vmatprep.subr.mxu0 %v5710_v4 }
 0x96f   : > { %v5612_v37 = vmul.f32 %v12089_v6, %v5593_v24  ;;  %v5613_v59 = vmul.f32 %v12083_v32, %v5595_v60  ;;  %9746 = vmatmul.mubr.msk.f32.vlgmr.msra.gmra.mxu1 %vm4093_vm8, %v5395_v31  ;;  %9748 = vmatmul.mubr.msk.f32.vlgmr.msra.gmra.mxu0 %vm4093_vm8, %v5490_v38 }
 0x970   : > { %5648 = vmatpush1.msra.mxu1 %v5614_v8  ;;  %5743 = vmatpush1.msra.mxu0 %v5709_v46 }
 0x971   : > { %5744 = vmatprep.subr.mxu0 %v5708_v33  ;;  %5649 = vmatprep.subr.mxu1 %v5613_v59 }
 0x972   : > { %5745 = vmatpush1.msra.mxu0 %v5707_v12  ;;  %5778 = vmatprep.mubr.f32.mxu0 %v10694_v1 }
 0x973   : > { %5932 = vmatprep.subr.mxu0 %v5900_v17  ;;  %5650 = vmatpush1.msra.mxu1 %v5612_v37 }
 0x974   : > { %5683 = vmatprep.mubr.f32.mxu1 %v10694_v1  ;;  %9752 = vmatmul.mubr.msk.f32.vlgmr.msra.gmra.mxu0 %vm4093_vm8, %v5693_v29 }
 0x975   : > { %5933 = vmatpush1.msra.mxu0 %v5899_v2  ;;  %9750 = vmatmul.mubr.msk.f32.vlgmr.msra.gmra.mxu1 %vm4093_vm8, %v5598_v53 }
 0x976   : > { %5837 = vmatprep.subr.mxu1 %v5805_v54  ;;  %5934 = vmatprep.subr.mxu0 %v5898_v20 }
 0x977   : > { %5838 = vmatpush1.msra.mxu1 %v5804_v14  ;;  %5935 = vmatpush1.msra.mxu0 %v5897_v5 }
 0x978   : > { %5839 = vmatprep.subr.mxu1 %v5803_v47  ;;  %5873 = vmatprep.mubr.f32.mxu1 %v10694_v1 }
 0x979   : > { %5840 = vmatpush1.msra.mxu1 %v5802_v52  ;;  %5968 = vmatprep.mubr.f32.mxu0 %v10694_v1 }
 0x97a   : > { %9754 = vmatmul.mubr.msk.f32.vlgmr.msra.gmra.mxu1 %vm4093_vm8, %v5788_v42  ;;  %9756 = vmatmul.mubr.msk.f32.vlgmr.msra.gmra.mxu0 %vm4093_vm8, %v5883_v19  ;;  %v5981_v53 = vpop.permute.xlu1 %5980  ;;  %v5989_v5 = vpop.permute.xlu0 %5988 }
 0x97b   : > { %6081 = vmatprep.mubr.f32.mxu1 %v10694_v1  ;;  %6155 = vmatprep.mubr.f32.mxu0 %v10694_v1 }
 0xa21   : > { %v5194_v36 = vpop.f32.mrf.mxu0 }
 0xa23   : > { %v5196_v49 = vpop.f32.mrf.mxu0 }
 0xa25   : > { %v5268_v3 = vpop.f32.mrf.mxu1 }
 0xa26   : > { %v5269_v30 = vadd.f32 %v5268_v3, %v5194_v36  ;;  %v6740_v36 = vld [vmem:[%s12679_s10] sm:$0xff]  ;;  %s12685_s10 = smov 94  }
 0xa27   : > { %v5270_v55 = vpop.f32.mrf.mxu1  ;;  %v6748_v3 = vld [vmem:[#allocation18] sm:$0xff] }
 0xa28   : > { %v5271_v26 = vadd.f32 %v5270_v55, %v5196_v49 }
 0xa2a   : > { %v5374_v15 = vpop.f32.mrf.mxu0 }
 0xa2b   : > { %v5379_v44 = vadd.f32 %v5374_v15, %v5269_v30 }
 0xa2c   : > { %v5376_v62 = vpop.f32.mrf.mxu0 }
 0xa2d   : > { %v5380_v0 = vadd.f32 %v5376_v62, %v5271_v26 }
 0xa2f   : > { %v5482_v25 = vpop.f32.mrf.mxu1  ;;  %v5577_v27 = vpop.f32.mrf.mxu0 }
 0xa30   : > { %v5487_v51 = vadd.f32 %v5482_v25, %v5379_v44  ;;  %v6011_v25 = vld [vmem:[#allocation16 + $0x8] sm:$0xff] }
 0xa31   : > { %v5484_v35 = vpop.f32.mrf.mxu1  ;;  %v5579_v23 = vpop.f32.mrf.mxu0 }
 0xa32   : > { %v5488_v61 = vadd.f32 %v5484_v35, %v5380_v0  ;;  %v5582_v4 = vadd.f32 %v5577_v27, %v5487_v51 }
 0xa34   : > { %v5780_v8 = vpop.f32.mrf.mxu0  ;;  %v5583_v38 = vadd.f32 %v5579_v23, %v5488_v61 }
 0xa35   : > { %v5685_v31 = vpop.f32.mrf.mxu1 }
 0xa36   : > { %v5690_v45 = vadd.f32 %v5685_v31, %v5582_v4  ;;  %v5782_v16 = vpop.f32.mrf.mxu0 }
 0xa37   : > { %v5687_v46 = vpop.f32.mrf.mxu1 }
 0xa38   : > { %v5691_v24 = vadd.f32 %v5687_v46, %v5583_v38  ;;  %v5785_v60 = vadd.f32 %v5780_v8, %v5690_v45  ;;  %v6169_v38 = vld [vmem:[#allocation16 + $0x10] sm:$0xff] }
 0xa3a   : > { %v5786_v50 = vadd.f32 %v5782_v16, %v5691_v24  ;;  %v5875_v33 = vpop.f32.mrf.mxu1  ;;  %v5970_v37 = vpop.f32.mrf.mxu0 }
 0xa3b   : > { %v5880_v59 = vadd.f32 %v5875_v33, %v5785_v60  ;;  %v6335_v33 = vld [vmem:[#allocation16 + $0x20] sm:$0xff] }
 0xa3c   : > { %v5877_v12 = vpop.f32.mrf.mxu1  ;;  %v5972_v2 = vpop.f32.mrf.mxu0 }
 0xa3d   : > { %v5881_v17 = vadd.f32 %v5877_v12, %v5786_v50  ;;  %v5975_v29 = vadd.f32 %v5970_v37, %v5880_v59 }
 0xa3f   : > { %v5983_v20 = vmul.f32 %v5981_v53, %v5975_v29  ;;  %v5976_v54 = vadd.f32 %v5972_v2, %v5881_v17  ;;  %v6501_v29 = vld [vmem:[#allocation16 + $0x30] sm:$0xff] }
 0xa41   : > { %v5991_v14 = vadd.f32 %v5989_v5, %v5983_v20  ;;  %v5984_v47 = vmul.f32 %v5981_v53, %v5976_v54 }
 0xa43   : > { %v5993_v52 = vmax.f32 %v5991_v14, 0.0  ;;  %v5992_v42 = vadd.f32 %v5989_v5, %v5984_v47 }
 0xa45   : > { %v5994_v19 = vmax.f32 %v5992_v42, 0.0  ;;  %6004 = vrot.lane.b32.xlu1 %v5993_v52, %s10712_s23 }
 0xa47   : > { %6006 = vrot.lane.b32.xlu0 %v5994_v19, %s10712_s23  ;;  %v6337_v16 = vmul.f32 %v5994_v19, %v12018_v39  ;;  %v6255_v39 = vld [vmem:[#allocation16 + $0x18] sm:$0xff]  ;;  %s12683_s23 = smov 98  }
 0xa49   : > { %5995 = vrot.lane.b32.xlu1 %v5993_v52, %s10713_s26 }
 0xa4b   : > { %5997 = vrot.lane.b32.xlu0 %v5994_v19, %s10713_s26  ;;  %s12682_s26 = smov 126  }
 0xa4d   : > { %6162 = vrot.lane.b32.xlu1 %v5993_v52, %s10714_s7 }
 0xa4f   : > { %6164 = vrot.lane.b32.xlu0 %v5994_v19, %s10714_s7  ;;  %s12681_s7 = smov 30  }
 0xa51   : > { %6248 = vrot.lane.b32.xlu1 %v5993_v52, %s10715_s15 }
 0xa53   : > { %6250 = vrot.lane.b32.xlu0 %v5994_v19, %s10715_s15  ;;  %s12684_s15 = smov 96  }
 0xa55   : > { %6414 = vrot.lane.b32.xlu1 %v5993_v52, %s10716_s8 }
 0xa57   : > { %6416 = vrot.lane.b32.xlu0 %v5994_v19, %s10716_s8  ;;  %s12680_s8 = sld [smem:[#allocation54_spill]] }
 0xa59   : > { %6743 = vperm.xlu1 %10093, %v6740_v36  }
 0xa5b   : > { %6751 = vperm.xlu0 %10092, %v6748_v3  }
 0xab7   : > { %v6005_v49 = vpop.permute.xlu1 %6004 }
 0xab9   : > { %v6007_v30 = vpop.permute.xlu0 %6006 }
 0xaba   : > { %v12179_v55 = vsel %vm5101_vm9, %v6005_v49, %v6007_v30  ;;  %v6009_v15 = vsel %vm5101_vm9, %v6007_v30, %v6005_v49  ;;  %vm12705_vm9 = vcmp.lt.s32.totalorder %v11144_v9, 16 }
 0xabb   : > { %v6012_v26 = vmul.f32 %v6009_v15, %v11951_v34  ;;  %v6013_v44 = vmul.f32 %v12179_v55, %v11954_v18  ;;  %v5996_v62 = vpop.permute.xlu1 %5995  ;;  %v6001_v34 = vld [vmem:[#allocation16] sm:$0xff]  ;;  %v6583_v53 = vmul.f32 %v6009_v15, %v12137_v7 }
 0xabd   : > { %6047 = vmatprep.subr.mxu1 %v6013_v44  ;;  %v5998_v27 = vpop.permute.xlu0 %5997 }
 0xabe   : > { %v5999_v0 = vsel %vm5070_vm0, %v5996_v62, %v5998_v27  ;;  %v6000_v51 = vsel %vm5070_vm0, %v5998_v27, %v5996_v62  ;;  %6048 = vmatpush1.msra.mxu1 %v6012_v26  ;;  %vm12687_vm0 = vcmask 31744  }
 0xabf   : > { %v6002_v35 = vmul.f32 %v6000_v51, %v11979_v21  ;;  %v6003_v23 = vmul.f32 %v5999_v0, %v11986_v58  ;;  %v6163_v61 = vpop.permute.xlu1 %6162  ;;  %9757 = vmatmul.mubr.msk.f32.vlgmr.msra.gmra.mxu1 %vm2247_vm10, %v6011_v25 }
 0xac0   : > { %6239 = vmatprep.mubr.f32.mxu1 %v10694_v1 }
 0xac1   : > { %6121 = vmatprep.subr.mxu0 %v6003_v23  ;;  %v6165_v18 = vpop.permute.xlu0 %6164 }
 0xac2   : > { %v6166_v4 = vsel %vm5281_vm3, %v6163_v61, %v6165_v18  ;;  %v6167_v8 = vsel %vm5281_vm3, %v6165_v18, %v6163_v61  ;;  %6122 = vmatpush1.msra.mxu0 %v6002_v35  ;;  %vm12688_vm3 = vmmov %vm12687_vm0 }
 0xac3   : > { %v6170_v31 = vmul.f32 %v6167_v8, %v12012_v40  ;;  %v6171_v21 = vmul.f32 %v6166_v4, %v12015_v43  ;;  %v6249_v58 = vpop.permute.xlu1 %6248  ;;  %9758 = vmatmul.mubr.msk.f32.vlgmr.msra.gmra.mxu0 %vm2247_vm10, %v6001_v34  ;;  %v6336_v40 = vmul.f32 %v5993_v52, %v12052_v48  ;;  %v6503_v43 = vmul.f32 %v6000_v51, %v12086_v22 }
 0xac4   : > { %6325 = vmatprep.mubr.f32.mxu0 %v10694_v1  ;;  %v6502_v48 = vmul.f32 %v5999_v0, %v12107_v56  ;;  %v6421_v56 = vld [vmem:[#allocation16 + $0x28] sm:$0xff]  ;;  %v6662_v2 = vmul.f32 %v6166_v4, %v12132_v63 }
 0xac5   : > { %6205 = vmatprep.subr.mxu1 %v6171_v21  ;;  %v6251_v45 = vpop.permute.xlu0 %6250 }
 0xac6   : > { %v6252_v46 = vsel %vm5389_vm4, %v6249_v58, %v6251_v45  ;;  %v6253_v24 = vsel %vm5389_vm4, %v6251_v45, %v6249_v58  ;;  %6206 = vmatpush1.msra.mxu1 %v6170_v31  ;;  %vm12689_vm4 = vmmov %vm12687_vm0 }
 0xac7   : > { %v6256_v60 = vmul.f32 %v6253_v24, %v12049_v13  ;;  %v6257_v50 = vmul.f32 %v6252_v46, %v12063_v41  ;;  %9759 = vmatmul.mubr.msk.f32.vlgmr.msra.gmra.mxu1 %vm2247_vm10, %v6169_v38  ;;  %6371 = vmatprep.subr.mxu1 %v6337_v16  ;;  %v6415_v37 = vpop.permute.xlu1 %6414  ;;  %v6663_v41 = vmul.f32 %v6167_v8, %v12113_v57  ;;  %v6661_v57 = vld [vmem:[#allocation16 + $0x40] sm:$0xff] }
 0xac8   : > { %6372 = vmatpush1.msra.mxu1 %v6336_v40  ;;  %6405 = vmatprep.mubr.f32.mxu1 %v10694_v1 }
 0xac9   : > { %6291 = vmatprep.subr.mxu0 %v6257_v50  ;;  %v6417_v59 = vpop.permute.xlu0 %6416  ;;  %6537 = vmatprep.subr.mxu1 %v6503_v43  ;;  %v6758_v50 = vld [vmem:[#allocation19] sm:$0xff] }
 0xaca   : > { %v6418_v22 = vsel %vm5592_vm5, %v6415_v37, %v6417_v59  ;;  %v6419_v13 = vsel %vm5592_vm5, %v6417_v59, %v6415_v37  ;;  %6292 = vmatpush1.msra.mxu0 %v6256_v60  ;;  %v7046_v37 = vld [vmem:[#allocation19 + $0x18] sm:$0xff]  ;;  %vm12690_vm5 = vmmov %vm12687_vm0 }
 0xacb   : > { %v6422_v12 = vmul.f32 %v6418_v22, %v12089_v6  ;;  %v6423_v17 = vmul.f32 %v6419_v13, %v12083_v32  ;;  %9760 = vmatmul.mubr.msk.f32.vlgmr.msra.gmra.mxu0 %vm2247_vm10, %v6255_v39  ;;  %9761 = vmatmul.mubr.msk.f32.vlgmr.msra.gmra.mxu1 %vm2247_vm10, %v6335_v33  ;;  %v6582_v32 = vmul.f32 %v12179_v55, %v12141_v28  ;;  %v6581_v6 = vld [vmem:[#allocation16 + $0x38] sm:$0xff]  ;;  %v6947_v33 = vld [vmem:[#allocation19 + $0x10] sm:$0xff] }
 0xacc   : > { %6538 = vmatpush1.msra.mxu1 %v6502_v48  ;;  %6491 = vmatprep.mubr.f32.mxu0 %v10694_v1  ;;  %v6848_v39 = vld [vmem:[#allocation19 + $0x8] sm:$0xff] }
 0xacd   : > { %6697 = vmatprep.subr.mxu1 %v6663_v41  ;;  %6457 = vmatprep.subr.mxu0 %v6423_v17 }
 0xace   : > { %6458 = vmatpush1.msra.mxu0 %v6422_v12  ;;  %6571 = vmatprep.mubr.f32.mxu1 %v10694_v1 }
 0xacf   : > { %9762 = vmatmul.mubr.msk.f32.vlgmr.msra.gmra.mxu0 %vm2247_vm10, %v6421_v56  ;;  %9763 = vmatmul.mubr.msk.f32.vlgmr.msra.gmra.mxu1 %vm2247_vm10, %v6501_v29  ;;  %v7144_v29 = vld [vmem:[#allocation21] sm:$0xff] }
 0xad0   : > { %6617 = vmatprep.subr.mxu0 %v6583_v53  ;;  %6698 = vmatpush1.msra.mxu1 %v6662_v2 }
 0xad1   : > { %6618 = vmatpush1.msra.mxu0 %v6582_v32  ;;  %6651 = vmatprep.mubr.f32.mxu0 %v10694_v1  ;;  %v6930_v32 = vld [vmem:[#allocation2 + $0x2] sm:$0x3] }
 0xad2   : > { %6731 = vmatprep.mubr.f32.mxu1 %v10694_v1 }
 0xad3   : > { %9764 = vmatmul.mubr.msk.f32.vlgmr.msra.gmra.mxu0 %vm2247_vm10, %v6581_v6  ;;  %9765 = vmatmul.mubr.msk.f32.vlgmr.msra.gmra.mxu1 %vm2247_vm10, %v6661_v57 }
 0xad4   : > { %6826 = vmatprep.mubr.f32.mxu0 %v10694_v1  ;;  %6916 = vmatprep.mubr.f32.mxu1 %v10694_v1  ;;  %v6744_v21 = vpop.permute.xlu1 %6743 }
 0xad6   : > { %v6752_v16 = vpop.permute.xlu0 %6751 }
 0xb7f   : > { %v6083_v63 = vpop.f32.mrf.mxu1 }
 0xb81   : > { %v6085_v7 = vpop.f32.mrf.mxu1 }
 0xb83   : > { %v6157_v28 = vpop.f32.mrf.mxu0 }
 0xb84   : > { %v6158_v20 = vadd.f32 %v6157_v28, %v6083_v63  ;;  %v6833_v63 = vld [vmem:[#allocation2] sm:$0x3]  ;;  %v6935_v28 = vrot.slane %v6930_v32, %v11146_v10 }
 0xb85   : > { %v6159_v54 = vpop.f32.mrf.mxu0 }
 0xb86   : > { %v6160_v47 = vadd.f32 %v6159_v54, %v6085_v7  ;;  %v7029_v7 = vld [vmem:[#allocation2 + $0x4] sm:$0x3] }
 0xb87   : > { %v6241_v5 = vpop.f32.mrf.mxu1 }
 0xb88   : > { %v6246_v52 = vadd.f32 %v6241_v5, %v6158_v20  ;;  %v6939_v20 = vrot.slane %v6930_v32, %v11148_v11 }
 0xb89   : > { %v6243_v14 = vpop.f32.mrf.mxu1 }
 0xb8a   : > { %v6247_v36 = vadd.f32 %v6243_v14, %v6160_v47  ;;  %v7128_v14 = vld [vmem:[#allocation2 + $0x6] sm:$0x3]  ;;  %v6838_v47 = vrot.slane %v6833_v63, %v11146_v10 }
 0xb8b   : > { %v6327_v42 = vpop.f32.mrf.mxu0  ;;  %v6407_v19 = vpop.f32.mrf.mxu1 }
 0xb8c   : > { %v6332_v3 = vadd.f32 %v6327_v42, %v6246_v52  ;;  %v6842_v52 = vrot.slane %v6833_v63, %v11148_v11  ;;  %v7034_v42 = vrot.slane %v7029_v7, %v11146_v10 }
 0xb8d   : > { %v6329_v49 = vpop.f32.mrf.mxu0  ;;  %v6409_v30 = vpop.f32.mrf.mxu1 }
 0xb8e   : > { %v6333_v55 = vadd.f32 %v6329_v49, %v6247_v36  ;;  %v6412_v15 = vadd.f32 %v6407_v19, %v6332_v3  ;;  %v7038_v19 = vrot.slane %v7029_v7, %v11148_v11  ;;  %v9776_v7 = vld [vmem:[%s12673_s11 + $0x18] sm:$0x3] }
 0xb8f   : > { %v6493_v26 = vpop.f32.mrf.mxu0  ;;  %v6573_v44 = vpop.f32.mrf.mxu1 }
 0xb90   : > { %v6413_v62 = vadd.f32 %v6409_v30, %v6333_v55  ;;  %v6498_v25 = vadd.f32 %v6493_v26, %v6412_v15  ;;  %v7133_v26 = vrot.slane %v7128_v14, %v11146_v10 }
 0xb91   : > { %v6495_v27 = vpop.f32.mrf.mxu0  ;;  %v6575_v0 = vpop.f32.mrf.mxu1 }
 0xb92   : > { %v6499_v51 = vadd.f32 %v6495_v27, %v6413_v62  ;;  %v6578_v35 = vadd.f32 %v6573_v44, %v6498_v25  ;;  %v7137_v44 = vrot.slane %v7128_v14, %v11148_v11 }
 0xb93   : > { %v6653_v23 = vpop.f32.mrf.mxu0  ;;  %v6733_v61 = vpop.f32.mrf.mxu1 }
 0xb94   : > { %v6579_v34 = vadd.f32 %v6575_v0, %v6499_v51  ;;  %v6658_v18 = vadd.f32 %v6653_v23, %v6578_v35 }
 0xb95   : > { %v6655_v4 = vpop.f32.mrf.mxu0  ;;  %v6735_v58 = vpop.f32.mrf.mxu1 }
 0xb96   : > { %v6659_v8 = vadd.f32 %v6655_v4, %v6579_v34  ;;  %v6738_v31 = vadd.f32 %v6733_v61, %v6658_v18 }
 0xb98   : > { %v6746_v38 = vmul.f32 %v6744_v21, %v6738_v31  ;;  %v6739_v45 = vadd.f32 %v6735_v58, %v6659_v8 }
 0xb9a   : > { %v6747_v46 = vmul.f32 %v6744_v21, %v6739_v45  ;;  %v6754_v24 = vadd.f32 %v6752_v16, %v6746_v38 }
 0xb9c   : > { %v6755_v40 = vadd.f32 %v6752_v16, %v6747_v46  ;;  %v6756_v60 = vmax.f32 %v6754_v24, 0.0  ;;  %v8023_v16 = vld [vmem:[%s12680_s8] sm:$0xf]  ;;  %v8031_v46 = vld [vmem:[#allocation24] sm:$0xf]  ;;  %s12686_s8 = sld [smem:[#allocation56_spill]] }
 0xb9d   : > { %v9771_v24 = vld [vmem:[%s12673_s11 + $0x14] sm:$0x3] }
 0xb9e   : > { %v6757_v43 = vmax.f32 %v6755_v40, 0.0  ;;  %v12310_v40 = vrot.slane %v9771_v24, %v11146_v10 }
 0xba0   : > { %6792 = vmatprep.subr.mxu0 %v6757_v43  ;;  %6882 = vmatprep.subr.mxu1 %v6757_v43 }
 0xba1   : > { %6793 = vmatpush1.msra.mxu0 %v6756_v60  ;;  %6883 = vmatpush1.msra.mxu1 %v6756_v60 }
 0xba2   : > { %9766 = vmatmul.mubr.msk.f32.vlgmr.msra.gmra.mxu0 %vm2247_vm10, %v6758_v50  ;;  %9767 = vmatmul.mubr.msk.f32.vlgmr.msra.gmra.mxu1 %vm2247_vm10, %v6848_v39 }
 0xba3   : > { %6981 = vmatprep.subr.mxu0 %v6757_v43  ;;  %7080 = vmatprep.subr.mxu1 %v6757_v43  ;;  %v12313_v43 = vrot.slane %v9771_v24, %v11148_v11 }
 0xba4   : > { %6982 = vmatpush1.msra.mxu0 %v6756_v60  ;;  %7081 = vmatpush1.msra.mxu1 %v6756_v60  ;;  %v9770_v60 = vld [vmem:[%s12673_s11 + $0x12] sm:$0x3] }
 0xba5   : > { %7015 = vmatprep.mubr.f32.mxu0 %v10694_v1  ;;  %7114 = vmatprep.mubr.f32.mxu1 %v10694_v1 }
 0xba6   : > { %9768 = vmatmul.mubr.msk.f32.vlgmr.msra.gmra.mxu0 %vm2247_vm10, %v6947_v33  ;;  %9769 = vmatmul.mubr.msk.f32.vlgmr.msra.gmra.mxu1 %vm2247_vm10, %v7046_v37 }
 0xba7   : > { %7262 = vmatprep.mubr.f32.mxu0 %v10694_v1  ;;  %7336 = vmatprep.mubr.f32.mxu1 %v10694_v1 }
 0xc62   : > { %v6828_v59 = vpop.f32.mrf.mxu0  ;;  %v6918_v48 = vpop.f32.mrf.mxu1 }
 0xc63   : > { %6923 = vrot.lane.b32.xlu1 %v6918_v48, %s10707_s18  ;;  %v6845_v27 = vmul.f32 %v6838_v47, %v6828_v59 }
 0xc64   : > { %v6830_v22 = vpop.f32.mrf.mxu0  ;;  %v6920_v13 = vpop.f32.mrf.mxu1 }
 0xc65   : > { %6925 = vrot.lane.b32.xlu0 %v6920_v13, %s10707_s18  ;;  %v6846_v0 = vmul.f32 %v6842_v52, %v6830_v22  ;;  %v12323_v22 = vrot.slane %v9770_v60, %v11146_v10  ;;  %v12326_v13 = vrot.slane %v9770_v60, %v11148_v11 }
 0xc66   : > { %v7017_v41 = vpop.f32.mrf.mxu0  ;;  %v7116_v17 = vpop.f32.mrf.mxu1 }
 0xc67   : > { %7022 = vrot.lane.b32.xlu1 %v7017_v41, %s10704_s1  ;;  %v9774_v41 = vld [vmem:[%s12673_s11 + $0x16] sm:$0x3] }
 0xc68   : > { %v7019_v12 = vpop.f32.mrf.mxu0  ;;  %v7118_v56 = vpop.f32.mrf.mxu1  ;;  %v12340_v63 = vrot.slane %v9774_v41, %v11148_v11 }
 0xc69   : > { %7024 = vrot.lane.b32.xlu0 %v7019_v12, %s10704_s1  ;;  %v7180_v12 = vld [vmem:[#allocation22 + $0x4] sm:$0xf] }
 0xc6b   : > { %7121 = vrot.lane.b32.xlu1 %v7116_v17, %s10705_s6 }
 0xc6d   : > { %7123 = vrot.lane.b32.xlu0 %v7118_v56, %s10705_s6 }
 0xc6f   : > { %7147 = vperm.xlu1 %10093, %v7144_v29  }
 0xcd5   : > { %v6924_v53 = vpop.permute.xlu1 %6923 }
 0xcd7   : > { %v6926_v2 = vpop.permute.xlu0 %6925 }
 0xcd8   : > { %v6927_v54 = vsel %vm3359_vm14, %v6924_v53, %v6926_v2  ;;  %v6928_v5 = vsel %vm3359_vm14, %v6926_v2, %v6924_v53  ;;  %v9778_v2 = vld [vmem:[%s12673_s11 + $0x1a] sm:$0x3] }
 0xcd9   : > { %v7023_v6 = vpop.permute.xlu1 %7022  ;;  %v6942_v30 = vmul.f32 %v6935_v28, %v6928_v5  ;;  %v6943_v55 = vmul.f32 %v6939_v20, %v6927_v54  ;;  %v7158_v28 = vld [vmem:[#allocation22] sm:$0xf]  ;;  %v12346_v5 = vrot.slane %v9778_v2, %v11148_v11  ;;  %v12353_v52 = vrot.slane %v9778_v2, %v11146_v10 }
 0xcdb   : > { %v7025_v57 = vpop.permute.xlu0 %7024  ;;  %v6944_v23 = vadd.f32 %v6942_v30, %v6845_v27  ;;  %v6945_v61 = vadd.f32 %v6943_v55, %v6846_v0  ;;  %v7350_v30 = vld [vmem:[#allocation22 + $0x8] sm:$0xf] }
 0xcdc   : > { %v7026_v3 = vsel %vm3056_vm11, %v7023_v6, %v7025_v57  ;;  %v7027_v49 = vsel %vm3056_vm11, %v7025_v57, %v7023_v6  ;;  %v12337_v57 = vrot.slane %v9774_v41, %v11146_v10  ;;  %v9786_v41 = vld [vmem:[%s12673_s11 + $0x22] sm:$0x3] }
 0xcdd   : > { %v7122_v15 = vpop.permute.xlu1 %7121  ;;  %v7041_v51 = vmul.f32 %v7034_v42, %v7027_v49  ;;  %v7042_v35 = vmul.f32 %v7038_v19, %v7026_v3  ;;  %v12361_v3 = vrot.slane %v9776_v7, %v11148_v11  ;;  %v9780_v49 = vld [vmem:[%s12673_s11 + $0x1c] sm:$0x3] }
 0xcde   : > { %v12375_v27 = vrot.slane %v9780_v49, %v11146_v10 }
 0xcdf   : > { %v7124_v36 = vpop.permute.xlu0 %7123  ;;  %v7043_v4 = vadd.f32 %v7041_v51, %v6944_v23  ;;  %v7044_v8 = vadd.f32 %v7042_v35, %v6945_v61  ;;  %v12381_v35 = vrot.slane %v9780_v49, %v11148_v11  ;;  %v9782_v23 = vld [vmem:[%s12673_s11 + $0x1e] sm:$0x3]  ;;  %v7932_v49 = vld [vmem:[#allocation22 + $0x20] sm:$0xf] }
 0xce0   : > { %v7125_v62 = vsel %vm3032_vm12, %v7122_v15, %v7124_v36  ;;  %v7126_v25 = vsel %vm3032_vm12, %v7124_v36, %v7122_v15  ;;  %v12358_v36 = vrot.slane %v9776_v7, %v11146_v10  ;;  %v7448_v61 = vld [vmem:[#allocation22 + $0xc] sm:$0xf]  ;;  %v12427_v7 = vrot.slane %v9786_v41, %v11148_v11 }
 0xce1   : > { %v7140_v34 = vmul.f32 %v7133_v26, %v7126_v25  ;;  %v7141_v18 = vmul.f32 %v7137_v44, %v7125_v62 }
 0xce3   : > { %v7142_v31 = vadd.f32 %v7140_v34, %v7043_v4  ;;  %v7143_v21 = vadd.f32 %v7141_v18, %v7044_v8  ;;  %v7540_v34 = vld [vmem:[#allocation22 + $0x10] sm:$0xf] }
 0xcea   : > { %v7148_v58 = vpop.permute.xlu1 %7147 }
 0xceb   : > { %v12271_v38 = vadd.f32 %v7148_v58, %v7142_v31  ;;  %v12273_v45 = vadd.f32 %v7148_v58, %v7143_v21  ;;  %v12390_v21 = vrot.slane %v9782_v23, %v11146_v10 }
 0xced   : > { %7173 = vrot.lane.b32.xlu0 %v12271_v38, %s10704_s1  ;;  %7175 = vrot.lane.b32.xlu1 %v12273_v45, %s10704_s1  ;;  %v7554_v26 = vmul.f32 %v12346_v5, %v12273_v45  ;;  %v7553_v25 = vmul.f32 %v12353_v52, %v12271_v38 }
 0xcf1   : > { %7152 = vrot.lane.b32.xlu0 %v12271_v38, %s10705_s6  ;;  %7154 = vrot.lane.b32.xlu1 %v12273_v45, %s10705_s6 }
 0xcf5   : > { %7343 = vrot.lane.b32.xlu0 %v12271_v38, %s12681_s7  ;;  %7345 = vrot.lane.b32.xlu1 %v12273_v45, %s12681_s7 }
 0xcf9   : > { %7441 = vrot.lane.b32.xlu0 %v12271_v38, %s10707_s18  ;;  %7443 = vrot.lane.b32.xlu1 %v12273_v45, %s10707_s18 }
 0xcfd   : > { %7631 = vrot.lane.b32.xlu0 %v12271_v38, %s12682_s26  ;;  %7633 = vrot.lane.b32.xlu1 %v12273_v45, %s12682_s26 }
 0xd01   : > { %7729 = vrot.lane.b32.xlu0 %v12271_v38, %s12683_s23  ;;  %7731 = vrot.lane.b32.xlu1 %v12273_v45, %s12683_s23 }
 0xd05   : > { %7827 = vrot.lane.b32.xlu0 %v12271_v38, %s12684_s15  ;;  %7829 = vrot.lane.b32.xlu1 %v12273_v45, %s12684_s15 }
 0xd09   : > { %7925 = vrot.lane.b32.xlu0 %v12271_v38, %s12685_s10  ;;  %7927 = vrot.lane.b32.xlu1 %v12273_v45, %s12685_s10  ;;  %v12395_v45 = vrot.slane %v9782_v23, %v11148_v11 }
 0xd0d   : > { %8026 = vperm.xlu0 %10092, %v8023_v16   ;;  %8034 = vperm.xlu1 %10093, %v8031_v46   ;;  %v9784_v16 = vld [vmem:[%s12673_s11 + $0x20] sm:$0x3]  ;;  %v7638_v46 = vld [vmem:[#allocation22 + $0x14] sm:$0xf] }
 0xd5f   : > { %v7174_v50 = vpop.permute.xlu0 %7173  ;;  %v7176_v39 = vpop.permute.xlu1 %7175 }
 0xd60   : > { %v7177_v33 = vsel %vm3056_vm11, %v7174_v50, %v7176_v39  ;;  %v7178_v37 = vsel %vm3056_vm11, %v7176_v39, %v7174_v50 }
 0xd61   : > { %v7193_v59 = vmul.f32 %v12310_v40, %v7178_v37  ;;  %v7194_v48 = vmul.f32 %v12313_v43, %v7177_v33 }
 0xd63   : > { %v7153_v17 = vpop.permute.xlu0 %7152  ;;  %7228 = vmatprep.subr.mxu0 %v7194_v48  ;;  %v7155_v56 = vpop.permute.xlu1 %7154  ;;  %v12412_v48 = vrot.slane %v9784_v16, %v11148_v11 }
 0xd64   : > { %v7156_v29 = vsel %vm3032_vm12, %v7153_v17, %v7155_v56  ;;  %v7157_v53 = vsel %vm3032_vm12, %v7155_v56, %v7153_v17  ;;  %7229 = vmatpush1.msra.mxu0 %v7193_v59  ;;  %v12409_v59 = vrot.slane %v9784_v16, %v11146_v10 }
 0xd65   : > { %v7171_v32 = vmul.f32 %v12323_v22, %v7157_v53  ;;  %v7172_v6 = vmul.f32 %v12326_v13, %v7156_v29  ;;  %9772 = vmatmul.mubr.msk.f32.vlgmr.msra.gmra.mxu0 %vm2247_vm10, %v7180_v12  ;;  %v7736_v12 = vld [vmem:[#allocation22 + $0x18] sm:$0xf] }
 0xd66   : > { %7432 = vmatprep.mubr.f32.mxu0 %v10694_v1 }
 0xd67   : > { %v7344_v20 = vpop.permute.xlu0 %7343  ;;  %7302 = vmatprep.subr.mxu1 %v7172_v6  ;;  %v7346_v54 = vpop.permute.xlu1 %7345  ;;  %v12424_v6 = vrot.slane %v9786_v41, %v11146_v10 }
 0xd68   : > { %v7347_v14 = vsel %vm3247_vm13, %v7344_v20, %v7346_v54  ;;  %v7348_v47 = vsel %vm3247_vm13, %v7346_v54, %v7344_v20  ;;  %7303 = vmatpush1.msra.mxu1 %v7171_v32 }
 0xd69   : > { %v7363_v42 = vmul.f32 %v12337_v57, %v7348_v47  ;;  %v7364_v19 = vmul.f32 %v12340_v63, %v7347_v14  ;;  %9773 = vmatmul.mubr.msk.f32.vlgmr.msra.gmra.mxu1 %vm2247_vm10, %v7158_v28  ;;  %v7834_v28 = vld [vmem:[#allocation22 + $0x1c] sm:$0xf] }
 0xd6a   : > { %7530 = vmatprep.mubr.f32.mxu1 %v10694_v1 }
 0xd6b   : > { %v7442_v55 = vpop.permute.xlu0 %7441  ;;  %7398 = vmatprep.subr.mxu0 %v7364_v19  ;;  %v7444_v15 = vpop.permute.xlu1 %7443 }
 0xd6c   : > { %v7445_v44 = vsel %vm3359_vm14, %v7442_v55, %v7444_v15  ;;  %v7446_v62 = vsel %vm3359_vm14, %v7444_v15, %v7442_v55  ;;  %7399 = vmatpush1.msra.mxu0 %v7363_v42 }
 0xd6d   : > { %v7461_v0 = vmul.f32 %v12358_v36, %v7446_v62  ;;  %v7462_v51 = vmul.f32 %v12361_v3, %v7445_v44  ;;  %7588 = vmatprep.subr.mxu0 %v7554_v26  ;;  %9775 = vmatmul.mubr.msk.f32.vlgmr.msra.gmra.mxu0 %vm2247_vm10, %v7350_v30 }
 0xd6e   : > { %7589 = vmatpush1.msra.mxu0 %v7553_v25  ;;  %7622 = vmatprep.mubr.f32.mxu0 %v10694_v1 }
 0xd6f   : > { %v7632_v18 = vpop.permute.xlu0 %7631  ;;  %7496 = vmatprep.subr.mxu1 %v7462_v51  ;;  %v7634_v4 = vpop.permute.xlu1 %7633 }
 0xd70   : > { %v7635_v8 = vsel %vm3576_vm15, %v7632_v18, %v7634_v4  ;;  %v7636_v31 = vsel %vm3576_vm15, %v7634_v4, %v7632_v18  ;;  %7497 = vmatpush1.msra.mxu1 %v7461_v0 }
 0xd71   : > { %v7651_v58 = vmul.f32 %v12375_v27, %v7635_v8  ;;  %v7652_v38 = vmul.f32 %v12381_v35, %v7636_v31  ;;  %9777 = vmatmul.mubr.msk.f32.vlgmr.msra.gmra.mxu1 %vm2247_vm10, %v7448_v61  ;;  %9779 = vmatmul.mubr.msk.f32.vlgmr.msra.gmra.mxu0 %vm2247_vm10, %v7540_v34 }
 0xd72   : > { %7720 = vmatprep.mubr.f32.mxu1 %v10694_v1  ;;  %7818 = vmatprep.mubr.f32.mxu0 %v10694_v1 }
 0xd73   : > { %v7730_v24 = vpop.permute.xlu0 %7729  ;;  %7686 = vmatprep.subr.mxu1 %v7652_v38  ;;  %v7732_v60 = vpop.permute.xlu1 %7731 }
 0xd74   : > { %v7733_v50 = vsel %vm3688_vm2, %v7730_v24, %v7732_v60  ;;  %v7734_v39 = vsel %vm3688_vm2, %v7732_v60, %v7730_v24  ;;  %7687 = vmatpush1.msra.mxu1 %v7651_v58 }
 0xd75   : > { %v7749_v33 = vmul.f32 %v12390_v21, %v7733_v50  ;;  %v7750_v37 = vmul.f32 %v12395_v45, %v7734_v39  ;;  %9781 = vmatmul.mubr.msk.f32.vlgmr.msra.gmra.mxu1 %vm2247_vm10, %v7638_v46 }
 0xd76   : > { %7916 = vmatprep.mubr.f32.mxu1 %v10694_v1 }
 0xd77   : > { %v7828_v17 = vpop.permute.xlu0 %7827  ;;  %v7830_v56 = vpop.permute.xlu1 %7829  ;;  %7784 = vmatprep.subr.mxu0 %v7750_v37 }
 0xd78   : > { %v7831_v29 = vsel %vm3800_vm6, %v7828_v17, %v7830_v56  ;;  %v7832_v53 = vsel %vm3800_vm6, %v7830_v56, %v7828_v17  ;;  %7785 = vmatpush1.msra.mxu0 %v7749_v33 }
 0xd79   : > { %v7847_v2 = vmul.f32 %v12409_v59, %v7831_v29  ;;  %v7848_v32 = vmul.f32 %v12412_v48, %v7832_v53  ;;  %9783 = vmatmul.mubr.msk.f32.vlgmr.msra.gmra.mxu0 %vm2247_vm10, %v7736_v12 }
 0xd7a   : > { %8014 = vmatprep.mubr.f32.mxu0 %v10694_v1 }
 0xd7b   : > { %v7926_v20 = vpop.permute.xlu0 %7925  ;;  %7882 = vmatprep.subr.mxu1 %v7848_v32  ;;  %v7928_v54 = vpop.permute.xlu1 %7927 }
 0xd7c   : > { %v7929_v14 = vsel %vm3912_vm7, %v7926_v20, %v7928_v54  ;;  %v7930_v47 = vsel %vm3912_vm7, %v7928_v54, %v7926_v20  ;;  %7883 = vmatpush1.msra.mxu1 %v7847_v2 }
 0xd7d   : > { %v7945_v42 = vmul.f32 %v12424_v6, %v7929_v14  ;;  %v7946_v19 = vmul.f32 %v12427_v7, %v7930_v47  ;;  %9785 = vmatmul.mubr.msk.f32.vlgmr.msra.gmra.mxu1 %vm2247_vm10, %v7834_v28 }
 0xd7e   : > { %8133 = vmatprep.mubr.f32.mxu1 %v10694_v1 }
 0xd7f   : > { %7980 = vmatprep.subr.mxu0 %v7946_v19 }
 0xd80   : > { %7981 = vmatpush1.msra.mxu0 %v7945_v42 }
 0xd81   : > { %9787 = vmatmul.mubr.msk.f32.vlgmr.msra.gmra.mxu0 %vm2247_vm10, %v7932_v49  ;;  %vm12691_vm10 = vmmov %vm12687_vm0 }
 0xd82   : > { %8213 = vmatprep.mubr.f32.mxu0 %v10694_v1 }
 0xd88   : > { %v8027_v2 = vpop.permute.xlu0 %8026  ;;  %v8035_v54 = vpop.permute.xlu1 %8034 }
 0xe25   : > { %v7264_v30 = vpop.f32.mrf.mxu0 }
 0xe27   : > { %v7266_v55 = vpop.f32.mrf.mxu0 }
 0xe29   : > { %v7338_v15 = vpop.f32.mrf.mxu1 }
 0xe2a   : > { %v7339_v26 = vadd.f32 %v7338_v15, %v7264_v30  ;;  %v8858_v30 = vld [vmem:[%s12686_s8] sm:$0xf] }
 0xe2b   : > { %v7340_v44 = vpop.f32.mrf.mxu1 }
 0xe2c   : > { %v7341_v62 = vadd.f32 %v7340_v44, %v7266_v55  ;;  %v8866_v55 = vld [vmem:[#allocation27] sm:$0xf] }
 0xe2d   : > { %v7434_v25 = vpop.f32.mrf.mxu0 }
 0xe2e   : > { %v7439_v0 = vadd.f32 %v7434_v25, %v7339_v26 }
 0xe2f   : > { %v7436_v51 = vpop.f32.mrf.mxu0 }
 0xe30   : > { %v7440_v23 = vadd.f32 %v7436_v51, %v7341_v62 }
 0xe31   : > { %v7532_v61 = vpop.f32.mrf.mxu1  ;;  %v7624_v34 = vpop.f32.mrf.mxu0 }
 0xe32   : > { %v7537_v18 = vadd.f32 %v7532_v61, %v7439_v0 }
 0xe33   : > { %v7534_v4 = vpop.f32.mrf.mxu1  ;;  %v7626_v58 = vpop.f32.mrf.mxu0 }
 0xe34   : > { %v7538_v8 = vadd.f32 %v7534_v4, %v7440_v23  ;;  %v7629_v31 = vadd.f32 %v7624_v34, %v7537_v18  ;;  %v8057_v23 = vld [vmem:[#allocation25 + $0x4] sm:$0xf] }
 0xe35   : > { %v7722_v38 = vpop.f32.mrf.mxu1 }
 0xe36   : > { %v7630_v16 = vadd.f32 %v7626_v58, %v7538_v8  ;;  %v7727_v46 = vadd.f32 %v7722_v38, %v7629_v31 }
 0xe37   : > { %v7724_v24 = vpop.f32.mrf.mxu1 }
 0xe38   : > { %v7728_v50 = vadd.f32 %v7724_v24, %v7630_v16 }
 0xe39   : > { %v7820_v60 = vpop.f32.mrf.mxu0 }
 0xe3a   : > { %v7825_v39 = vadd.f32 %v7820_v60, %v7727_v46  ;;  %v8227_v46 = vld [vmem:[#allocation25 + $0x8] sm:$0xf] }
 0xe3b   : > { %v7822_v33 = vpop.f32.mrf.mxu0 }
 0xe3c   : > { %v7826_v12 = vadd.f32 %v7822_v33, %v7728_v50 }
 0xe3d   : > { %v7918_v37 = vpop.f32.mrf.mxu1 }
 0xe3e   : > { %v7923_v17 = vadd.f32 %v7918_v37, %v7825_v39 }
 0xe3f   : > { %v7920_v41 = vpop.f32.mrf.mxu1 }
 0xe40   : > { %v7924_v29 = vadd.f32 %v7920_v41, %v7826_v12  ;;  %v8405_v41 = vld [vmem:[#allocation25 + $0x10] sm:$0xf] }
 0xe41   : > { %v8016_v56 = vpop.f32.mrf.mxu0 }
 0xe42   : > { %v8021_v53 = vadd.f32 %v8016_v56, %v7923_v17 }
 0xe43   : > { %v8018_v32 = vpop.f32.mrf.mxu0 }
 0xe44   : > { %v8029_v28 = vmul.f32 %v8027_v2, %v8021_v53  ;;  %v8022_v20 = vadd.f32 %v8018_v32, %v7924_v29  ;;  %v8497_v29 = vld [vmem:[#allocation25 + $0x14] sm:$0xf] }
 0xe46   : > { %v8037_v14 = vadd.f32 %v8035_v54, %v8029_v28  ;;  %v8030_v47 = vmul.f32 %v8027_v2, %v8022_v20  ;;  %v8589_v20 = vld [vmem:[#allocation25 + $0x18] sm:$0xf] }
 0xe48   : > { %v8039_v42 = vmax.f32 %v8037_v14, 0.0  ;;  %v8038_v19 = vadd.f32 %v8035_v54, %v8030_v47 }
 0xe4a   : > { %v8040_v49 = vmax.f32 %v8038_v19, 0.0  ;;  %8050 = vrot.lane.b32.xlu0 %v8039_v42, %s10704_s1 }
 0xe4c   : > { %8052 = vrot.lane.b32.xlu1 %v8040_v49, %s10704_s1  ;;  %v8407_v60 = vmul.f32 %v8040_v49, %v12346_v5  ;;  %v8319_v5 = vld [vmem:[#allocation25 + $0xc] sm:$0xf]  ;;  %s12700_s1 = smov 1  }
 0xe4e   : > { %8041 = vrot.lane.b32.xlu0 %v8039_v42, %s10705_s6 }
 0xe50   : > { %8043 = vrot.lane.b32.xlu1 %v8040_v49, %s10705_s6  ;;  %s12701_s6 = smov 16  }
 0xe52   : > { %8220 = vrot.lane.b32.xlu0 %v8039_v42, %s12681_s7 }
 0xe54   : > { %8222 = vrot.lane.b32.xlu1 %v8040_v49, %s12681_s7  ;;  %s12709_s7 = sshll.u32 %s12711_s2, 3 }
 0xe56   : > { %8312 = vrot.lane.b32.xlu0 %v8039_v42, %s10707_s18 }
 0xe58   : > { %8314 = vrot.lane.b32.xlu1 %v8040_v49, %s10707_s18  ;;  %s12702_s18 = smov 17  }
 0xe5a   : > { %8490 = vrot.lane.b32.xlu0 %v8039_v42, %s12682_s26 }
 0xe5c   : > { %8492 = vrot.lane.b32.xlu1 %v8040_v49, %s12682_s26  ;;  %s1261_s26 = scalar_lea.vmem %s10885_s9, %s12709_s7 }
 0xe5e   : > { %8582 = vrot.lane.b32.xlu0 %v8039_v42, %s12683_s23 }
 0xe60   : > { %8584 = vrot.lane.b32.xlu1 %v8040_v49, %s12683_s23 }
 0xe62   : > { %8674 = vrot.lane.b32.xlu0 %v8039_v42, %s12684_s15 }
 0xe64   : > { %8676 = vrot.lane.b32.xlu1 %v8040_v49, %s12684_s15 }
 0xe66   : > { %8766 = vrot.lane.b32.xlu0 %v8039_v42, %s12685_s10 }
 0xe68   : > { %8768 = vrot.lane.b32.xlu1 %v8040_v49, %s12685_s10 }
 0xe6a   : > { %8861 = vperm.xlu0 %10092, %v8858_v30  }
 0xe6c   : > { %8869 = vperm.xlu1 %10093, %v8866_v55  }
 0xebc   : > { %v8051_v15 = vpop.permute.xlu0 %8050 }
 0xebe   : > { %v8053_v26 = vpop.permute.xlu1 %8052 }
 0xebf   : > { %v8054_v44 = vsel %vm3056_vm11, %v8051_v15, %v8053_v26  ;;  %v8055_v62 = vsel %vm3056_vm11, %v8053_v26, %v8051_v15  ;;  %vm12692_vm11 = vmmov %vm12687_vm0  ;;  %v8773_v15 = vld [vmem:[#allocation25 + $0x20] sm:$0xf] }
 0xec0   : > { %v8058_v25 = vmul.f32 %v8055_v62, %v12310_v40  ;;  %v8059_v0 = vmul.f32 %v8054_v44, %v12313_v43  ;;  %v8042_v51 = vpop.permute.xlu0 %8041  ;;  %v8047_v43 = vld [vmem:[#allocation25] sm:$0xf] }
 0xec2   : > { %9788 = vmatprep.subr.msk.mxu1 %vm1318_vm1, %v8059_v0  ;;  %v8044_v61 = vpop.permute.xlu1 %8043 }
 0xec3   : > { %v8045_v34 = vsel %vm3032_vm12, %v8042_v51, %v8044_v61  ;;  %v8046_v18 = vsel %vm3032_vm12, %v8044_v61, %v8042_v51  ;;  %9789 = vmatpush1.msk.msra.mxu1 %vm1318_vm1, %v8058_v25  ;;  %vm12693_vm12 = vmmov %vm12687_vm0 }
 0xec4   : > { %v8048_v4 = vmul.f32 %v8046_v18, %v12323_v22  ;;  %v8049_v8 = vmul.f32 %v8045_v34, %v12326_v13  ;;  %v8221_v40 = vpop.permute.xlu0 %8220  ;;  %9790 = vmatmul.mubr.msk.f32.vlgmr.msra.gmra.mxu1 %vm12687_vm0, %v8057_v23 }
 0xec5   : > { %8303 = vmatprep.mubr.f32.mxu1 %v10694_v1 }
 0xec6   : > { %9791 = vmatprep.subr.msk.mxu0 %vm1318_vm1, %v8049_v8  ;;  %v8223_v31 = vpop.permute.xlu1 %8222 }
 0xec7   : > { %v8224_v58 = vsel %vm3247_vm13, %v8221_v40, %v8223_v31  ;;  %v8225_v38 = vsel %vm3247_vm13, %v8223_v31, %v8221_v40  ;;  %9792 = vmatpush1.msk.msra.mxu0 %vm1318_vm1, %v8048_v4  ;;  %vm12694_vm13 = vmmov %vm12687_vm0 }
 0xec8   : > { %v8228_v22 = vmul.f32 %v8225_v38, %v12337_v57  ;;  %v8229_v13 = vmul.f32 %v8224_v58, %v12340_v63  ;;  %v8313_v16 = vpop.permute.xlu0 %8312  ;;  %9793 = vmatmul.mubr.msk.f32.vlgmr.msra.gmra.mxu0 %vm12688_vm3, %v8047_v43  ;;  %v8406_v57 = vmul.f32 %v8039_v42, %v12353_v52  ;;  %v8681_v42 = vld [vmem:[#allocation25 + $0x1c] sm:$0xf]  ;;  %vm12707_vm3 = vcmp.lt.s32.totalorder %v11144_v9, 17 }
 0xec9   : > { %8395 = vmatprep.mubr.f32.mxu0 %v10694_v1 }
 0xeca   : > { %9794 = vmatprep.subr.msk.mxu1 %vm1318_vm1, %v8229_v13  ;;  %v8315_v24 = vpop.permute.xlu1 %8314 }
 0xecb   : > { %v8316_v50 = vsel %vm3359_vm14, %v8313_v16, %v8315_v24  ;;  %v8317_v39 = vsel %vm3359_vm14, %v8315_v24, %v8313_v16  ;;  %9795 = vmatpush1.msk.msra.mxu1 %vm1318_vm1, %v8228_v22  ;;  %vm12695_vm14 = vmmov %vm12687_vm0 }
 0xecc   : > { %v8320_v63 = vmul.f32 %v8317_v39, %v12358_v36  ;;  %v8321_v33 = vmul.f32 %v8316_v50, %v12361_v3  ;;  %v8491_v37 = vpop.permute.xlu0 %8490  ;;  %9800 = vmatprep.subr.msk.mxu1 %vm1318_vm1, %v8407_v60  ;;  %9796 = vmatmul.mubr.msk.f32.vlgmr.msra.gmra.mxu1 %vm12689_vm4, %v8227_v46  ;;  %vm12708_vm4 = vmmov %vm12707_vm3 }
 0xecd   : > { %9801 = vmatpush1.msk.msra.mxu1 %vm1318_vm1, %v8406_v57  ;;  %8481 = vmatprep.mubr.f32.mxu1 %v10694_v1 }
 0xece   : > { %9797 = vmatprep.subr.msk.mxu0 %vm1318_vm1, %v8321_v33  ;;  %v8493_v12 = vpop.permute.xlu1 %8492 }
 0xecf   : > { %v8494_v52 = vsel %vm3576_vm15, %v8491_v37, %v8493_v12  ;;  %v8495_v36 = vsel %vm3576_vm15, %v8493_v12, %v8491_v37  ;;  %9798 = vmatpush1.msk.msra.mxu0 %vm1318_vm1, %v8320_v63  ;;  %vm12696_vm15 = vmmov %vm12687_vm0 }
 0xed0   : > { %v8498_v3 = vmul.f32 %v8494_v52, %v12375_v27  ;;  %v8499_v17 = vmul.f32 %v8495_v36, %v12381_v35  ;;  %v8583_v56 = vpop.permute.xlu0 %8582  ;;  %9799 = vmatmul.mubr.msk.f32.vlgmr.msra.gmra.mxu0 %vm12690_vm5, %v8319_v5  ;;  %9802 = vmatmul.mubr.msk.f32.vlgmr.msra.gmra.mxu1 %vm12691_vm10, %v8405_v41 }
 0xed1   : > { %8573 = vmatprep.mubr.f32.mxu0 %v10694_v1  ;;  %8665 = vmatprep.mubr.f32.mxu1 %v10694_v1 }
 0xed2   : > { %9803 = vmatprep.subr.msk.mxu0 %vm1318_vm1, %v8499_v17  ;;  %v8585_v53 = vpop.permute.xlu1 %8584 }
 0xed3   : > { %v8586_v2 = vsel %vm3688_vm2, %v8583_v56, %v8585_v53  ;;  %v8587_v27 = vsel %vm3688_vm2, %v8585_v53, %v8583_v56  ;;  %9804 = vmatpush1.msk.msra.mxu0 %vm1318_vm1, %v8498_v3  ;;  %vm12697_vm2 = vmmov %vm12687_vm0 }
 0xed4   : > { %v8590_v35 = vmul.f32 %v8586_v2, %v12390_v21  ;;  %v8591_v32 = vmul.f32 %v8587_v27, %v12395_v45  ;;  %v8675_v28 = vpop.permute.xlu0 %8674  ;;  %9805 = vmatmul.mubr.msk.f32.vlgmr.msra.gmra.mxu0 %vm12692_vm11, %v8497_v29  ;;  %v8876_v27 = vld [vmem:[#allocation28] sm:$0xf] }
 0xed5   : > { %8757 = vmatprep.mubr.f32.mxu0 %v10694_v1 }
 0xed6   : > { %v8677_v54 = vpop.permute.xlu1 %8676  ;;  %9806 = vmatprep.subr.msk.mxu1 %vm1318_vm1, %v8591_v32  ;;  %v9072_v32 = vld [vmem:[#allocation28 + $0x8] sm:$0xf] }
 0xed7   : > { %v8678_v14 = vsel %vm3800_vm6, %v8675_v28, %v8677_v54  ;;  %v8679_v47 = vsel %vm3800_vm6, %v8677_v54, %v8675_v28  ;;  %9807 = vmatpush1.msk.msra.mxu1 %vm1318_vm1, %v8590_v35  ;;  %v8973_v35 = vld [vmem:[#allocation28 + $0x4] sm:$0xf]  ;;  %v9171_v28 = vld [vmem:[#allocation28 + $0xc] sm:$0xf]  ;;  %vm12698_vm6 = vmmov %vm12687_vm0 }
 0xed8   : > { %v8682_v21 = vmul.f32 %v8678_v14, %v12409_v59  ;;  %v8683_v45 = vmul.f32 %v8679_v47, %v12412_v48  ;;  %9808 = vmatmul.mubr.msk.f32.vlgmr.msra.gmra.mxu1 %vm12693_vm12, %v8589_v20  ;;  %v8767_v19 = vpop.permute.xlu0 %8766 }
 0xed9   : > { %8849 = vmatprep.mubr.f32.mxu1 %v10694_v1 }
 0xeda   : > { %9809 = vmatprep.subr.msk.mxu0 %vm1318_vm1, %v8683_v45  ;;  %v8769_v49 = vpop.permute.xlu1 %8768 }
 0xedb   : > { %v8770_v30 = vsel %vm3912_vm7, %v8767_v19, %v8769_v49  ;;  %v8771_v55 = vsel %vm3912_vm7, %v8769_v49, %v8767_v19  ;;  %9810 = vmatpush1.msk.msra.mxu0 %vm1318_vm1, %v8682_v21  ;;  %vm12699_vm7 = vmmov %vm12687_vm0  ;;  %v9269_v19 = vld [vmem:[#allocation30] sm:$0xf] }
 0xedc   : > { %v8774_v59 = vmul.f32 %v8770_v30, %v12424_v6  ;;  %v8775_v48 = vmul.f32 %v8771_v55, %v12427_v7  ;;  %9811 = vmatmul.mubr.msk.f32.vlgmr.msra.gmra.mxu0 %vm12694_vm13, %v8681_v42  ;;  %v9055_v55 = vld [vmem:[#allocation2 + $0xa] sm:$0x3]  ;;  %vm12706_vm0 = vmmov %vm12705_vm9 }
 0xedd   : > { %8950 = vmatprep.mubr.f32.mxu0 %v10694_v1 }
 0xede   : > { %9812 = vmatprep.subr.msk.mxu1 %vm1318_vm1, %v8775_v48 }
 0xedf   : > { %9813 = vmatpush1.msk.msra.mxu1 %vm1318_vm1, %v8774_v59 }
 0xee0   : > { %9814 = vmatmul.mubr.msk.f32.vlgmr.msra.gmra.mxu1 %vm12695_vm14, %v8773_v15  ;;  %v8958_v15 = vld [vmem:[#allocation2 + $0x8] sm:$0x3] }
 0xee1   : > { %9041 = vmatprep.mubr.f32.mxu1 %v10694_v1 }
 0xee5   : > { %v8862_v41 = vpop.permute.xlu0 %8861 }
 0xee7   : > { %v8870_v3 = vpop.permute.xlu1 %8869 }
 0xf84   : > { %v8135_v26 = vpop.f32.mrf.mxu1 }
 0xf86   : > { %v8137_v44 = vpop.f32.mrf.mxu1 }
 0xf88   : > { %v8215_v62 = vpop.f32.mrf.mxu0 }
 0xf89   : > { %v8216_v25 = vadd.f32 %v8215_v62, %v8135_v26  ;;  %v9154_v26 = vld [vmem:[#allocation2 + $0xc] sm:$0x3]  ;;  %v9064_v62 = vrot.slane %v9055_v55, %v11148_v11 }
 0xf8a   : > { %v8217_v6 = vpop.f32.mrf.mxu0 }
 0xf8b   : > { %v8218_v0 = vadd.f32 %v8217_v6, %v8137_v44  ;;  %v9060_v44 = vrot.slane %v9055_v55, %v11146_v10 }
 0xf8c   : > { %v8305_v7 = vpop.f32.mrf.mxu1 }
 0xf8d   : > { %v8310_v51 = vadd.f32 %v8305_v7, %v8216_v25  ;;  %v8963_v7 = vrot.slane %v8958_v15, %v11146_v10 }
 0xf8e   : > { %v8307_v23 = vpop.f32.mrf.mxu1 }
 0xf8f   : > { %v8311_v61 = vadd.f32 %v8307_v23, %v8218_v0  ;;  %v9253_v0 = vld [vmem:[#allocation2 + $0xe] sm:$0x3]  ;;  %v9159_v23 = vrot.slane %v9154_v26, %v11146_v10 }
 0xf90   : > { %v8397_v34 = vpop.f32.mrf.mxu0  ;;  %v8483_v18 = vpop.f32.mrf.mxu1 }
 0xf91   : > { %v8402_v4 = vadd.f32 %v8397_v34, %v8310_v51  ;;  %v8967_v51 = vrot.slane %v8958_v15, %v11148_v11 }
 0xf92   : > { %v8399_v8 = vpop.f32.mrf.mxu0  ;;  %v8485_v31 = vpop.f32.mrf.mxu1 }
 0xf93   : > { %v8403_v40 = vadd.f32 %v8399_v8, %v8311_v61  ;;  %v8488_v43 = vadd.f32 %v8483_v18, %v8402_v4  ;;  %v9163_v61 = vrot.slane %v9154_v26, %v11148_v11 }
 0xf94   : > { %v8575_v58 = vpop.f32.mrf.mxu0 }
 0xf95   : > { %v8489_v38 = vadd.f32 %v8485_v31, %v8403_v40  ;;  %v8580_v22 = vadd.f32 %v8575_v58, %v8488_v43  ;;  %v9258_v31 = vrot.slane %v9253_v0, %v11146_v10  ;;  %v9262_v58 = vrot.slane %v9253_v0, %v11148_v11 }
 0xf96   : > { %v8577_v13 = vpop.f32.mrf.mxu0 }
 0xf97   : > { %v8581_v46 = vadd.f32 %v8577_v13, %v8489_v38 }
 0xf98   : > { %v8667_v16 = vpop.f32.mrf.mxu1 }
 0xf99   : > { %v8672_v24 = vadd.f32 %v8667_v16, %v8580_v22 }
 0xf9a   : > { %v8669_v60 = vpop.f32.mrf.mxu1 }
 0xf9b   : > { %v8673_v57 = vadd.f32 %v8669_v60, %v8581_v46 }
 0xf9c   : > { %v8759_v50 = vpop.f32.mrf.mxu0 }
 0xf9d   : > { %v8764_v63 = vadd.f32 %v8759_v50, %v8672_v24 }
 0xf9e   : > { %v8761_v39 = vpop.f32.mrf.mxu0 }
 0xf9f   : > { %v8765_v37 = vadd.f32 %v8761_v39, %v8673_v57 }
 0xfa0   : > { %v8851_v33 = vpop.f32.mrf.mxu1 }
 0xfa1   : > { %v8856_v5 = vadd.f32 %v8851_v33, %v8764_v63 }
 0xfa2   : > { %v8853_v12 = vpop.f32.mrf.mxu1 }
 0xfa3   : > { %v8864_v52 = vmul.f32 %v8862_v41, %v8856_v5  ;;  %v8857_v36 = vadd.f32 %v8853_v12, %v8765_v37 }
 0xfa5   : > { %v8865_v17 = vmul.f32 %v8862_v41, %v8857_v36  ;;  %v8872_v56 = vadd.f32 %v8870_v3, %v8864_v52 }
 0xfa7   : > { %v8873_v29 = vadd.f32 %v8870_v3, %v8865_v17  ;;  %v8874_v2 = vmax.f32 %v8872_v56, 0.0 }
 0xfa9   : > { %v8875_v53 = vmax.f32 %v8873_v29, 0.0 }
 0xfab   : > { %9815 = vmatprep.subr.msk.mxu0 %vm1318_vm1, %v8875_v53  ;;  %9818 = vmatprep.subr.msk.mxu1 %vm1318_vm1, %v8875_v53 }
 0xfac   : > { %9816 = vmatpush1.msk.msra.mxu0 %vm1318_vm1, %v8874_v2  ;;  %9819 = vmatpush1.msk.msra.mxu1 %vm1318_vm1, %v8874_v2 }
 0xfad   : > { %9817 = vmatmul.mubr.msk.f32.vlgmr.msra.gmra.mxu0 %vm12696_vm15, %v8876_v27  ;;  %9820 = vmatmul.mubr.msk.f32.vlgmr.msra.gmra.mxu1 %vm12697_vm2, %v8973_v35 }
 0xfae   : > { %9821 = vmatprep.subr.msk.mxu0 %vm1318_vm1, %v8875_v53  ;;  %9824 = vmatprep.subr.msk.mxu1 %vm1318_vm1, %v8875_v53 }
 0xfaf   : > { %9822 = vmatpush1.msk.msra.mxu0 %vm1318_vm1, %v8874_v2  ;;  %9825 = vmatpush1.msk.msra.mxu1 %vm1318_vm1, %v8874_v2  ;;  %vm12703_vm1 = vcmp.lt.s32.totalorder %v11144_v9, 1 }
 0xfb0   : > { %9140 = vmatprep.mubr.f32.mxu0 %v10694_v1  ;;  %9239 = vmatprep.mubr.f32.mxu1 %v10694_v1  ;;  %vm12704_vm8 = vmmov %vm12703_vm1 }
 0xfb1   : > { %9823 = vmatmul.mubr.msk.f32.vlgmr.msra.gmra.mxu0 %vm12698_vm6, %v9072_v32  ;;  %9826 = vmatmul.mubr.msk.f32.vlgmr.msra.gmra.mxu1 %vm12699_vm7, %v9171_v28 }
0x106d   : > { %v8952_v20 = vpop.f32.mrf.mxu0  ;;  %v9043_v54 = vpop.f32.mrf.mxu1 }
0x106e   : > { %9048 = vrot.lane.b32.xlu0 %v9043_v54, %s12700_s1  ;;  %v8970_v13 = vmul.f32 %v8963_v7, %v8952_v20 }
0x106f   : > { %v8954_v14 = vpop.f32.mrf.mxu0  ;;  %v9045_v47 = vpop.f32.mrf.mxu1 }
0x1070   : > { %9050 = vrot.lane.b32.xlu1 %v9045_v47, %s12700_s1  ;;  %v8971_v16 = vmul.f32 %v8967_v51, %v8954_v14 }
0x1071   : > { %v9142_v21 = vpop.f32.mrf.mxu0  ;;  %v9241_v42 = vpop.f32.mrf.mxu1 }
0x1072   : > { %9147 = vrot.lane.b32.xlu0 %v9142_v21, %s12701_s6 }
0x1073   : > { %v9144_v45 = vpop.f32.mrf.mxu0  ;;  %v9243_v1 = vpop.f32.mrf.mxu1 }
0x1074   : > { %9149 = vrot.lane.b32.xlu1 %v9144_v45, %s12701_s6 }
0x1076   : > { %9246 = vrot.lane.b32.xlu0 %v9241_v42, %s12702_s18 }
0x1078   : > { %9248 = vrot.lane.b32.xlu1 %v9243_v1, %s12702_s18 }
0x107a   : > { %9272 = vperm.xlu0 %10092, %v9269_v19  }
0x10e0   : > { %v9049_v49 = vpop.permute.xlu0 %9048 }
0x10e2   : > { %v9051_v30 = vpop.permute.xlu1 %9050 }
0x10e3   : > { %v9052_v25 = vsel %vm12703_vm1, %v9049_v49, %v9051_v30  ;;  %v9053_v6 = vsel %vm12704_vm8, %v9051_v30, %v9049_v49 }
0x10e4   : > { %v9148_v59 = vpop.permute.xlu0 %9147  ;;  %v9067_v8 = vmul.f32 %v9060_v44, %v9053_v6  ;;  %v9068_v40 = vmul.f32 %v9064_v62, %v9052_v25 }
0x10e6   : > { %v9150_v48 = vpop.permute.xlu1 %9149  ;;  %v9069_v60 = vadd.f32 %v9067_v8, %v8970_v13  ;;  %v9070_v50 = vadd.f32 %v9068_v40, %v8971_v16 }
0x10e7   : > { %v9151_v18 = vsel %vm12705_vm9, %v9148_v59, %v9150_v48  ;;  %v9152_v4 = vsel %vm12706_vm0, %v9150_v48, %v9148_v59 }
0x10e8   : > { %v9247_v43 = vpop.permute.xlu0 %9246  ;;  %v9166_v46 = vmul.f32 %v9159_v23, %v9152_v4  ;;  %v9167_v24 = vmul.f32 %v9163_v61, %v9151_v18 }
0x10ea   : > { %v9249_v34 = vpop.permute.xlu1 %9248  ;;  %v9168_v63 = vadd.f32 %v9166_v46, %v9069_v60  ;;  %v9169_v10 = vadd.f32 %v9167_v24, %v9070_v50 }
0x10eb   : > { %v9250_v38 = vsel %vm12707_vm3, %v9247_v43, %v9249_v34  ;;  %v9251_v22 = vsel %vm12708_vm4, %v9249_v34, %v9247_v43 }
0x10ec   : > { %v9265_v39 = vmul.f32 %v9258_v31, %v9251_v22  ;;  %v9266_v57 = vmul.f32 %v9262_v58, %v9250_v38 }
0x10ee   : > { %v9267_v33 = vadd.f32 %v9265_v39, %v9168_v63  ;;  %v9268_v11 = vadd.f32 %v9266_v57, %v9169_v10 }
0x10f5   : > { %v9273_v37 = vpop.permute.xlu0 %9272 }
0x10f6   : > { %v9275_v5 = vadd.f32 %v9273_v37, %v9267_v33  ;;  %v9276_v41 = vadd.f32 %v9273_v37, %v9268_v11 }
0x10f8   : > { %v9279_v9 = vcombine.low %v9275_v5, %v9276_v41 }
0x10fa   : > { %9281 = vst [vmem:[%s1261_s26] sm:$0xff] %v9279_v9 }
0x10fb PF: > { %s86_s28 = sadd.s32 1, %s10635_s28  }
0x10fc   : > { %p83_p10 = scmp.ge.s32.totalorder %s86_s28, 4  }
0x10fe   :  { %85 = sbr.rel (!%p83_p10) target bundleno = 63 (0x3f), region = 398 }
0x1103   :  { %9319 = vsyncpa [#allocation3], 1 }
0x1104   :  { %9321 = vsyncpa [#allocation3 + $0x1], 1 }
0x1105   :  { %9322 = vsyncpa [#allocation5], 1 }
0x1106   :  { %9323 = vsyncpa [#allocation8], 1 }
0x1107   :  { %9324 = vsyncpa [#allocation11], 1 }
0x1108   :  { %9325 = vsyncpa [#allocation14], 1 }
0x1109   :  { %9326 = vsyncpa [#allocation17], 1 }
0x110a   :  { %9327 = vsyncpa [#allocation20], 1 }
0x110b   :  { %9328 = vsyncpa [#allocation23], 1 }
0x110c   :  { %9329 = vsyncpa [#allocation26], 1 }
0x110d   :  { %9330 = vsyncpa [#allocation29], 1 }

</bundles_post_ra>
